<compile_context>
chip_gen: v7x
topology: tpu7x:2x2x1
jax: 0.10.0
libtpu: 0.0.40
codegen_flags: <defaults>
</compile_context>

<pallas_src>
import functools

import jax
import jax.numpy as jnp
from jax.experimental import pallas as pl
from jax.experimental.pallas import tpu as pltpu


def _tree_max(parts):
    """Pairwise (tree) reduction with jnp.maximum (short dep chains, VALU-friendly)."""
    while len(parts) > 1:
        nxt = [jnp.maximum(parts[i], parts[i + 1])
               for i in range(0, len(parts) - 1, 2)]
        if len(parts) % 2:
            nxt.append(parts[-1])
        parts = nxt
    return parts[0]


def _pool_valid(a, w):
    """'Valid' w x w stride-1 max pool of a (Hs, Ws, C) value -> (Hs-w+1, Ws-w+1, C)."""
    Hs, Ws = a.shape[0], a.shape[1]
    Ho, Wo = Hs - (w - 1), Ws - (w - 1)
    # Separable max pool: H axis first (slices along the untiled leading dim are
    # cheap), then the W (sublane) reduction runs on the H-shrunk intermediate.
    r = _tree_max([a[dy:dy + Ho] for dy in range(w)])
    return _tree_max([r[:, dx:dx + Wo] for dx in range(w)])


def _spp_kernel(x_ref, o_ref, xp_ref, *, H, W, PMAX, pool_sizes):
    # x_ref : (1, H, W, Cb)                  channels-last input tile
    # o_ref : (1, G, H, W, Cb)               stacked output tile, G = len(pools)+1
    # xp_ref: (H+2*PMAX, W+2*PMAX, Cb) VMEM  -inf-padded scratch
    dtype = x_ref.dtype
    if jnp.issubdtype(dtype, jnp.floating):
        neg = dtype.type(-jnp.inf)
    else:  # integer inputs: iinfo.min behaves like -inf for max pooling
        neg = dtype.type(jnp.iinfo(dtype).min)

    G = len(pool_sizes) + 1
    Hp, Wp = H + 2 * PMAX, W + 2 * PMAX
    Cb = x_ref.shape[-1]

    x = x_ref[0]                                   # (H, W, Cb)

    # Identity branch first: cheap store that the pipeline can retire early.
    o_ref[0, G - 1] = x

    # Fill only the -inf halo *frame* (interior is written once with x below).
    if PMAX > 0:
        xp_ref[0:PMAX, :, :] = jnp.full((PMAX, Wp, Cb), neg, dtype)
        xp_ref[PMAX + H:Hp, :, :] = jnp.full((PMAX, Wp, Cb), neg, dtype)
        xp_ref[PMAX:PMAX + H, 0:PMAX, :] = jnp.full((H, PMAX, Cb), neg, dtype)
        xp_ref[PMAX:PMAX + H, PMAX + W:Wp, :] = jnp.full((H, PMAX, Cb), neg, dtype)
    xp_ref[PMAX:PMAX + H, PMAX:PMAX + W, :] = x
    xp = xp_ref[...]                               # (Hp, Wp, Cb)

    # SPPF cascade: pool_{k_i} = pool_{k_i - k_{i-1} + 1}(pool_{k_{i-1}}).
    # Exact for stride-1 max pooling with -inf padding (max windows compose);
    # intermediates keep exactly enough -inf halo for the subsequent crops.
    ks = sorted(set(pool_sizes))
    rev = tuple(reversed(pool_sizes))              # reference concat order
    cur, cur_pad, prev_k = xp, PMAX, 1
    for k in ks:
        w = k - prev_k + 1                         # e.g. 5, 5, 5 for (5, 9, 13)
        cur = _pool_valid(cur, w)
        cur_pad -= (w - 1) // 2                    # remaining halo around pool_k(x)
        prev_k = k
        # Store this stage's output(s) as soon as they are available.
        for g, kk in enumerate(rev):
            if kk == k:
                o_ref[0, g] = cur[cur_pad:cur_pad + H, cur_pad:cur_pad + W, :]


def _choose_cb(C, H, W, PMAX, G, itemsize):
    """Pick the channel block: full C when small, else a 128-multiple split
    keeping double-buffered in/out blocks + scratch under ~40 MiB (v7x-safe)."""
    if C % 128 != 0:
        return C
    Hp, Wp = H + 2 * PMAX, W + 2 * PMAX

    def vmem_est(cb):
        io = 2 * (H * W * cb + G * H * W * cb) * itemsize     # double-buffered in/out
        scratch = 3 * Hp * Wp * cb * itemsize                 # pad buffer + cascade temps
        return io + scratch

    budget = 40 * 1024 * 1024
    cb = C
    while cb > 128 and cb % 256 == 0 and vmem_est(cb) > budget:
        cb //= 2
    return cb


def spatial_pyramid_pooling(x, pool_sizes=(5, 9, 13)):
    """x: (N, C, H, W) array -> (N, (len(pool_sizes)+1)*C, H, W)."""
    N, C, H, W = x.shape
    for k in pool_sizes:
        assert k % 2 == 1 and k >= 1, "pool sizes must be odd (PyTorch 'same' pooling)"
    PMAX = max(pool_sizes) // 2
    G = len(pool_sizes) + 1
    Hp, Wp = H + 2 * PMAX, W + 2 * PMAX

    Cb = _choose_cb(C, H, W, PMAX, G, x.dtype.itemsize)
    assert C % Cb == 0

    # Channels-last only inside the kernel; NCHW at the JAX boundary.
    x_nhwc = jnp.transpose(x, (0, 2, 3, 1))        # (N, H, W, C)

    kernel = functools.partial(
        _spp_kernel, H=H, W=W, PMAX=PMAX, pool_sizes=tuple(pool_sizes)
    )

    stacked = pl.pallas_call(
        kernel,
        out_shape=jax.ShapeDtypeStruct((N, G, H, W, C), x.dtype),
        grid_spec=pltpu.PrefetchScalarGridSpec(
            num_scalar_prefetch=0,
            grid=(N, C // Cb),
            in_specs=[
                pl.BlockSpec((1, H, W, Cb), lambda n, c: (n, 0, 0, c)),
            ],
            out_specs=pl.BlockSpec((1, G, H, W, Cb), lambda n, c: (n, 0, 0, 0, c)),
            scratch_shapes=[pltpu.VMEM((Hp, Wp, Cb), x.dtype)],
        ),
        compiler_params=pltpu.CompilerParams(
            dimension_semantics=("parallel", "parallel"),
            vmem_limit_bytes=64 * 1024 * 1024,
        ),
    )(x_nhwc)

    # (N, G, H, W, C) -> (N, G, C, H, W) -> (N, G*C, H, W) == torch.cat(..., dim=1)
    return jnp.transpose(stacked, (0, 1, 4, 2, 3)).reshape(N, G * C, H, W)


def _reference_spp(x, pool_sizes=(5, 9, 13)):
    # Plain-JAX reference using reduce_window (matches nn.MaxPool2d(k, 1, k//2)).
    def maxpool(x, k):
        p = k // 2
        return jax.lax.reduce_window(
            x,
            -jnp.inf,
            jax.lax.max,
            window_dimensions=(1, 1, k, k),
            window_strides=(1, 1, 1, 1),
            padding=((0, 0), (0, 0), (p, p), (p, p)),
        )

    feats = [maxpool(x, k) for k in reversed(pool_sizes)] + [x]
    return jnp.concatenate(feats, axis=1)


if __name__ == "__main__":
    key = jax.random.PRNGKey(0)
    N, C, H, W = 2, 4, 16, 16
    x = jax.random.normal(key, (N, C, H, W), dtype=jnp.float32)

    out = jax.block_until_ready(spatial_pyramid_pooling(x))
    ref = jax.block_until_ready(_reference_spp(x))

    assert out.shape == (N, 4 * C, H, W), out.shape
    assert jnp.array_equal(out, ref), "mismatch vs reference"

    print("KERNEL_OK")
</pallas_src>

<mosaic_0001>
module attributes {stable_mosaic.version = 11 : i64} {
  func.func @_spp_kernel(%arg0: i32, %arg1: i32, %arg2: memref<1x16x16x4xf32, #tpu.memory_space<vmem>>, %arg3: memref<1x4x16x16x4xf32, #tpu.memory_space<vmem>>, %arg4: memref<28x28x4xf32, #tpu.memory_space<vmem>>) attributes {dimension_semantics = [#tpu.dimension_semantics<parallel>, #tpu.dimension_semantics<parallel>], iteration_bounds = array<i64: 2, 1>, scalar_prefetch = 0 : i64, scratch_operands = 1 : i64, tpu.core_type = #tpu.core_type<tc>, window_params = [{transform_indices = @transform_0, window_bounds = array<i64: 1, 16, 16, 4>}, {transform_indices = @transform_1, window_bounds = array<i64: 1, 4, 16, 16, 4>}]} {
    %c0 = arith.constant 0 : index
    %c0_0 = arith.constant 0 : index
    %c0_1 = arith.constant 0 : index
    %c0_2 = arith.constant 0 : index
    %0 = vector.load %arg2[%c0, %c0_0, %c0_1, %c0_2] : memref<1x16x16x4xf32, #tpu.memory_space<vmem>>, vector<1x16x16x4xf32>
    %1 = vector.shape_cast %0 : vector<1x16x16x4xf32> to vector<16x16x4xf32>
    %c0_3 = arith.constant 0 : index
    %c3 = arith.constant 3 : index
    %c0_4 = arith.constant 0 : index
    %c0_5 = arith.constant 0 : index
    %c0_6 = arith.constant 0 : index
    %2 = vector.load %arg3[%c0_3, %c3, %c0_4, %c0_5, %c0_6] : memref<1x4x16x16x4xf32, #tpu.memory_space<vmem>>, vector<1x1x16x16x4xf32>
    %3 = vector.shape_cast %2 : vector<1x1x16x16x4xf32> to vector<16x16x4xf32>
    %4 = vector.shape_cast %1 : vector<16x16x4xf32> to vector<1x1x16x16x4xf32>
    tpu.vector_store %arg3[%c0_3, %c3, %c0_4, %c0_5, %c0_6], %4 {strides = array<i32>} : memref<1x4x16x16x4xf32, #tpu.memory_space<vmem>>, vector<1x1x16x16x4xf32>,
    %cst = arith.constant 0xFF800000 : f32
    %5 = vector.broadcast %cst : f32 to vector<6x28x4xf32>
    %c0_7 = arith.constant 0 : index
    %c0_8 = arith.constant 0 : index
    %c0_9 = arith.constant 0 : index
    %6 = vector.load %arg4[%c0_7, %c0_8, %c0_9] : memref<28x28x4xf32, #tpu.memory_space<vmem>>, vector<6x28x4xf32>
    tpu.vector_store %arg4[%c0_7, %c0_8, %c0_9], %5 {strides = array<i32>} : memref<28x28x4xf32, #tpu.memory_space<vmem>>, vector<6x28x4xf32>,
    %cst_10 = arith.constant 0xFF800000 : f32
    %7 = vector.broadcast %cst_10 : f32 to vector<6x28x4xf32>
    %c22 = arith.constant 22 : index
    %c0_11 = arith.constant 0 : index
    %c0_12 = arith.constant 0 : index
    %8 = vector.load %arg4[%c22, %c0_11, %c0_12] : memref<28x28x4xf32, #tpu.memory_space<vmem>>, vector<6x28x4xf32>
    tpu.vector_store %arg4[%c22, %c0_11, %c0_12], %7 {strides = array<i32>} : memref<28x28x4xf32, #tpu.memory_space<vmem>>, vector<6x28x4xf32>,
    %cst_13 = arith.constant 0xFF800000 : f32
    %9 = vector.broadcast %cst_13 : f32 to vector<16x6x4xf32>
    %c6 = arith.constant 6 : index
    %c0_14 = arith.constant 0 : index
    %c0_15 = arith.constant 0 : index
    %10 = vector.load %arg4[%c6, %c0_14, %c0_15] : memref<28x28x4xf32, #tpu.memory_space<vmem>>, vector<16x6x4xf32>
    tpu.vector_store %arg4[%c6, %c0_14, %c0_15], %9 {strides = array<i32>} : memref<28x28x4xf32, #tpu.memory_space<vmem>>, vector<16x6x4xf32>,
    %cst_16 = arith.constant 0xFF800000 : f32
    %11 = vector.broadcast %cst_16 : f32 to vector<16x6x4xf32>
    %c6_17 = arith.constant 6 : index
    %c22_18 = arith.constant 22 : index
    %c0_19 = arith.constant 0 : index
    %12 = vector.load %arg4[%c6_17, %c22_18, %c0_19] : memref<28x28x4xf32, #tpu.memory_space<vmem>>, vector<16x6x4xf32>
    tpu.vector_store %arg4[%c6_17, %c22_18, %c0_19], %11 {strides = array<i32>} : memref<28x28x4xf32, #tpu.memory_space<vmem>>, vector<16x6x4xf32>,
    %c6_20 = arith.constant 6 : index
    %c6_21 = arith.constant 6 : index
    %c0_22 = arith.constant 0 : index
    %13 = vector.load %arg4[%c6_20, %c6_21, %c0_22] : memref<28x28x4xf32, #tpu.memory_space<vmem>>, vector<16x16x4xf32>
    tpu.vector_store %arg4[%c6_20, %c6_21, %c0_22], %1 {strides = array<i32>} : memref<28x28x4xf32, #tpu.memory_space<vmem>>, vector<16x16x4xf32>,
    %c0_23 = arith.constant 0 : index
    %c0_24 = arith.constant 0 : index
    %c0_25 = arith.constant 0 : index
    %14 = vector.load %arg4[%c0_23, %c0_24, %c0_25] : memref<28x28x4xf32, #tpu.memory_space<vmem>>, vector<28x28x4xf32>
    %15 = vector.extract_strided_slice %14 {offsets = [0, 0, 0], sizes = [24, 28, 4], strides = [1, 1, 1]} : vector<28x28x4xf32> to vector<24x28x4xf32>
    %16 = vector.extract_strided_slice %14 {offsets = [1, 0, 0], sizes = [24, 28, 4], strides = [1, 1, 1]} : vector<28x28x4xf32> to vector<24x28x4xf32>
    %17 = vector.extract_strided_slice %14 {offsets = [2, 0, 0], sizes = [24, 28, 4], strides = [1, 1, 1]} : vector<28x28x4xf32> to vector<24x28x4xf32>
    %18 = vector.extract_strided_slice %14 {offsets = [3, 0, 0], sizes = [24, 28, 4], strides = [1, 1, 1]} : vector<28x28x4xf32> to vector<24x28x4xf32>
    %19 = vector.extract_strided_slice %14 {offsets = [4, 0, 0], sizes = [24, 28, 4], strides = [1, 1, 1]} : vector<28x28x4xf32> to vector<24x28x4xf32>
    %20 = arith.maximumf %15, %16 : vector<24x28x4xf32>
    %21 = arith.maximumf %17, %18 : vector<24x28x4xf32>
    %22 = arith.maximumf %20, %21 : vector<24x28x4xf32>
    %23 = arith.maximumf %22, %19 : vector<24x28x4xf32>
    %24 = vector.extract_strided_slice %23 {offsets = [0, 0, 0], sizes = [24, 24, 4], strides = [1, 1, 1]} : vector<24x28x4xf32> to vector<24x24x4xf32>
    %25 = vector.extract_strided_slice %23 {offsets = [0, 1, 0], sizes = [24, 24, 4], strides = [1, 1, 1]} : vector<24x28x4xf32> to vector<24x24x4xf32>
    %26 = vector.extract_strided_slice %23 {offsets = [0, 2, 0], sizes = [24, 24, 4], strides = [1, 1, 1]} : vector<24x28x4xf32> to vector<24x24x4xf32>
    %27 = vector.extract_strided_slice %23 {offsets = [0, 3, 0], sizes = [24, 24, 4], strides = [1, 1, 1]} : vector<24x28x4xf32> to vector<24x24x4xf32>
    %28 = vector.extract_strided_slice %23 {offsets = [0, 4, 0], sizes = [24, 24, 4], strides = [1, 1, 1]} : vector<24x28x4xf32> to vector<24x24x4xf32>
    %29 = arith.maximumf %24, %25 : vector<24x24x4xf32>
    %30 = arith.maximumf %26, %27 : vector<24x24x4xf32>
    %31 = arith.maximumf %29, %30 : vector<24x24x4xf32>
    %32 = arith.maximumf %31, %28 : vector<24x24x4xf32>
    %33 = vector.extract_strided_slice %32 {offsets = [4, 4, 0], sizes = [16, 16, 4], strides = [1, 1, 1]} : vector<24x24x4xf32> to vector<16x16x4xf32>
    %c0_26 = arith.constant 0 : index
    %c2 = arith.constant 2 : index
    %c0_27 = arith.constant 0 : index
    %c0_28 = arith.constant 0 : index
    %c0_29 = arith.constant 0 : index
    %34 = vector.load %arg3[%c0_26, %c2, %c0_27, %c0_28, %c0_29] : memref<1x4x16x16x4xf32, #tpu.memory_space<vmem>>, vector<1x1x16x16x4xf32>
    %35 = vector.shape_cast %34 : vector<1x1x16x16x4xf32> to vector<16x16x4xf32>
    %36 = vector.shape_cast %33 : vector<16x16x4xf32> to vector<1x1x16x16x4xf32>
    tpu.vector_store %arg3[%c0_26, %c2, %c0_27, %c0_28, %c0_29], %36 {strides = array<i32>} : memref<1x4x16x16x4xf32, #tpu.memory_space<vmem>>, vector<1x1x16x16x4xf32>,
    %37 = vector.extract_strided_slice %32 {offsets = [0, 0, 0], sizes = [20, 24, 4], strides = [1, 1, 1]} : vector<24x24x4xf32> to vector<20x24x4xf32>
    %38 = vector.extract_strided_slice %32 {offsets = [1, 0, 0], sizes = [20, 24, 4], strides = [1, 1, 1]} : vector<24x24x4xf32> to vector<20x24x4xf32>
    %39 = vector.extract_strided_slice %32 {offsets = [2, 0, 0], sizes = [20, 24, 4], strides = [1, 1, 1]} : vector<24x24x4xf32> to vector<20x24x4xf32>
    %40 = vector.extract_strided_slice %32 {offsets = [3, 0, 0], sizes = [20, 24, 4], strides = [1, 1, 1]} : vector<24x24x4xf32> to vector<20x24x4xf32>
    %41 = vector.extract_strided_slice %32 {offsets = [4, 0, 0], sizes = [20, 24, 4], strides = [1, 1, 1]} : vector<24x24x4xf32> to vector<20x24x4xf32>
    %42 = arith.maximumf %37, %38 : vector<20x24x4xf32>
    %43 = arith.maximumf %39, %40 : vector<20x24x4xf32>
    %44 = arith.maximumf %42, %43 : vector<20x24x4xf32>
    %45 = arith.maximumf %44, %41 : vector<20x24x4xf32>
    %46 = vector.extract_strided_slice %45 {offsets = [0, 0, 0], sizes = [20, 20, 4], strides = [1, 1, 1]} : vector<20x24x4xf32> to vector<20x20x4xf32>
    %47 = vector.extract_strided_slice %45 {offsets = [0, 1, 0], sizes = [20, 20, 4], strides = [1, 1, 1]} : vector<20x24x4xf32> to vector<20x20x4xf32>
    %48 = vector.extract_strided_slice %45 {offsets = [0, 2, 0], sizes = [20, 20, 4], strides = [1, 1, 1]} : vector<20x24x4xf32> to vector<20x20x4xf32>
    %49 = vector.extract_strided_slice %45 {offsets = [0, 3, 0], sizes = [20, 20, 4], strides = [1, 1, 1]} : vector<20x24x4xf32> to vector<20x20x4xf32>
    %50 = vector.extract_strided_slice %45 {offsets = [0, 4, 0], sizes = [20, 20, 4], strides = [1, 1, 1]} : vector<20x24x4xf32> to vector<20x20x4xf32>
    %51 = arith.maximumf %46, %47 : vector<20x20x4xf32>
    %52 = arith.maximumf %48, %49 : vector<20x20x4xf32>
    %53 = arith.maximumf %51, %52 : vector<20x20x4xf32>
    %54 = arith.maximumf %53, %50 : vector<20x20x4xf32>
    %55 = vector.extract_strided_slice %54 {offsets = [2, 2, 0], sizes = [16, 16, 4], strides = [1, 1, 1]} : vector<20x20x4xf32> to vector<16x16x4xf32>
    %c0_30 = arith.constant 0 : index
    %c1 = arith.constant 1 : index
    %c0_31 = arith.constant 0 : index
    %c0_32 = arith.constant 0 : index
    %c0_33 = arith.constant 0 : index
    %56 = vector.load %arg3[%c0_30, %c1, %c0_31, %c0_32, %c0_33] : memref<1x4x16x16x4xf32, #tpu.memory_space<vmem>>, vector<1x1x16x16x4xf32>
    %57 = vector.shape_cast %56 : vector<1x1x16x16x4xf32> to vector<16x16x4xf32>
    %58 = vector.shape_cast %55 : vector<16x16x4xf32> to vector<1x1x16x16x4xf32>
    tpu.vector_store %arg3[%c0_30, %c1, %c0_31, %c0_32, %c0_33], %58 {strides = array<i32>} : memref<1x4x16x16x4xf32, #tpu.memory_space<vmem>>, vector<1x1x16x16x4xf32>,
    %59 = vector.extract_strided_slice %54 {offsets = [0, 0, 0], sizes = [16, 20, 4], strides = [1, 1, 1]} : vector<20x20x4xf32> to vector<16x20x4xf32>
    %60 = vector.extract_strided_slice %54 {offsets = [1, 0, 0], sizes = [16, 20, 4], strides = [1, 1, 1]} : vector<20x20x4xf32> to vector<16x20x4xf32>
    %61 = vector.extract_strided_slice %54 {offsets = [2, 0, 0], sizes = [16, 20, 4], strides = [1, 1, 1]} : vector<20x20x4xf32> to vector<16x20x4xf32>
    %62 = vector.extract_strided_slice %54 {offsets = [3, 0, 0], sizes = [16, 20, 4], strides = [1, 1, 1]} : vector<20x20x4xf32> to vector<16x20x4xf32>
    %63 = vector.extract_strided_slice %54 {offsets = [4, 0, 0], sizes = [16, 20, 4], strides = [1, 1, 1]} : vector<20x20x4xf32> to vector<16x20x4xf32>
    %64 = arith.maximumf %59, %60 : vector<16x20x4xf32>
    %65 = arith.maximumf %61, %62 : vector<16x20x4xf32>
    %66 = arith.maximumf %64, %65 : vector<16x20x4xf32>
    %67 = arith.maximumf %66, %63 : vector<16x20x4xf32>
    %68 = vector.extract_strided_slice %67 {offsets = [0, 0, 0], sizes = [16, 16, 4], strides = [1, 1, 1]} : vector<16x20x4xf32> to vector<16x16x4xf32>
    %69 = vector.extract_strided_slice %67 {offsets = [0, 1, 0], sizes = [16, 16, 4], strides = [1, 1, 1]} : vector<16x20x4xf32> to vector<16x16x4xf32>
    %70 = vector.extract_strided_slice %67 {offsets = [0, 2, 0], sizes = [16, 16, 4], strides = [1, 1, 1]} : vector<16x20x4xf32> to vector<16x16x4xf32>
    %71 = vector.extract_strided_slice %67 {offsets = [0, 3, 0], sizes = [16, 16, 4], strides = [1, 1, 1]} : vector<16x20x4xf32> to vector<16x16x4xf32>
    %72 = vector.extract_strided_slice %67 {offsets = [0, 4, 0], sizes = [16, 16, 4], strides = [1, 1, 1]} : vector<16x20x4xf32> to vector<16x16x4xf32>
    %73 = arith.maximumf %68, %69 : vector<16x16x4xf32>
    %74 = arith.maximumf %70, %71 : vector<16x16x4xf32>
    %75 = arith.maximumf %73, %74 : vector<16x16x4xf32>
    %76 = arith.maximumf %75, %72 : vector<16x16x4xf32>
    %c0_34 = arith.constant 0 : index
    %c0_35 = arith.constant 0 : index
    %c0_36 = arith.constant 0 : index
    %c0_37 = arith.constant 0 : index
    %c0_38 = arith.constant 0 : index
    %77 = vector.load %arg3[%c0_34, %c0_35, %c0_36, %c0_37, %c0_38] : memref<1x4x16x16x4xf32, #tpu.memory_space<vmem>>, vector<1x1x16x16x4xf32>
    %78 = vector.shape_cast %77 : vector<1x1x16x16x4xf32> to vector<16x16x4xf32>
    %79 = vector.shape_cast %76 : vector<16x16x4xf32> to vector<1x1x16x16x4xf32>
    tpu.vector_store %arg3[%c0_34, %c0_35, %c0_36, %c0_37, %c0_38], %79 {strides = array<i32>} : memref<1x4x16x16x4xf32, #tpu.memory_space<vmem>>, vector<1x1x16x16x4xf32>,
    return
  }
  func.func @transform_0(%arg0: i32, %arg1: i32) -> (i32, i32, i32, i32) {
    %c0_i32 = arith.constant 0 : i32
    %c0_i32_0 = arith.constant 0 : i32
    %c0_i32_1 = arith.constant 0 : i32
    return %arg0, %c0_i32, %c0_i32_0, %arg1 : i32, i32, i32, i32
  }
  func.func @transform_1(%arg0: i32, %arg1: i32) -> (i32, i32, i32, i32, i32) {
    %c0_i32 = arith.constant 0 : i32
    %c0_i32_0 = arith.constant 0 : i32
    %c0_i32_1 = arith.constant 0 : i32
    %c0_i32_2 = arith.constant 0 : i32
    return %arg0, %c0_i32, %c0_i32_0, %c0_i32_1, %arg1 : i32, i32, i32, i32, i32
  }
}

</mosaic_0001>

<bundles_post_ra>
// kernel: tpu_custom_call.1
= control target key start
LH: loop header
LB: loop body
LE: loop exit
PB: predicated region body
PF: predicated region fallthrough
CT: control target
= control target key end

     0   :  { %6 = vsyncpa [#allocation4], 0  ;;  %s7912_s0 = inlined_call_operand.hbm [shape: f32[2,16,16,4], index: 0, kind: input, shape index: {}]   ;;  %s7913_s1 = inlined_call_operand.hbm [shape: f32[2,4,16,16,4], index: 1, kind: output, shape index: {}]  }
   0x1   :  { %8 = vsyncpa [#allocation4 + $0x1], 0 }
   0x2   :  { %9 = vsyncpa [#allocation5], 0 }
   0x3   :  { %11 = vsyncpa [#allocation5 + $0x1], 0  ;;  %s4181_s6 = smov 0   ;;  %s4183_s7 = smov 0  }
   0x4   :  { %s4185_s8 = smov 0   ;;  %s4187_s9 = smov 0  }
   0x5   :  { %s4189_s10 = smov 0   ;;  %s4191_s11 = smov 0  }
   0x6 LB: > { %s3830_s12 = sadd.s32 4294967295, %s4162_s11   ;;  %s3831_s13 = sadd.s32 4294967294, %s4162_s11   ;;  %s4162_s11 = sphi %s4191_s11, %s17_s11   ;;  %s4158_s10 = sphi %s4189_s10, %s8510_s10   ;;  %s4154_s9 = sphi %s4187_s9, %s8509_s9   ;;  %s4150_s8 = sphi %s4185_s8, %s8508_s8   ;;  %s4146_s7 = sphi %s4183_s7, %s8507_s7   ;;  %s4142_s6 = sphi %s4181_s6, %s8506_s6  }
   0x7   : > { %s29_s14 = sadd.s32 1, %s4158_s10  ;;  %s38_s15 = sadd.s32 1, %s4150_s8 }
   0x8   : > { %p31_p0 = scmp.ge.s32.totalorder %s29_s14, 2  ;;  %p45_p1 = scmp.ne.s32.totalorder %s4150_s8, %s4146_s7 }
   0x9   : > { %p46_p2 = scmp.eq.s32.totalorder %s4162_s11, 0  ;;  %p51_p3 = scmp.ne.s32.totalorder %s4146_s7, %s4142_s6 }
   0xa   : > { %s8512_s14 = smov (%p31_p0, %s29_s14), 0  ;;  %p52_p5 = scmp.eq.s32.totalorder %s3830_s12, 0 }
   0xb   : > { %p4222_p4 = por %p46_p2, %p45_p1  ;;  %s33_s17 = ssub.s32 %s4158_s10, %s8512_s14 }
   0xc   : > { %p77_p6 = scmp.eq.s32.totalorder %s3830_s12, 1  ;;  %p36_p7 = scmp.eq.s32.totalorder %s33_s17, 0 }
   0xd   : > { %p4228_p8 = por %p52_p5, %p51_p3  ;;  %p83_p10 = scmp.eq.s32.totalorder %s3831_s13, 1 }
   0xe   : > { %p4232_p9 = por %p77_p6, %p45_p1  ;;  %p3987_p13 = scmp.lt.s32.totalorder %s4162_s11, 2 }
   0xf   : > { %s4237_s20 = scalar_select %p36_p7, %s4150_s8, %s38_s15  }
  0x10   : > { %s8126_s19 = scalar_select %p4232_p9, 1, 0 }
  0x11   : > { %p4239_p11 = por %p83_p10, %p51_p3  ;;  %s103_s22 = sand.u32 1, %s4150_s8  }
  0x12   : > { %s3834_s23 = sshll.u32 %s103_s22, 8  ;;  %s3973_s24 = sshll.u32 %s4158_s10, 12 }
  0x13   : > { %s8127_s21 = scalar_select %p4239_p11, 1, 0 }
  0x14   : > { %s4250_s27 = scalar_lea.hbm %s7912_s0, %s3973_s24  ;;  %s107_s28 = scalar_lea.vmem [#allocation3], %s3834_s23 }
  0x15   : > { %s115_s29 = sshll.u32 %s107_s28, 4  ;;  %p4256_p0 = pnand %p3987_p13, %p4222_p4  ;;  %s4252_s29 = int_to_ptr.vmem [resolvable:$true] %s115_s29 }
  0x16   : > { %s4261_s2 = scalar_lea.sflag [#allocation4], %s103_s22  ;;  %s4050_s3 = scalar_lea.hbm %s4250_s27, 4096 }
  0x17   : > { %p4051_p2 = scmp.ne.s32.totalorder %s4250_s27, %s4050_s3  ;;  %p4052_p3 = pneg %p4256_p0 }
  0x18   : > { %s4055_s12 = scalar_lea.hbm %s7912_s0, 8192  ;;  %p4056_p4 = scmp.lt.u32.totalorder %s4250_s27, %s7912_s0 }
  0x19   : > { %p4053_p5 = pnand %p4052_p3, %p4051_p2  ;;  %p4057_p7 = scmp.lt.u32.totalorder %s4055_s12, %s4050_s3 }
  0x1a   : > { %p4059_p13 = scmp.lt.u32.totalorder %s4050_s3, %s4250_s27 }
  0x1b   : > { %p4054_p6 = pneg %p4053_p5  ;;  %p4058_p10 = por %p4057_p7, %p4056_p4 }
  0x1d   : > { %p4060_p12 = por %p4059_p13, %p4058_p10 }
  0x1f   : > { %p4061_p1 = pnand %p4060_p12, %p4054_p6 }
  0x21   : > { %4064 = shalt.err (!%p4061_p1)
}
  0x22   : > { %s4065_s16 = scalar_lea.vmem %s4252_s29, 4096  ;;  %s4164_s17 = smov [#allocation3]  }
  0x23   : > { %p4066_p2 = scmp.ne.s32.totalorder %s4252_s29, %s4065_s16  ;;  %s4070_s22 = sshll.u32 %s4164_s17, 4  ;;  %s4071_s22 = int_to_ptr.vmem [resolvable:$false] %s4070_s22 }
  0x24   : > { %s4072_s23 = scalar_lea.vmem %s4071_s22, 8192  ;;  %p4073_p9 = scmp.lt.s32.totalorder %s4252_s29, %s4071_s22 }
  0x25   : > { %p4068_p5 = pnand %p4066_p2, %p4052_p3  ;;  %p4074_p4 = scmp.lt.s32.totalorder %s4072_s23, %s4065_s16 }
  0x27   : > { %p4069_p11 = pneg %p4068_p5  ;;  %p4075_p7 = por %p4074_p4, %p4073_p9 }
  0x29   : > { %p4076_p10 = pnand %p4075_p7, %p4069_p11 }
  0x2b   : > { %4079 = shalt.err (!%p4076_p10)
}
  0x2c   : > { %s4165_s24 = smov 128   ;;  %s4166_s25 = smov 8  }
  0x2d   : > { %3982 = dma.hbm_to_vmem [thread:$0]  (!%p4256_p0), %s4250_s27, 4096, %s4252_s29, %s4261_s2, %s4165_s24, %s4165_s24, %s4166_s25  }
  0x2e   : > { %p123_p12 = scmp.lt.s32.totalorder %s4162_s11, 3  ;;  %p8129_p1 = scmp.ge.s32.totalorder %s4162_s11, 1 }
  0x30   : > { %p124_p3 = pnand %p8129_p1, %p123_p12 }
  0x32   : > { %127 = sbr.rel (%p124_p3) target bundleno = 731 (0x2db), region = 24 }
  0x39   : > { %s4293_s26 = sand.u32 1, %s4146_s7  }
  0x3a   : > { %s3838_s28 = sshll.u32 %s4293_s26, 8  ;;  %s130_s3 = scalar_lea.sflag [#allocation4], %s4293_s26 }
  0x3b   : > { %s4297_s4 = scalar_lea.vmem [#allocation3], %s3838_s28 }
  0x3c   : > { %4133 = dma.done.wait (%p4228_p8), %s130_s3, 4096  }
  0x3d   : > { %4135 = vsyncadd (%p4228_p8), %s130_s3, 4294963200  ;;  %vm185_vm0 = vcmask 31744   ;;  %vm221_vm1 = vcmask 27648   ;;  %vm269_vm2 = vcmask 29696   ;;  %v4167_v0 = vmov -inf   ;;  %s3839_s18 = sshll.u32 %s4293_s26, 10 }
  0x3e   : > { %218 = vst.msk [vmem:[#allocation2] sm:$0xff] %vm185_vm0, %v4167_v0  ;;  %219 = vst.msk [vmem:[#allocation2 + $0x8] sm:$0xff] %vm185_vm0, %v4167_v0  ;;  %v152_v1 = vld [vmem:[%s4297_s4] sm:$0xff]  ;;  %v153_v2 = vld [vmem:[%s4297_s4 + $0x8] sm:$0xff]  ;;  %s4470_s27 = scalar_lea.vmem [#allocation6], %s3839_s18  ;;  %vm838_vm3 = vcmask 1046528  }
  0x3f   : > { %220 = vst.msk [vmem:[#allocation2 + $0x10] sm:$0xff] %vm185_vm0, %v4167_v0  ;;  %223 = vst.msk [vmem:[#allocation2 + $0x20] sm:$0xff] %vm185_vm0, %v4167_v0  ;;  %v154_v3 = vld [vmem:[%s4297_s4 + $0x10] sm:$0xff]  ;;  %v155_v61 = vld [vmem:[%s4297_s4 + $0x18] sm:$0xff]  ;;  %vm1295_vm4 = vcmask 1045504   ;;  %vm1608_vm5 = vcmask 1043456  }
  0x40   : > { %224 = vst.msk [vmem:[#allocation2 + $0x28] sm:$0xff] %vm185_vm0, %v4167_v0  ;;  %225 = vst.msk [vmem:[#allocation2 + $0x30] sm:$0xff] %vm185_vm0, %v4167_v0  ;;  %vm1922_vm6 = vcmask 31748   ;;  %vm2941_vm7 = vcmask 25600   ;;  %vm2938_vm8 = vcmask 31746   ;;  %s3974_s29 = sshll.u32 %s4154_s9, 14 }
  0x41   : > { %227 = vst.msk [vmem:[#allocation2 + $0x40] sm:$0xff] %vm185_vm0, %v4167_v0  ;;  %228 = vst.msk [vmem:[#allocation2 + $0x48] sm:$0xff] %vm185_vm0, %v4167_v0  ;;  %s3745_s30 = sshll.u32 %s4470_s27, 4  ;;  %s7857_s12 = scalar_lea.hbm %s7913_s1, %s3974_s29  ;;  %s7859_s30 = int_to_ptr.vmem [resolvable:$true] %s3745_s30 }
  0x42   : > { %229 = vst.msk [vmem:[#allocation2 + $0x50] sm:$0xff] %vm185_vm0, %v4167_v0  ;;  %231 = vst.msk [vmem:[#allocation2 + $0x60] sm:$0xff] %vm185_vm0, %v4167_v0  ;;  %s3731_s9 = scalar_lea.sflag [#allocation5], %s4293_s26  ;;  %s4080_s13 = scalar_lea.vmem %s7859_s30, 16384 }
  0x43   : > { %232 = vst.msk [vmem:[#allocation2 + $0x68] sm:$0xff] %vm185_vm0, %v4167_v0  ;;  %233 = vst.msk [vmem:[#allocation2 + $0x70] sm:$0xff] %vm185_vm0, %v4167_v0  ;;  %p4081_p8 = scmp.ne.s32.totalorder %s7859_s30, %s4080_s13  ;;  %p8503_p9 = scmp.ne.s32.totalorder %s8126_s19, 0 }
  0x44   : > { %235 = vst.msk [vmem:[#allocation2 + $0x80] sm:$0xff] %vm185_vm0, %v4167_v0  ;;  %236 = vst.msk [vmem:[#allocation2 + $0x88] sm:$0xff] %vm185_vm0, %v4167_v0  ;;  %s4168_s15 = smov [#allocation6]  }
  0x45   : > { %237 = vst.msk [vmem:[#allocation2 + $0x90] sm:$0xff] %vm185_vm0, %v4167_v0  ;;  %239 = vst.msk [vmem:[#allocation2 + $0xa0] sm:$0xff] %vm185_vm0, %v4167_v0  ;;  %p4082_p11 = pnand %p4081_p8, %p8503_p9  ;;  %s4084_s16 = sshll.u32 %s4168_s15, 4  ;;  %s4085_s16 = int_to_ptr.vmem [resolvable:$false] %s4084_s16 }
  0x46   : > { %240 = vst.msk [vmem:[#allocation2 + $0xa8] sm:$0xff] %vm185_vm0, %v4167_v0  ;;  %241 = vst.msk [vmem:[#allocation2 + $0xb0] sm:$0xff] %vm185_vm0, %v4167_v0  ;;  %v336_v4 = vld [vmem:[#allocation2 + $0x10] sm:$0xff]  ;;  %s4086_s17 = scalar_lea.vmem %s4085_s16, 32768  ;;  %p4087_p6 = scmp.lt.s32.totalorder %s7859_s30, %s4085_s16 }
  0x47   : > { %244 = vst.msk [vmem:[#allocation2 + $0x2c0] sm:$0xff] %vm185_vm0, %v4167_v0  ;;  %245 = vst.msk [vmem:[#allocation2 + $0x2c8] sm:$0xff] %vm185_vm0, %v4167_v0  ;;  %v340_v5 = vld [vmem:[#allocation2 + $0x30] sm:$0xff]  ;;  %p4083_p0 = pneg %p4082_p11  ;;  %p4088_p13 = scmp.lt.s32.totalorder %s4086_s17, %s4080_s13 }
  0x48   : > { %246 = vst.msk [vmem:[#allocation2 + $0x2d0] sm:$0xff] %vm185_vm0, %v4167_v0  ;;  %248 = vst.msk [vmem:[#allocation2 + $0x2e0] sm:$0xff] %vm185_vm0, %v4167_v0  ;;  %v448_v10 = vmax.f32 %v336_v4, %v340_v5  ;;  %v157_v4 = vld [vmem:[%s4297_s4 + $0x28] sm:$0xff] }
  0x49   : > { %249 = vst.msk [vmem:[#allocation2 + $0x2e8] sm:$0xff] %vm185_vm0, %v4167_v0  ;;  %250 = vst.msk [vmem:[#allocation2 + $0x2f0] sm:$0xff] %vm185_vm0, %v4167_v0  ;;  %v344_v6 = vld [vmem:[#allocation2 + $0x50] sm:$0xff]  ;;  %p4089_p2 = por %p4088_p13, %p4087_p6 }
  0x4a   : > { %252 = vst.msk [vmem:[#allocation2 + $0x300] sm:$0xff] %vm185_vm0, %v4167_v0  ;;  %253 = vst.msk [vmem:[#allocation2 + $0x308] sm:$0xff] %vm185_vm0, %v4167_v0  ;;  %v348_v7 = vld [vmem:[#allocation2 + $0x70] sm:$0xff]  ;;  %v452_v11 = vmax.f32 %v340_v5, %v344_v6 }
  0x4b   : > { %254 = vst.msk [vmem:[#allocation2 + $0x310] sm:$0xff] %vm185_vm0, %v4167_v0  ;;  %256 = vst.msk [vmem:[#allocation2 + $0x320] sm:$0xff] %vm185_vm0, %v4167_v0  ;;  %v4484_v15 = vmax.f32 %v344_v6, %v348_v7  ;;  %v158_v5 = vld [vmem:[%s4297_s4 + $0x30] sm:$0xff]  ;;  %p4090_p5 = pnand %p4089_p2, %p4083_p0 }
  0x4c   : > { %257 = vst.msk [vmem:[#allocation2 + $0x328] sm:$0xff] %vm185_vm0, %v4167_v0  ;;  %258 = vst.msk [vmem:[#allocation2 + $0x330] sm:$0xff] %vm185_vm0, %v4167_v0  ;;  %v352_v8 = vld [vmem:[#allocation2 + $0x90] sm:$0xff] }
  0x4d   : > { %260 = vst.msk [vmem:[#allocation2 + $0x340] sm:$0xff] %vm185_vm0, %v4167_v0  ;;  %261 = vst.msk [vmem:[#allocation2 + $0x348] sm:$0xff] %vm185_vm0, %v4167_v0  ;;  %v4478_v9 = vld [vmem:[#allocation2 + $0xb0] sm:$0xff]  ;;  %v4486_v16 = vmax.f32 %v348_v7, %v352_v8  ;;  %v552_v24 = vmax.f32 %v448_v10, %v4484_v15 }
  0x4e   : > { %262 = vst.msk [vmem:[#allocation2 + $0x350] sm:$0xff] %vm185_vm0, %v4167_v0  ;;  %264 = vst.msk [vmem:[#allocation2 + $0x360] sm:$0xff] %vm185_vm0, %v4167_v0  ;;  %v4491_v19 = vmax.f32 %v352_v8, %v4478_v9 }
  0x4f   : > { %265 = vst.msk [vmem:[#allocation2 + $0x368] sm:$0xff] %vm185_vm0, %v4167_v0  ;;  %266 = vst.msk [vmem:[#allocation2 + $0x370] sm:$0xff] %vm185_vm0, %v4167_v0  ;;  %v4480_v12 = vld [vmem:[#allocation2 + $0x2d0] sm:$0xff]  ;;  %v556_v25 = vmax.f32 %v452_v11, %v4486_v16  ;;  %v4506_v36 = vmax.f32 %v552_v24, %v352_v8  ;;  %v159_v11 = vld [vmem:[%s4297_s4 + $0x38] sm:$0xff] }
  0x50   : > { %222 = vst.msk [vmem:[#allocation2 + $0x18] sm:$0xf] %vm221_vm1, %v4167_v0  ;;  %226 = vst.msk [vmem:[#allocation2 + $0x38] sm:$0xf] %vm221_vm1, %v4167_v0  ;;  %v428_v13 = vld [vmem:[#allocation2 + $0x2f0] sm:$0xff]  ;;  %v560_v53 = vmax.f32 %v4484_v15, %v4491_v19  ;;  %v161_v15 = vld [vmem:[%s4297_s4 + $0x48] sm:$0xff] }
  0x51   : > { %230 = vst.msk [vmem:[#allocation2 + $0x58] sm:$0xf] %vm221_vm1, %v4167_v0  ;;  %234 = vst.msk [vmem:[#allocation2 + $0x78] sm:$0xf] %vm221_vm1, %v4167_v0  ;;  %v4494_v20 = vmax.f32 %v4480_v12, %v428_v13  ;;  %v4509_v37 = vmax.f32 %v556_v25, %v4478_v9  ;;  %v162_v25 = vld [vmem:[%s4297_s4 + $0x50] sm:$0xff] }
  0x52   : > { %238 = vst.msk [vmem:[#allocation2 + $0x98] sm:$0xf] %vm221_vm1, %v4167_v0  ;;  %242 = vst.msk [vmem:[#allocation2 + $0xb8] sm:$0xf] %vm221_vm1, %v4167_v0  ;;  %v4482_v14 = vld [vmem:[#allocation2 + $0x310] sm:$0xff] }
  0x53   : > { %247 = vst.msk [vmem:[#allocation2 + $0x2d8] sm:$0xf] %vm221_vm1, %v4167_v0  ;;  %251 = vst.msk [vmem:[#allocation2 + $0x2f8] sm:$0xf] %vm221_vm1, %v4167_v0  ;;  %v4488_v17 = vld [vmem:[#allocation2 + $0x330] sm:$0xff]  ;;  %v4497_v21 = vmax.f32 %v428_v13, %v4482_v14  ;;  %v160_v13 = vld [vmem:[%s4297_s4 + $0x40] sm:$0xff] }
  0x54   : > { %255 = vst.msk [vmem:[#allocation2 + $0x318] sm:$0xf] %vm221_vm1, %v4167_v0  ;;  %259 = vst.msk [vmem:[#allocation2 + $0x338] sm:$0xf] %vm221_vm1, %v4167_v0  ;;  %v544_v22 = vmax.f32 %v4482_v14, %v4488_v17 }
  0x55   : > { %263 = vst.msk [vmem:[#allocation2 + $0x358] sm:$0xf] %vm221_vm1, %v4167_v0  ;;  %267 = vst.msk [vmem:[#allocation2 + $0x378] sm:$0xf] %vm221_vm1, %v4167_v0  ;;  %v440_v18 = vld [vmem:[#allocation2 + $0x350] sm:$0xff] }
  0x56   : > { %286 = vst.msk [vmem:[#allocation2 + $0xd6] sm:$0x3f] %vm269_vm2, %v4167_v0  ;;  %270 = vst.msk [vmem:[#allocation2 + $0xc0] sm:$0x3f] %vm269_vm2, %v4167_v0  ;;  %v548_v23 = vmax.f32 %v4488_v17, %v440_v18  ;;  %v640_v34 = vmax.f32 %v4494_v20, %v544_v22  ;;  %v444_v47 = vld [vmem:[#allocation2 + $0x370] sm:$0xff] }
  0x57   : > { %271 = vst.msk [vmem:[#allocation2 + $0xe0] sm:$0x3f] %vm269_vm2, %v4167_v0  ;;  %272 = vst.msk [vmem:[#allocation2 + $0x100] sm:$0x3f] %vm269_vm2, %v4167_v0  ;;  %v337_v26 = vld [vmem:[#allocation2 + $0x18] sm:$0xf] }
  0x58   : > { %273 = vst.msk [vmem:[#allocation2 + $0x120] sm:$0x3f] %vm269_vm2, %v4167_v0  ;;  %274 = vst.msk [vmem:[#allocation2 + $0x140] sm:$0x3f] %vm269_vm2, %v4167_v0  ;;  %v341_v27 = vld [vmem:[#allocation2 + $0x38] sm:$0xf]  ;;  %v644_v35 = vmax.f32 %v4497_v21, %v548_v23  ;;  %v4519_v48 = vmax.f32 %v640_v34, %v440_v18 }
  0x59   : > { %275 = vst.msk [vmem:[#allocation2 + $0x160] sm:$0x3f] %vm269_vm2, %v4167_v0  ;;  %276 = vst.msk [vmem:[#allocation2 + $0x180] sm:$0x3f] %vm269_vm2, %v4167_v0  ;;  %v345_v28 = vld [vmem:[#allocation2 + $0x58] sm:$0xf]  ;;  %v449_v32 = vmax.f32 %v337_v26, %v341_v27 }
  0x5a   : > { %277 = vst.msk [vmem:[#allocation2 + $0x1a0] sm:$0x3f] %vm269_vm2, %v4167_v0  ;;  %278 = vst.msk [vmem:[#allocation2 + $0x1c0] sm:$0x3f] %vm269_vm2, %v4167_v0  ;;  %v349_v29 = vld [vmem:[#allocation2 + $0x78] sm:$0xf]  ;;  %v453_v33 = vmax.f32 %v341_v27, %v345_v28  ;;  %v4569_v18 = vmax.f32 %v644_v35, %v444_v47 }
  0x5b   : > { %279 = vst.msk [vmem:[#allocation2 + $0x1e0] sm:$0x3f] %vm269_vm2, %v4167_v0  ;;  %280 = vst.msk [vmem:[#allocation2 + $0x200] sm:$0x3f] %vm269_vm2, %v4167_v0  ;;  %v353_v30 = vld [vmem:[#allocation2 + $0x98] sm:$0xf]  ;;  %v457_v43 = vmax.f32 %v345_v28, %v349_v29 }
  0x5c   : > { %281 = vst.msk [vmem:[#allocation2 + $0x220] sm:$0x3f] %vm269_vm2, %v4167_v0  ;;  %282 = vst.msk [vmem:[#allocation2 + $0x240] sm:$0x3f] %vm269_vm2, %v4167_v0  ;;  %v357_v31 = vld [vmem:[#allocation2 + $0xb8] sm:$0xf]  ;;  %v461_v44 = vmax.f32 %v349_v29, %v353_v30 }
  0x5d   : > { %283 = vst.msk [vmem:[#allocation2 + $0x260] sm:$0x3f] %vm269_vm2, %v4167_v0  ;;  %284 = vst.msk [vmem:[#allocation2 + $0x280] sm:$0x3f] %vm269_vm2, %v4167_v0  ;;  %v425_v38 = vld [vmem:[#allocation2 + $0x2d8] sm:$0xf]  ;;  %v4515_v45 = vmax.f32 %v353_v30, %v357_v31  ;;  %v553_v56 = vmax.f32 %v449_v32, %v457_v43 }
  0x5e   : > { %285 = vst.msk [vmem:[#allocation2 + $0x2a0] sm:$0x3f] %vm269_vm2, %v4167_v0  ;;  %287 = vst.msk [vmem:[#allocation2 + $0xf6] sm:$0x3f] %vm269_vm2, %v4167_v0  ;;  %v429_v39 = vld [vmem:[#allocation2 + $0x2f8] sm:$0xf]  ;;  %v557_v57 = vmax.f32 %v453_v33, %v461_v44 }
  0x5f   : > { %288 = vst.msk [vmem:[#allocation2 + $0x116] sm:$0x3f] %vm269_vm2, %v4167_v0  ;;  %289 = vst.msk [vmem:[#allocation2 + $0x136] sm:$0x3f] %vm269_vm2, %v4167_v0  ;;  %v4511_v40 = vld [vmem:[#allocation2 + $0x318] sm:$0xf]  ;;  %v4517_v46 = vmax.f32 %v425_v38, %v429_v39  ;;  %v561_v63 = vmax.f32 %v457_v43, %v4515_v45  ;;  %v4552_v7 = vmax.f32 %v553_v56, %v353_v30 }
  0x60   : > { %290 = vst.msk [vmem:[#allocation2 + $0x156] sm:$0x3f] %vm269_vm2, %v4167_v0  ;;  %291 = vst.msk [vmem:[#allocation2 + $0x176] sm:$0x3f] %vm269_vm2, %v4167_v0  ;;  %v4513_v41 = vld [vmem:[#allocation2 + $0x338] sm:$0xf]  ;;  %v4522_v49 = vmax.f32 %v429_v39, %v4511_v40  ;;  %v4554_v8 = vmax.f32 %v557_v57, %v357_v31 }
  0x61   : > { %292 = vst.msk [vmem:[#allocation2 + $0x196] sm:$0x3f] %vm269_vm2, %v4167_v0  ;;  %293 = vst.msk [vmem:[#allocation2 + $0x1b6] sm:$0x3f] %vm269_vm2, %v4167_v0  ;;  %v441_v42 = vld [vmem:[#allocation2 + $0x358] sm:$0xf]  ;;  %v545_v50 = vmax.f32 %v4511_v40, %v4513_v41 }
  0x62   : > { %294 = vst.msk [vmem:[#allocation2 + $0x1d6] sm:$0x3f] %vm269_vm2, %v4167_v0  ;;  %295 = vst.msk [vmem:[#allocation2 + $0x1f6] sm:$0x3f] %vm269_vm2, %v4167_v0  ;;  %v4526_v51 = vld [vmem:[#allocation2 + $0xd8] sm:$0xf]  ;;  %v549_v55 = vmax.f32 %v4513_v41, %v441_v42 }
  0x63   : > { %296 = vst.msk [vmem:[#allocation2 + $0x216] sm:$0x3f] %vm269_vm2, %v4167_v0  ;;  %297 = vst.msk [vmem:[#allocation2 + $0x236] sm:$0x3f] %vm269_vm2, %v4167_v0  ;;  %v445_v54 = vld [vmem:[#allocation2 + $0x378] sm:$0xf]  ;;  %v4532_v58 = vmax.f32 %v357_v31, %v4526_v51  ;;  %v641_v62 = vmax.f32 %v4517_v46, %v545_v50  ;;  %v4572_v22 = vmax.f32 %v561_v63, %v4526_v51 }
  0x64   : > { %298 = vst.msk [vmem:[#allocation2 + $0x256] sm:$0x3f] %vm269_vm2, %v4167_v0  ;;  %299 = vst.msk [vmem:[#allocation2 + $0x276] sm:$0x3f] %vm269_vm2, %v4167_v0  ;;  %v645_v6 = vmax.f32 %v4522_v49, %v549_v55  ;;  %v163_v26 = vld [vmem:[%s4297_s4 + $0x58] sm:$0xff]  ;;  %v164_v27 = vld [vmem:[%s4297_s4 + $0x60] sm:$0xff] }
  0x65   : > { %300 = vst.msk [vmem:[#allocation2 + $0x296] sm:$0x3f] %vm269_vm2, %v4167_v0  ;;  %301 = vst.msk [vmem:[#allocation2 + $0x2b6] sm:$0x3f] %vm269_vm2, %v4167_v0  ;;  %v4539_v0 = vld [vmem:[#allocation2 + $0xf8] sm:$0xf]  ;;  %v565_v10 = vmax.f32 %v461_v44, %v4532_v58  ;;  %v4590_v28 = vmax.f32 %v641_v62, %v441_v42 }
  0x66   : > { %302 = vst.msk [vmem:[#allocation2 + $0xc6] sm:$0xff] %vm185_vm0, %v152_v1  ;;  %303 = vst.msk [vmem:[#allocation2 + $0xce] sm:$0xff] %vm185_vm0, %v153_v2  ;;  %v165_v32 = vld [vmem:[%s4297_s4 + $0x68] sm:$0xff]  ;;  %v166_v33 = vld [vmem:[%s4297_s4 + $0x70] sm:$0xff]  ;;  %v7921_v43 = vrot.slane %v4506_v36, 1  ;;  %v7915_v56 = vrot.slane %v4572_v22, 1 }
  0x67   : > { %304 = vst.msk [vmem:[#allocation2 + $0xe6] sm:$0xff] %vm185_vm0, %v154_v3  ;;  %3840 = vst.msk [vmem:[%s4470_s27 + $0x300] sm:$0xff] %vm185_vm0, %v152_v1  ;;  %v4593_v29 = vmax.f32 %v565_v10, %v4539_v0  ;;  %v167_v34 = vld [vmem:[%s4297_s4 + $0x78] sm:$0xff]  ;;  %v169_v39 = vld [vmem:[%s4297_s4 + $0x88] sm:$0xff] }
  0x68   : > { %3841 = vst.msk [vmem:[%s4470_s27 + $0x308] sm:$0xff] %vm185_vm0, %v153_v2  ;;  %3842 = vst.msk [vmem:[%s4470_s27 + $0x310] sm:$0xff] %vm185_vm0, %v154_v3  ;;  %v156_v3 = vld [vmem:[%s4297_s4 + $0x20] sm:$0xff]  ;;  %v170_v42 = vld [vmem:[%s4297_s4 + $0x90] sm:$0xff] }
  0x69   : > { %8130 = vst [vmem:[#allocation9_spill] sm:$0xff] %v4519_v48  ;;  %8131 = vst [vmem:[#allocation10_spill] sm:$0xff] %v4532_v58  ;;  %v172_v47 = vld [vmem:[%s4297_s4 + $0xa0] sm:$0xff]  ;;  %v175_v55 = vld [vmem:[%s4297_s4 + $0xb8] sm:$0xff]  ;;  %v7917_v57 = vrot.slane %v4593_v29, 1 }
  0x6a   : > { %8132 = vst [vmem:[#allocation11_spill] sm:$0xff] %v4539_v0  ;;  %305 = vst.msk [vmem:[#allocation2 + $0xee] sm:$0xff] %vm185_vm0, %v155_v61  ;;  %v178_v62 = vld [vmem:[%s4297_s4 + $0xd0] sm:$0xff]  ;;  %v179_v10 = vld [vmem:[%s4297_s4 + $0xd8] sm:$0xff] }
  0x6b   : > { %3843 = vst.msk [vmem:[%s4470_s27 + $0x318] sm:$0xff] %vm185_vm0, %v155_v61  ;;  %306 = vst.msk [vmem:[#allocation2 + $0x106] sm:$0xff] %vm185_vm0, %v156_v3  ;;  %v177_v61 = vld [vmem:[%s4297_s4 + $0xc8] sm:$0xff] }
  0x6c   : > { %v417_v52 = vld [vmem:[#allocation2 + $0x298] sm:$0xf]  ;;  %307 = vst.msk [vmem:[#allocation2 + $0x10e] sm:$0xff] %vm185_vm0, %v157_v4  ;;  %308 = vst.msk [vmem:[#allocation2 + $0x126] sm:$0xff] %vm185_vm0, %v158_v5 }
  0x6d   : > { %v421_v59 = vld [vmem:[#allocation2 + $0x2b8] sm:$0xf]  ;;  %v4534_v60 = vld [vmem:[#allocation2 + $0xd0] sm:$0xff]  ;;  %3844 = vst.msk [vmem:[%s4470_s27 + $0x320] sm:$0xff] %vm185_vm0, %v156_v3  ;;  %3845 = vst.msk [vmem:[%s4470_s27 + $0x328] sm:$0xff] %vm185_vm0, %v157_v4 }
  0x6e   : > { %v4541_v1 = vmax.f32 %v417_v52, %v421_v59  ;;  %v4543_v2 = vmax.f32 %v421_v59, %v425_v38  ;;  %3846 = vst.msk [vmem:[%s4470_s27 + $0x330] sm:$0xff] %vm185_vm0, %v158_v5  ;;  %8135 = vst [vmem:[#allocation14_spill] sm:$0xff] %v4569_v18  ;;  %v4597_v30 = vmax.f32 %v4478_v9, %v4534_v60  ;;  %v168_v38 = vld [vmem:[%s4297_s4 + $0x80] sm:$0xff]  ;;  %v844_v52 = vrot.slane %v4552_v7, 1  ;;  %v359_v4 = vld [vmem:[#allocation2 + $0xc8] sm:$0xff] }
  0x6f   : > { %309 = vst.msk [vmem:[#allocation2 + $0x12e] sm:$0xff] %vm185_vm0, %v159_v11  ;;  %310 = vst.msk [vmem:[#allocation2 + $0x146] sm:$0xff] %vm185_vm0, %v160_v13  ;;  %v4600_v31 = vmax.f32 %v560_v53, %v4534_v60  ;;  %v4614_v9 = vmax.f32 %v645_v6, %v445_v54  ;;  %v174_v54 = vld [vmem:[%s4297_s4 + $0xb0] sm:$0xff] }
  0x70   : > { %8133 = vst [vmem:[#allocation12_spill] sm:$0xff] %v4541_v1  ;;  %8134 = vst [vmem:[#allocation13_spill] sm:$0xff] %v4543_v2  ;;  %v633_v23 = vmax.f32 %v4541_v1, %v4517_v46  ;;  %v637_v24 = vmax.f32 %v4543_v2, %v4522_v49  ;;  %v564_v44 = vmax.f32 %v4486_v16, %v4597_v30  ;;  %v171_v46 = vld [vmem:[%s4297_s4 + $0x98] sm:$0xff]  ;;  %v173_v49 = vld [vmem:[%s4297_s4 + $0xa8] sm:$0xff] }
  0x71   : > { %311 = vst.msk [vmem:[#allocation2 + $0x14e] sm:$0xff] %vm185_vm0, %v161_v15  ;;  %3847 = vst.msk [vmem:[%s4470_s27 + $0x338] sm:$0xff] %vm185_vm0, %v159_v11  ;;  %v7919_v50 = vrot.slane %v4600_v31, 1  ;;  %v4650_v16 = vmax.f32 %v4526_v51, %v4539_v0  ;;  %v176_v51 = vld [vmem:[%s4297_s4 + $0xc0] sm:$0xff]  ;;  %v4671_v59 = vld [vmem:[#allocation2 + $0xf0] sm:$0xff]  ;;  %v845_v3 = vsel %vm838_vm3, %v7921_v43, %v844_v52 }
  0x72   : > { %3848 = vst.msk [vmem:[%s4470_s27 + $0x340] sm:$0xff] %vm185_vm0, %v160_v13  ;;  %3849 = vst.msk [vmem:[%s4470_s27 + $0x348] sm:$0xff] %vm185_vm0, %v161_v15  ;;  %v4617_v35 = vmax.f32 %v633_v23, %v4511_v40  ;;  %v7920_v40 = vrot.slane %v4509_v37, 1  ;;  %v4654_v53 = vmax.f32 %v637_v24, %v4513_v41  ;;  %v7916_v41 = vrot.slane %v4554_v8, 1  ;;  %v180_v11 = vld [vmem:[%s4297_s4 + $0xe0] sm:$0xff]  ;;  %v181_v13 = vld [vmem:[%s4297_s4 + $0xe8] sm:$0xff] }
  0x73   : > { %8136 = vst [vmem:[#allocation15_spill] sm:$0xff] %v4590_v28  ;;  %8137 = vst [vmem:[#allocation16_spill] sm:$0xff] %v4597_v30  ;;  %v4692_v6 = vmax.f32 %v564_v44, %v4671_v59  ;;  %v4701_v15 = vmax.f32 %v4534_v60, %v4671_v59  ;;  %v859_v24 = vsel %vm838_vm3, %v7919_v50, %v7915_v56  ;;  %v182_v60 = vld [vmem:[%s4297_s4 + $0xf0] sm:$0xff]  ;;  %v354_v56 = vld [vmem:[#allocation2 + $0xa0] sm:$0xff] }
  0x74   : > { %312 = vst.msk [vmem:[#allocation2 + $0x166] sm:$0xff] %vm185_vm0, %v162_v25  ;;  %313 = vst.msk [vmem:[#allocation2 + $0x16e] sm:$0xff] %vm185_vm0, %v163_v26  ;;  %v852_v23 = vsel %vm838_vm3, %v7920_v40, %v7916_v41  ;;  %v355_v41 = vld [vmem:[#allocation2 + $0xa8] sm:$0xff] }
  0x75   : > { %314 = vst.msk [vmem:[#allocation2 + $0x186] sm:$0xff] %vm185_vm0, %v164_v27  ;;  %3850 = vst.msk [vmem:[%s4470_s27 + $0x350] sm:$0xff] %vm185_vm0, %v162_v25  ;;  %v183_v25 = vld [vmem:[%s4297_s4 + $0xf8] sm:$0xff] }
  0x76   : > { %3851 = vst.msk [vmem:[%s4470_s27 + $0x358] sm:$0xff] %vm185_vm0, %v163_v26  ;;  %3852 = vst.msk [vmem:[%s4470_s27 + $0x360] sm:$0xff] %vm185_vm0, %v164_v27  ;;  %v334_v26 = vld [vmem:[#allocation2] sm:$0xff]  ;;  %v4729_v27 = vmax.f32 %v4506_v36, %v845_v3 }
  0x77   : > { %8138 = vst [vmem:[#allocation17_spill] sm:$0xff] %v4614_v9  ;;  %8139 = vst [vmem:[#allocation18_spill] sm:$0xff] %v4617_v35 }
  0x78   : > { %315 = vst.msk [vmem:[#allocation2 + $0x18e] sm:$0xff] %vm185_vm0, %v165_v32  ;;  %316 = vst.msk [vmem:[#allocation2 + $0x1a6] sm:$0xff] %vm185_vm0, %v166_v33 }
  0x79   : > { %317 = vst.msk [vmem:[#allocation2 + $0x1ae] sm:$0xff] %vm185_vm0, %v167_v34  ;;  %3853 = vst.msk [vmem:[%s4470_s27 + $0x368] sm:$0xff] %vm185_vm0, %v165_v32  ;;  %v4732_v32 = vmax.f32 %v4509_v37, %v852_v23  ;;  %v351_v23 = vld [vmem:[#allocation2 + $0x88] sm:$0xff] }
  0x7a   : > { %3854 = vst.msk [vmem:[%s4470_s27 + $0x370] sm:$0xff] %vm185_vm0, %v166_v33  ;;  %3855 = vst.msk [vmem:[%s4470_s27 + $0x378] sm:$0xff] %vm185_vm0, %v167_v34  ;;  %v4735_v33 = vmax.f32 %v4600_v31, %v859_v24 }
  0x7b   : > { %318 = vst.msk [vmem:[#allocation2 + $0x1c6] sm:$0xff] %vm185_vm0, %v168_v38  ;;  %319 = vst.msk [vmem:[#allocation2 + $0x1ce] sm:$0xff] %vm185_vm0, %v169_v39 }
  0x7c   : > { %320 = vst.msk [vmem:[#allocation2 + $0x1e6] sm:$0xff] %vm185_vm0, %v170_v42  ;;  %3856 = vst.msk [vmem:[%s4470_s27 + $0x380] sm:$0xff] %vm185_vm0, %v168_v38  ;;  %v335_v38 = vld [vmem:[#allocation2 + $0x8] sm:$0xff] }
  0x7d   : > { %3857 = vst.msk [vmem:[%s4470_s27 + $0x388] sm:$0xff] %vm185_vm0, %v169_v39  ;;  %3858 = vst.msk [vmem:[%s4470_s27 + $0x390] sm:$0xff] %vm185_vm0, %v170_v42  ;;  %v338_v39 = vld [vmem:[#allocation2 + $0x20] sm:$0xff]  ;;  %v339_v42 = vld [vmem:[#allocation2 + $0x28] sm:$0xff] }
  0x7e   : > { %8140 = vst [vmem:[#allocation19_spill] sm:$0xff] %v4654_v53  ;;  %321 = vst.msk [vmem:[#allocation2 + $0x1ee] sm:$0xff] %vm185_vm0, %v171_v46 }
  0x7f   : > { %322 = vst.msk [vmem:[#allocation2 + $0x206] sm:$0xff] %vm185_vm0, %v172_v47  ;;  %323 = vst.msk [vmem:[#allocation2 + $0x20e] sm:$0xff] %vm185_vm0, %v173_v49 }
  0x80   : > { %3859 = vst.msk [vmem:[%s4470_s27 + $0x398] sm:$0xff] %vm185_vm0, %v171_v46  ;;  %3860 = vst.msk [vmem:[%s4470_s27 + $0x3a0] sm:$0xff] %vm185_vm0, %v172_v47  ;;  %v7918_v46 = vrot.slane %v4692_v6, 1 }
  0x81   : > { %3861 = vst.msk [vmem:[%s4470_s27 + $0x3a8] sm:$0xff] %vm185_vm0, %v173_v49  ;;  %324 = vst.msk [vmem:[#allocation2 + $0x226] sm:$0xff] %vm185_vm0, %v174_v54  ;;  %v4749_v49 = vmax.f32 %v4552_v7, %v844_v52 }
  0x82   : > { %325 = vst.msk [vmem:[#allocation2 + $0x22e] sm:$0xff] %vm185_vm0, %v175_v55  ;;  %326 = vst.msk [vmem:[#allocation2 + $0x246] sm:$0xff] %vm185_vm0, %v176_v51  ;;  %v866_v52 = vsel %vm838_vm3, %v7918_v46, %v7917_v57  ;;  %v4767_v57 = vmax.f32 %v355_v41, %v359_v4 }
  0x83   : > { %3862 = vst.msk [vmem:[%s4470_s27 + $0x3b0] sm:$0xff] %vm185_vm0, %v174_v54  ;;  %3863 = vst.msk [vmem:[%s4470_s27 + $0x3b8] sm:$0xff] %vm185_vm0, %v175_v55  ;;  %v342_v54 = vld [vmem:[#allocation2 + $0x40] sm:$0xff]  ;;  %v343_v55 = vld [vmem:[#allocation2 + $0x48] sm:$0xff]  ;;  %v4759_v5 = vmax.f32 %v4692_v6, %v866_v52 }
  0x84   : > { %3864 = vst.msk [vmem:[%s4470_s27 + $0x3c0] sm:$0xff] %vm185_vm0, %v176_v51  ;;  %327 = vst.msk [vmem:[#allocation2 + $0x24e] sm:$0xff] %vm185_vm0, %v177_v61  ;;  %v346_v51 = vld [vmem:[#allocation2 + $0x60] sm:$0xff]  ;;  %v450_v24 = vmax.f32 %v338_v39, %v342_v54 }
  0x85   : > { %328 = vst.msk [vmem:[#allocation2 + $0x266] sm:$0xff] %vm185_vm0, %v178_v62  ;;  %8141 = vst [vmem:[#allocation20_spill] sm:$0xff] %v4701_v15 }
  0x86   : > { %3865 = vst.msk [vmem:[%s4470_s27 + $0x3c8] sm:$0xff] %vm185_vm0, %v177_v61  ;;  %3866 = vst.msk [vmem:[%s4470_s27 + $0x3d0] sm:$0xff] %vm185_vm0, %v178_v62  ;;  %v446_v61 = vmax.f32 %v334_v26, %v338_v39  ;;  %v447_v62 = vmax.f32 %v335_v38, %v339_v42  ;;  %v358_v26 = vld [vmem:[#allocation2 + $0xc0] sm:$0xff]  ;;  %v4763_v39 = vld [vmem:[#allocation2 + $0xe8] sm:$0xff] }
  0x87   : > { %329 = vst.msk [vmem:[#allocation2 + $0x26e] sm:$0xff] %vm185_vm0, %v179_v10  ;;  %330 = vst.msk [vmem:[#allocation2 + $0x286] sm:$0xff] %vm185_vm0, %v180_v11  ;;  %v4765_v3 = vmax.f32 %v354_v56, %v358_v26 }
  0x88   : > { %331 = vst.msk [vmem:[#allocation2 + $0x28e] sm:$0xff] %vm185_vm0, %v181_v13  ;;  %3867 = vst.msk [vmem:[%s4470_s27 + $0x3d8] sm:$0xff] %vm185_vm0, %v179_v10  ;;  %v4761_v10 = vld [vmem:[#allocation2 + $0xe0] sm:$0xff] }
  0x89   : > { %3868 = vst.msk [vmem:[%s4470_s27 + $0x3e0] sm:$0xff] %vm185_vm0, %v180_v11  ;;  %3869 = vst.msk [vmem:[%s4470_s27 + $0x3e8] sm:$0xff] %vm185_vm0, %v181_v13  ;;  %v347_v11 = vld [vmem:[#allocation2 + $0x68] sm:$0xff]  ;;  %v350_v13 = vld [vmem:[#allocation2 + $0x80] sm:$0xff]  ;;  %v4770_v46 = vmax.f32 %v358_v26, %v4761_v10 }
  0x8a   : > { %332 = vst.msk [vmem:[#allocation2 + $0x2a6] sm:$0xff] %vm185_vm0, %v182_v60  ;;  %333 = vst.msk [vmem:[#allocation2 + $0x2ae] sm:$0xff] %vm185_vm0, %v183_v25  ;;  %v455_v38 = vmax.f32 %v343_v55, %v347_v11  ;;  %v458_v47 = vmax.f32 %v346_v51, %v350_v13  ;;  %v459_v34 = vmax.f32 %v347_v11, %v351_v23 }
  0x8b   : > { %3870 = vst.msk [vmem:[%s4470_s27 + $0x3f0] sm:$0xff] %vm185_vm0, %v182_v60  ;;  %3871 = vst.msk [vmem:[%s4470_s27 + $0x3f8] sm:$0xff] %vm185_vm0, %v183_v25  ;;  %v451_v60 = vmax.f32 %v339_v42, %v343_v55  ;;  %v454_v25 = vmax.f32 %v342_v54, %v346_v51  ;;  %v462_v42 = vmax.f32 %v350_v13, %v354_v56 }
  0x8c   : > { %v463_v54 = vmax.f32 %v351_v23, %v355_v41  ;;  %8142 = vst [vmem:[#allocation21_spill] sm:$0xff] %v4765_v3  ;;  %8143 = vst [vmem:[#allocation22_spill] sm:$0xff] %v4767_v57  ;;  %v4773_v55 = vmax.f32 %v359_v4, %v4763_v39  ;;  %v551_v51 = vmax.f32 %v447_v62, %v455_v38 }
  0x8d   : > { %v550_v63 = vmax.f32 %v446_v61, %v454_v25  ;;  %8144 = vst [vmem:[#allocation23_spill] sm:$0xff] %v4770_v46  ;;  %v554_v52 = vmax.f32 %v450_v24, %v458_v47  ;;  %v555_v50 = vmax.f32 %v451_v60, %v459_v34  ;;  %v558_v40 = vmax.f32 %v454_v25, %v462_v42 }
  0x8e   : > { %8145 = vst [vmem:[#allocation24_spill] sm:$0xff] %v4773_v55  ;;  %v559_v43 = vmax.f32 %v455_v38, %v463_v54  ;;  %v562_v9 = vmax.f32 %v458_v47, %v4765_v3  ;;  %v563_v28 = vmax.f32 %v459_v34, %v4767_v57  ;;  %v566_v61 = vmax.f32 %v462_v42, %v4770_v46 }
  0x8f   : > { %v416_v11 = vld [vmem:[#allocation2 + $0x290] sm:$0xff]  ;;  %v567_v53 = vmax.f32 %v463_v54, %v4773_v55  ;;  %v4784_v62 = vmax.f32 %v550_v63, %v350_v13  ;;  %v4786_v24 = vmax.f32 %v551_v51, %v351_v23  ;;  %v4788_v60 = vmax.f32 %v554_v52, %v354_v56  ;;  %v4802_v63 = vld [vmem:[#allocation2 + $0x108] sm:$0xff] }
  0x90   : > { %v4790_v25 = vmax.f32 %v555_v50, %v355_v41  ;;  %v4792_v47 = vmax.f32 %v558_v40, %v358_v26  ;;  %v4794_v34 = vmax.f32 %v559_v43, %v359_v4  ;;  %v4807_v56 = vmax.f32 %v562_v9, %v4761_v10 }
  0x91   : > { %v420_v44 = vld [vmem:[#allocation2 + $0x2b0] sm:$0xff]  ;;  %v4810_v40 = vmax.f32 %v563_v28, %v4763_v39  ;;  %v839_v41 = vrot.slane %v4784_v62, 1  ;;  %v840_v4 = vrot.slane %v4786_v24, 1  ;;  %v1609_v30 = vrot.slane %v4784_v62, 4 }
  0x92   : > { %v4779_v35 = vmax.f32 %v416_v11, %v420_v44  ;;  %v4782_v2 = vmax.f32 %v420_v44, %v4480_v12  ;;  %v4800_v12 = vld [vmem:[#allocation2 + $0x100] sm:$0xff]  ;;  %v4804_v44 = vld [vmem:[#allocation2 + $0x110] sm:$0xff]  ;;  %v847_v13 = vrot.slane %v4790_v25, 1  ;;  %v853_v23 = vrot.slane %v4792_v47, 1 }
  0x93   : > { %v4813_v43 = vmax.f32 %v566_v61, %v4800_v12  ;;  %v860_v26 = vrot.slane %v4807_v56, 1  ;;  %v841_v54 = vsel %vm838_vm3, %v839_v41, %v840_v4  ;;  %v8152_v61 = vrot.slane %v4509_v37, 1 }
  0x94   : > { %8146 = vst [vmem:[#allocation25_spill] sm:$0xff] %v4779_v35  ;;  %8147 = vst [vmem:[#allocation26_spill] sm:$0xff] %v4782_v2  ;;  %v632_v38 = vmax.f32 %v4779_v35, %v4494_v20  ;;  %v636_v42 = vmax.f32 %v4782_v2, %v4497_v21  ;;  %v4816_v20 = vmax.f32 %v567_v53, %v4802_v63  ;;  %v846_v53 = vrot.slane %v4788_v60, 1 }
  0x95   : > { %v8148_v21 = vmax.f32 %v4491_v19, %v4701_v15  ;;  %v854_v19 = vrot.slane %v4794_v34, 1  ;;  %v867_v11 = vrot.slane %v4813_v43, 1  ;;  %v1616_v57 = vrot.slane %v4788_v60, 4 }
  0x96   : > { %v4826_v9 = vmax.f32 %v632_v38, %v4482_v14  ;;  %v4829_v28 = vmax.f32 %v636_v42, %v4488_v17  ;;  %v8151_v14 = vrot.slane %v4506_v36, 1  ;;  %v861_v17 = vrot.slane %v4810_v40, 1 }
  0x97   : > { %v4822_v50 = vmax.f32 %v8148_v21, %v4804_v44  ;;  %v848_v52 = vsel %vm838_vm3, %v846_v53, %v847_v13  ;;  %v850_v38 = vsel %vm838_vm3, %v847_v13, %v8152_v61  ;;  %v855_v42 = vsel %vm838_vm3, %v853_v23, %v854_v19 }
  0x98   : > { %8149 = vst [vmem:[#allocation27_spill] sm:$0xff] %v4826_v9  ;;  %8150 = vst [vmem:[#allocation28_spill] sm:$0xff] %v4829_v28  ;;  %v843_v51 = vsel %vm838_vm3, %v840_v4, %v8151_v14  ;;  %v8153_v21 = vrot.slane %v4600_v31, 1  ;;  %v862_v18 = vsel %vm838_vm3, %v860_v26, %v861_v17  ;;  %v8154_v4 = vrot.slane %v4692_v6, 1 }
  0x99   : > { %v868_v48 = vrot.slane %v4816_v20, 1  ;;  %v7931_v53 = vrot.slane %v4822_v50, 1  ;;  %v1079_v28 = vmax.f32 %v4784_v62, %v841_v54  ;;  %v4859_v13 = vmax.f32 %v4786_v24, %v843_v51 }
  0x9a   : > { %v857_v41 = vsel %vm838_vm3, %v854_v19, %v8153_v21  ;;  %v864_v14 = vsel %vm838_vm3, %v861_v17, %v8154_v4  ;;  %v1082_v23 = vmax.f32 %v4788_v60, %v848_v52  ;;  %v4863_v19 = vmax.f32 %v4790_v25, %v850_v38 }
  0x9b   : > { %v869_v26 = vsel %vm838_vm3, %v867_v11, %v868_v48  ;;  %v871_v17 = vsel %vm838_vm3, %v868_v48, %v7931_v53  ;;  %v1085_v61 = vmax.f32 %v4792_v47, %v855_v42  ;;  %v4871_v21 = vmax.f32 %v4794_v34, %v857_v41 }
  0x9c   : > { %v1088_v54 = vmax.f32 %v4807_v56, %v862_v18  ;;  %v4875_v51 = vmax.f32 %v4810_v40, %v864_v14  ;;  %v1091_v52 = vmax.f32 %v4813_v43, %v869_v26  ;;  %v4879_v38 = vmax.f32 %v4816_v20, %v871_v17 }
  0x9d   : > { %v1296_v11 = vrot.slane %v1079_v28, 2  ;;  %v1297_v4 = vrot.slane %v4859_v13, 2  ;;  %v1303_v9 = vrot.slane %v1082_v23, 2  ;;  %v1304_v48 = vrot.slane %v4863_v19, 2 }
  0x9e   : > { %v1310_v42 = vrot.slane %v1085_v61, 2  ;;  %v1311_v41 = vrot.slane %v4871_v21, 2  ;;  %v1317_v53 = vrot.slane %v1088_v54, 2  ;;  %v1318_v18 = vrot.slane %v4875_v51, 2 }
  0x9f   : > { %v1298_v14 = vsel %vm1295_vm4, %v1296_v11, %v1297_v4  ;;  %v1305_v26 = vsel %vm1295_vm4, %v1303_v9, %v1304_v48  ;;  %v1324_v2 = vrot.slane %v1091_v52, 2  ;;  %v1325_v17 = vrot.slane %v4879_v38, 2 }
  0xa0   : > { %v1312_v1 = vsel %vm1295_vm4, %v1310_v42, %v1311_v41  ;;  %v1319_v35 = vsel %vm1295_vm4, %v1317_v53, %v1318_v18  ;;  %v1536_v15 = vmax.f32 %v1079_v28, %v1298_v14  ;;  %v1539_v55 = vmax.f32 %v1082_v23, %v1305_v26 }
  0xa1   : > { %v1326_v46 = vsel %vm1295_vm4, %v1324_v2, %v1325_v17  ;;  %v1542_v58 = vmax.f32 %v1085_v61, %v1312_v1  ;;  %v1545_v0 = vmax.f32 %v1088_v54, %v1319_v35  ;;  %v1610_v9 = vrot.slane %v4786_v24, 4 }
  0xa2   : > { %v1548_v11 = vmax.f32 %v1091_v52, %v1326_v46  ;;  %v1617_v3 = vrot.slane %v4790_v25, 4  ;;  %v1623_v42 = vrot.slane %v4792_v47, 4  ;;  %v1624_v28 = vrot.slane %v4794_v34, 4  ;;  %v4909_v47 = vld [vmem:[#allocation2 + $0x118] sm:$0xf] }
  0xa3   : > { %v1630_v53 = vrot.slane %v4807_v56, 4  ;;  %v1631_v23 = vrot.slane %v4810_v40, 4  ;;  %v1611_v1 = vsel %vm1608_vm5, %v1609_v30, %v1610_v9  ;;  %v1637_v35 = vrot.slane %v4813_v43, 4 }
  0xa4   : > { %v1618_v2 = vsel %vm1608_vm5, %v1616_v57, %v1617_v3  ;;  %v1638_v46 = vrot.slane %v4816_v20, 4  ;;  %v1625_v62 = vsel %vm1608_vm5, %v1623_v42, %v1624_v28  ;;  %v1849_v60 = vmax.f32 %v1536_v15, %v1611_v1 }
  0xa5   : > { %v1632_v24 = vsel %vm1608_vm5, %v1630_v53, %v1631_v23  ;;  %v4907_v25 = vmax.f32 %v1539_v55, %v1618_v2  ;;  %v4912_v56 = vmax.f32 %v1542_v58, %v1625_v62  ;;  %v8155_v57 = vmax.f32 %v4515_v45, %v4650_v16 }
  0xa6   : > { %v1639_v34 = vsel %vm1608_vm5, %v1637_v35, %v1638_v46  ;;  %v1858_v30 = vmax.f32 %v1545_v0, %v1632_v24  ;;  %v8156_v15 = vrot.slane %v4729_v27, 2  ;;  %v8157_v61 = vrot.slane %v4732_v32, 2 }
  0xa7   : > { %v4918_v40 = vmax.f32 %v8155_v57, %v4909_v47  ;;  %v4920_v43 = vmax.f32 %v1548_v11, %v1639_v34  ;;  %v1971_v20 = vmax.f32 %v1849_v60, %v4907_v25  ;;  %v1313_v45 = vrot.slane %v4735_v33, 2 }
  0xa8   : > { %v1300_v55 = vsel %vm1295_vm4, %v1297_v4, %v8156_v15  ;;  %v1307_v58 = vsel %vm1295_vm4, %v1304_v48, %v8157_v61  ;;  %v4930_v0 = vmax.f32 %v4912_v56, %v1858_v30  ;;  %v1320_v52 = vrot.slane %v4759_v5, 2 }
  0xa9   : > { %v872_v54 = vrot.slane %v4918_v40, 1  ;;  %3872 = vst.msk [vmem:[%s4470_s27 + $0x1fc] sm:$0xf0] %vm1922_vm6, %v4920_v43  ;;  %v4939_v14 = vmax.f32 %v1858_v30, %v4920_v43  ;;  %v1537_v4 = vmax.f32 %v4859_v13, %v1300_v55  ;;  %v1540_v26 = vmax.f32 %v4863_v19, %v1307_v58 }
  0xaa   : > { %v8158_v48 = vrot.slane %v4506_v36, 4  ;;  %v2037_v42 = vmax.f32 %v1971_v20, %v4930_v0  ;;  %v8159_v53 = vrot.slane %v4822_v50, 1  ;;  %v1314_v2 = vsel %vm1295_vm4, %v1311_v41, %v1313_v45 }
  0xab   : > { %v1321_v35 = vsel %vm1295_vm4, %v1318_v18, %v1320_v52  ;;  %v1543_v13 = vmax.f32 %v4871_v21, %v1314_v2  ;;  %v8160_v24 = vrot.slane %v4509_v37, 4  ;;  %v8162_v34 = vrot.slane %v4600_v31, 4 }
  0xac   : > { %v1613_v11 = vsel %vm1608_vm5, %v1610_v9, %v8158_v48  ;;  %v873_v1 = vsel %vm838_vm3, %v8159_v53, %v872_v54  ;;  %v1546_v19 = vmax.f32 %v4875_v51, %v1321_v35  ;;  %v4961_v60 = vmax.f32 %v2037_v42, %v4920_v43 }
  0xad   : > { %v4953_v62 = vmax.f32 %v4822_v50, %v873_v1  ;;  %v1620_v9 = vsel %vm1608_vm5, %v1617_v3, %v8160_v24  ;;  %v1627_v41 = vsel %vm1608_vm5, %v1624_v28, %v8162_v34  ;;  %v8163_v18 = vrot.slane %v4692_v6, 4  ;;  %v5292_v3 = vld [vmem:[#allocation2 + $0x188] sm:$0xff] }
  0xae   : > { %8161 = vst [vmem:[#allocation29_spill] sm:$0xff] %v4961_v60  ;;  %v1640_v57 = vrot.slane %v4822_v50, 4  ;;  %v1850_v51 = vmax.f32 %v1537_v4, %v1613_v11  ;;  %v4971_v20 = vmax.f32 %v1540_v26, %v1620_v9  ;;  %v4973_v15 = vmax.f32 %v1543_v13, %v1627_v41 }
  0xaf   : > { %v1634_v30 = vsel %vm1608_vm5, %v1631_v23, %v8163_v18  ;;  %v1327_v21 = vrot.slane %v4953_v62, 2  ;;  %v8164_v58 = vrot.slane %v4554_v8, 1  ;;  %v8165_v26 = vrot.slane %v4572_v22, 1 }
  0xb0   : > { %v1641_v61 = vsel %vm1608_vm5, %v1638_v46, %v1640_v57  ;;  %v1859_v28 = vmax.f32 %v1546_v19, %v1634_v30  ;;  %v1972_v50 = vmax.f32 %v1850_v51, %v4971_v20  ;;  %v8166_v42 = vrot.slane %v4593_v29, 1 }
  0xb1   : > { %v1328_v23 = vsel %vm1295_vm4, %v1325_v17, %v1327_v21  ;;  %v1176_v4 = vmax.f32 %v4554_v8, %v8164_v58  ;;  %v1177_v48 = vmax.f32 %v4572_v22, %v8165_v26  ;;  %v1179_v53 = vmax.f32 %v4918_v40, %v872_v54 }
  0xb2   : > { %v1549_v11 = vmax.f32 %v4879_v38, %v1328_v23  ;;  %v4990_v46 = vmax.f32 %v4973_v15, %v1859_v28  ;;  %v1178_v17 = vmax.f32 %v4593_v29, %v8166_v42  ;;  %v1301_v1 = vrot.slane %v4749_v49, 2 }
  0xb3   : > { %v1308_v2 = vrot.slane %v1176_v4, 2  ;;  %v1315_v35 = vrot.slane %v1177_v48, 2  ;;  %v1614_v13 = vrot.slane %v4552_v7, 4  ;;  %v1329_v9 = vrot.slane %v1179_v53, 2 }
  0xb4   : > { %v4998_v19 = vmax.f32 %v1549_v11, %v1641_v61  ;;  %v2038_v38 = vmax.f32 %v1972_v50, %v4990_v46  ;;  %v1322_v24 = vrot.slane %v1178_v17, 2  ;;  %v8167_v34 = vrot.slane %v4729_v27, 2 }
  0xb5   : > { %v8168_v18 = vrot.slane %v4732_v32, 2  ;;  %v1316_v49 = vsel %vm1295_vm4, %v1313_v45, %v1315_v35  ;;  %v8169_v30 = vrot.slane %v4506_v36, 4  ;;  %v1330_v50 = vsel %vm1295_vm4, %v1327_v21, %v1329_v9 }
  0xb6   : > { %v1302_v41 = vsel %vm1295_vm4, %v8167_v34, %v1301_v1  ;;  %3873 = vst.msk [vmem:[%s4470_s27 + $0x204] sm:$0xff] %vm185_vm0, %v4998_v19  ;;  %v5015_v51 = vmax.f32 %v1859_v28, %v4998_v19  ;;  %v5018_v61 = vmax.f32 %v2038_v38, %v4998_v19  ;;  %v1323_v23 = vsel %vm1295_vm4, %v1320_v52, %v1322_v24  ;;  %v8176_v24 = vld [vmem:[#allocation16_spill] sm:$0xff] }
  0xb7   : > { %v1309_v54 = vsel %vm1295_vm4, %v8168_v18, %v1308_v2  ;;  %v1615_v7 = vsel %vm1608_vm5, %v8169_v30, %v1614_v13  ;;  %v1538_v58 = vmax.f32 %v4729_v27, %v1302_v41  ;;  %v1544_v36 = vmax.f32 %v4735_v33, %v1316_v49  ;;  %v370_v13 = vld [vmem:[#allocation2 + $0x120] sm:$0xff]  ;;  %v371_v41 = vld [vmem:[#allocation2 + $0x128] sm:$0xff]  ;;  %v5073_v18 = vld [vmem:[#allocation2 + $0x130] sm:$0xff] }
  0xb8   : > { %8170 = vst [vmem:[#allocation30_spill] sm:$0xff] %v5018_v61  ;;  %v1541_v45 = vmax.f32 %v4732_v32, %v1309_v54  ;;  %v1547_v4 = vmax.f32 %v4759_v5, %v1323_v23  ;;  %v7943_v26 = vrot.slane %v5018_v61, 1  ;;  %v1550_v48 = vmax.f32 %v4953_v62, %v1330_v50  ;;  %v8177_v49 = vld [vmem:[#allocation11_spill] sm:$0xff] }
  0xb9   : > { %v1621_v11 = vrot.slane %v4554_v8, 4  ;;  %v1628_v52 = vrot.slane %v4572_v22, 4  ;;  %v1635_v21 = vrot.slane %v4593_v29, 4  ;;  %v1642_v27 = vrot.slane %v4918_v40, 4 }
  0xba   : > { %v1851_v42 = vmax.f32 %v1538_v58, %v1615_v7  ;;  %v8171_v32 = vrot.slane %v4509_v37, 4  ;;  %v5038_v5 = vmax.f32 %v4761_v10, %v4800_v12  ;;  %v5042_v62 = vmax.f32 %v4763_v39, %v4802_v63  ;;  %v8174_v39 = vld [vmem:[#allocation21_spill] sm:$0xff] }
  0xbb   : > { %v5046_v8 = vmax.f32 %v4671_v59, %v4804_v44  ;;  %v8172_v22 = vrot.slane %v4600_v31, 4  ;;  %v8173_v37 = vrot.slane %v4692_v6, 4  ;;  %v1643_v10 = vsel %vm1608_vm5, %v1640_v57, %v1642_v27  ;;  %v8175_v31 = vld [vmem:[#allocation22_spill] sm:$0xff] }
  0xbc   : > { %v1622_v33 = vsel %vm1608_vm5, %v8171_v32, %v1621_v11  ;;  %v5055_v2 = vmax.f32 %v1550_v48, %v1643_v10  ;;  %v570_v35 = vmax.f32 %v8174_v39, %v5038_v5  ;;  %v571_v38 = vmax.f32 %v8175_v31, %v5042_v62 }
  0xbd   : > { %v1629_v29 = vsel %vm1608_vm5, %v8172_v22, %v1628_v52  ;;  %v1636_v40 = vsel %vm1608_vm5, %v8173_v37, %v1635_v21  ;;  %v1854_v17 = vmax.f32 %v1541_v45, %v1622_v33  ;;  %v572_v6 = vmax.f32 %v8176_v24, %v5046_v8  ;;  %v5086_v21 = vld [vmem:[#allocation2 + $0x138] sm:$0xf] }
  0xbe   : > { %v1857_v53 = vmax.f32 %v1544_v36, %v1629_v29  ;;  %v1860_v1 = vmax.f32 %v1547_v4, %v1636_v40  ;;  %v1974_v9 = vmax.f32 %v4907_v25, %v4912_v56  ;;  %3874 = vst.msk [vmem:[%s4470_s27 + $0x20c] sm:$0xf] %vm221_vm1, %v5055_v2  ;;  %v666_v54 = vmax.f32 %v570_v35, %v370_v13  ;;  %v8178_v36 = vld [vmem:[#allocation10_spill] sm:$0xff] }
  0xbf   : > { %v1973_v59 = vmax.f32 %v1851_v42, %v1854_v17  ;;  %v5077_v30 = vmax.f32 %v8177_v49, %v4909_v47  ;;  %v667_v7 = vmax.f32 %v571_v38, %v371_v41  ;;  %v668_v23 = vmax.f32 %v572_v6, %v5073_v18 }
  0xc0   : > { %v5068_v57 = vmax.f32 %v1857_v53, %v1860_v1  ;;  %v5071_v34 = vmax.f32 %v1860_v1, %v5055_v2  ;;  %v2040_v25 = vmax.f32 %v1974_v9, %v4939_v14  ;;  %v1975_v56 = vmax.f32 %v4971_v20, %v4973_v15 }
  0xc1   : > { %v874_v58 = vrot.slane %v666_v54, 1  ;;  %v1644_v45 = vrot.slane %v666_v54, 4  ;;  %v573_v4 = vmax.f32 %v8178_v36, %v5077_v30  ;;  %v875_v48 = vrot.slane %v667_v7, 1 }
  0xc2   : > { %v2039_v50 = vmax.f32 %v1973_v59, %v5068_v57  ;;  %v877_v11 = vrot.slane %v668_v23, 1  ;;  %v1645_v52 = vrot.slane %v667_v7, 4  ;;  %v1647_v27 = vrot.slane %v668_v23, 4 }
  0xc3   : > { %v669_v32 = vmax.f32 %v573_v4, %v5086_v21  ;;  %v5093_v20 = vmax.f32 %v1975_v56, %v5015_v51  ;;  %v1976_v15 = vmax.f32 %v1854_v17, %v1857_v53  ;;  %v876_v33 = vsel %vm838_vm3, %v874_v58, %v875_v48 }
  0xc4   : > { %v5089_v42 = vmax.f32 %v2039_v50, %v5055_v2  ;;  %v878_v22 = vsel %vm838_vm3, %v875_v48, %v877_v11  ;;  %v1646_v29 = vsel %vm1608_vm5, %v1644_v45, %v1645_v52  ;;  %v1648_v37 = vsel %vm1608_vm5, %v1645_v52, %v1647_v27  ;;  %v5121_v50 = vld [vmem:[#allocation2 + $0x148] sm:$0xff]  ;;  %v8180_v45 = vld [vmem:[#allocation23_spill] sm:$0xff] }
  0xc5   : > { %v1094_v10 = vmax.f32 %v666_v54, %v876_v33  ;;  %v1095_v1 = vmax.f32 %v667_v7, %v878_v22  ;;  %v879_v39 = vrot.slane %v669_v32, 1  ;;  %v1649_v35 = vrot.slane %v669_v32, 4  ;;  %v5118_v7 = vld [vmem:[#allocation2 + $0x140] sm:$0xff] }
  0xc6   : > { %v2220_v40 = vrot.slane %v5089_v42, 1  ;;  %v2042_v59 = vmax.f32 %v1976_v15, %v5071_v34  ;;  %v5102_v31 = vmax.f32 %v4800_v12, %v370_v13  ;;  %v5105_v17 = vmax.f32 %v4802_v63, %v371_v41 }
  0xc7   : > { %v1331_v24 = vrot.slane %v1094_v10, 2  ;;  %v1332_v6 = vrot.slane %v1095_v1, 2  ;;  %v880_v54 = vsel %vm838_vm3, %v877_v11, %v879_v39  ;;  %v1180_v49 = vmax.f32 %v669_v32, %v879_v39  ;;  %v8181_v11 = vld [vmem:[#allocation24_spill] sm:$0xff] }
  0xc8   : > { %v2221_v53 = vsel %vm838_vm3, %v7943_v26, %v2220_v40  ;;  %v5111_v38 = vmax.f32 %v5089_v42, %v2220_v40  ;;  %v1650_v12 = vsel %vm1608_vm5, %v1647_v27, %v1649_v35  ;;  %v1096_v56 = vmax.f32 %v668_v23, %v880_v54  ;;  %v8182_v32 = vld [vmem:[#allocation20_spill] sm:$0xff]  ;;  %v5143_v40 = vld [vmem:[#allocation2 + $0x150] sm:$0xff] }
  0xc9   : > { %v5114_v9 = vmax.f32 %v5018_v61, %v2221_v53  ;;  %v1333_v63 = vsel %vm1295_vm4, %v1331_v24, %v1332_v6  ;;  %v5125_v58 = vmax.f32 %v4804_v44, %v5073_v18  ;;  %v574_v36 = vmax.f32 %v8180_v45, %v5102_v31 }
  0xca   : > { %v1551_v4 = vmax.f32 %v1094_v10, %v1333_v63  ;;  %v1336_v48 = vrot.slane %v1180_v49, 2  ;;  %v575_v52 = vmax.f32 %v8181_v11, %v5105_v17  ;;  %v5133_v27 = vmax.f32 %v4909_v47, %v5086_v21  ;;  %v5171_v11 = vld [vmem:[#allocation2 + $0x158] sm:$0xf] }
  0xcb   : > { %8179 = vst [vmem:[#allocation21_spill] sm:$0xff] %v5114_v9  ;;  %v1334_v23 = vrot.slane %v1096_v56, 2  ;;  %v576_v15 = vmax.f32 %v8182_v32, %v5125_v58  ;;  %v670_v44 = vmax.f32 %v574_v36, %v5118_v7  ;;  %v5139_v33 = vmax.f32 %v370_v13, %v5118_v7 }
  0xcc   : > { %v5141_v22 = vmax.f32 %v1551_v4, %v1646_v29  ;;  %v671_v10 = vmax.f32 %v575_v52, %v5121_v50  ;;  %v577_v39 = vmax.f32 %v4650_v16, %v5133_v27  ;;  %v5149_v47 = vmax.f32 %v371_v41, %v5121_v50 }
  0xcd   : > { %v1335_v35 = vsel %vm1295_vm4, %v1332_v6, %v1334_v23  ;;  %v1337_v53 = vsel %vm1295_vm4, %v1334_v23, %v1336_v48  ;;  %v672_v24 = vmax.f32 %v576_v15, %v5143_v40  ;;  %v881_v13 = vrot.slane %v670_v44, 1 }
  0xce   : > { %3875 = vst.msk [vmem:[%s4470_s27 + $0x20c] sm:$0xf0] %vm1922_vm6, %v5141_v22  ;;  %v5159_v29 = vmax.f32 %v4920_v43, %v5141_v22  ;;  %v5162_v54 = vmax.f32 %v2040_v25, %v5141_v22  ;;  %v1552_v16 = vmax.f32 %v1095_v1, %v1335_v35  ;;  %v1553_v41 = vmax.f32 %v1096_v56, %v1337_v53 }
  0xcf   : > { %v882_v49 = vrot.slane %v671_v10, 1  ;;  %v884_v6 = vrot.slane %v672_v24, 1  ;;  %v1651_v63 = vrot.slane %v670_v44, 4  ;;  %v1652_v45 = vrot.slane %v671_v10, 4 }
  0xd0   : > { %8183 = vst [vmem:[#allocation22_spill] sm:$0xff] %v5162_v54  ;;  %v5165_v4 = vmax.f32 %v1552_v16, %v1648_v37  ;;  %v5167_v48 = vmax.f32 %v1553_v41, %v1650_v12  ;;  %v2043_v43 = vmax.f32 %v4930_v0, %v5159_v29  ;;  %v673_v52 = vmax.f32 %v577_v39, %v5171_v11 }
  0xd1   : > { %v883_v25 = vsel %vm838_vm3, %v881_v13, %v882_v49  ;;  %v885_v1 = vsel %vm838_vm3, %v882_v49, %v884_v6  ;;  %v1653_v56 = vsel %vm1608_vm5, %v1651_v63, %v1652_v45  ;;  %v1654_v35 = vrot.slane %v672_v24, 4  ;;  %v5208_v63 = vld [vmem:[#allocation2 + $0x160] sm:$0xff] }
  0xd2   : > { %3876 = vst.msk [vmem:[%s4470_s27 + $0x214] sm:$0xff] %vm185_vm0, %v5165_v4  ;;  %v5182_v37 = vmax.f32 %v4998_v19, %v5165_v4  ;;  %v5186_v0 = vmax.f32 %v5093_v20, %v5165_v4  ;;  %v5193_v12 = vmax.f32 %v5055_v2, %v5167_v48  ;;  %v5196_v23 = vmax.f32 %v2042_v59, %v5167_v48 }
  0xd3   : > { %3877 = vst.msk [vmem:[%s4470_s27 + $0x21c] sm:$0xf] %vm221_vm1, %v5167_v48  ;;  %v1097_v32 = vmax.f32 %v670_v44, %v883_v25  ;;  %v1098_v15 = vmax.f32 %v671_v10, %v885_v1  ;;  %v886_v39 = vrot.slane %v673_v52, 1  ;;  %v1656_v53 = vrot.slane %v673_v52, 4 }
  0xd4   : > { %8184 = vst [vmem:[#allocation16_spill] sm:$0xff] %v5186_v0  ;;  %v2044_v20 = vmax.f32 %v4990_v46, %v5182_v37  ;;  %v5203_v13 = vmax.f32 %v5073_v18, %v5143_v40  ;;  %v1655_v59 = vsel %vm1608_vm5, %v1652_v45, %v1654_v35  ;;  %v578_v46 = vmax.f32 %v5038_v5, %v5139_v33 }
  0xd5   : > { %v1338_v16 = vrot.slane %v1097_v32, 2  ;;  %v1339_v2 = vrot.slane %v1098_v15, 2  ;;  %v887_v41 = vsel %vm838_vm3, %v884_v6, %v886_v39  ;;  %v1181_v10 = vmax.f32 %v673_v52, %v886_v39  ;;  %v5221_v39 = vld [vmem:[#allocation2 + $0x168] sm:$0xff] }
  0xd6   : > { %v1099_v44 = vmax.f32 %v672_v24, %v887_v41  ;;  %v1657_v49 = vsel %vm1608_vm5, %v1654_v35, %v1656_v53  ;;  %v579_v18 = vmax.f32 %v5042_v62, %v5149_v47  ;;  %v580_v1 = vmax.f32 %v5046_v8, %v5203_v13  ;;  %v5223_v35 = vld [vmem:[#allocation2 + $0x170] sm:$0xff] }
  0xd7   : > { %v1340_v25 = vsel %vm1295_vm4, %v1338_v16, %v1339_v2  ;;  %v5219_v6 = vmax.f32 %v5086_v21, %v5171_v11  ;;  %v1343_v52 = vrot.slane %v1181_v10, 2  ;;  %v674_v5 = vmax.f32 %v578_v46, %v5208_v63 }
  0xd8   : > { %v1554_v24 = vmax.f32 %v1097_v32, %v1340_v25  ;;  %v1341_v45 = vrot.slane %v1099_v44, 2  ;;  %v675_v53 = vmax.f32 %v579_v18, %v5221_v39  ;;  %v676_v62 = vmax.f32 %v580_v1, %v5223_v35 }
  0xd9   : > { %v581_v8 = vmax.f32 %v5077_v30, %v5219_v6  ;;  %v5232_v21 = vmax.f32 %v5118_v7, %v5208_v63  ;;  %v888_v10 = vrot.slane %v674_v5, 1  ;;  %v1658_v7 = vrot.slane %v674_v5, 4 }
  0xda   : > { %v1867_v32 = vmax.f32 %v1554_v24, %v1653_v56  ;;  %v1342_v16 = vsel %vm1295_vm4, %v1339_v2, %v1341_v45  ;;  %v1344_v41 = vsel %vm1295_vm4, %v1341_v45, %v1343_v52  ;;  %v889_v46 = vrot.slane %v675_v53, 1 }
  0xdb   : > { %v1555_v25 = vmax.f32 %v1098_v15, %v1342_v16  ;;  %v1556_v55 = vmax.f32 %v1099_v44, %v1344_v41  ;;  %v891_v18 = vrot.slane %v676_v62, 1  ;;  %v1659_v56 = vrot.slane %v675_v53, 4  ;;  %v5252_v41 = vld [vmem:[#allocation2 + $0x178] sm:$0xf] }
  0xdc   : > { %3878 = vst.msk [vmem:[%s4470_s27 + $0x21c] sm:$0xf0] %vm1922_vm6, %v1867_v32  ;;  %v5239_v1 = vmax.f32 %v5141_v22, %v1867_v32  ;;  %v5241_v30 = vmax.f32 %v2043_v43, %v1867_v32  ;;  %v890_v15 = vsel %vm838_vm3, %v888_v10, %v889_v46  ;;  %v5274_v10 = vmax.f32 %v5121_v50, %v5221_v39 }
  0xdd   : > { %v5243_v24 = vmax.f32 %v1555_v25, %v1655_v59  ;;  %v5245_v2 = vmax.f32 %v1556_v55, %v1657_v49  ;;  %v892_v44 = vsel %vm838_vm3, %v889_v46, %v891_v18  ;;  %v1100_v45 = vmax.f32 %v674_v5, %v890_v15 }
  0xde   : > { %8185 = vst [vmem:[#allocation11_spill] sm:$0xff] %v5241_v30  ;;  %v1101_v52 = vmax.f32 %v675_v53, %v892_v44  ;;  %v1660_v16 = vsel %vm1608_vm5, %v1658_v7, %v1659_v56  ;;  %v2046_v22 = vmax.f32 %v4939_v14, %v5239_v1  ;;  %v677_v14 = vmax.f32 %v581_v8, %v5252_v41  ;;  %v5284_v7 = vld [vmem:[#allocation2 + $0x180] sm:$0xff] }
  0xdf   : > { %3879 = vst.msk [vmem:[%s4470_s27 + $0x224] sm:$0xff] %vm185_vm0, %v5243_v24  ;;  %v5259_v55 = vmax.f32 %v5165_v4, %v5243_v24  ;;  %v5262_v43 = vmax.f32 %v2044_v20, %v5243_v24  ;;  %v5269_v59 = vmax.f32 %v5167_v48, %v5245_v2  ;;  %v1345_v49 = vrot.slane %v1100_v45, 2 }
  0xe0   : > { %3880 = vst.msk [vmem:[%s4470_s27 + $0x22c] sm:$0xf] %vm221_vm1, %v5245_v2  ;;  %v1346_v5 = vrot.slane %v1101_v52, 2  ;;  %v1661_v53 = vrot.slane %v676_v62, 4  ;;  %v893_v4 = vrot.slane %v677_v14, 1  ;;  %v1663_v25 = vrot.slane %v677_v14, 4 }
  0xe1   : > { %8186 = vst [vmem:[#allocation10_spill] sm:$0xff] %v5262_v43  ;;  %v2047_v20 = vmax.f32 %v5015_v51, %v5259_v55  ;;  %v5280_v46 = vmax.f32 %v5143_v40, %v5223_v35  ;;  %v582_v15 = vmax.f32 %v5102_v31, %v5232_v21  ;;  %v583_v50 = vmax.f32 %v5105_v17, %v5274_v10  ;;  %v5403_v43 = vld [vmem:[#allocation2 + $0x1b8] sm:$0xf] }
  0xe2   : > { %v1347_v48 = vsel %vm1295_vm4, %v1345_v49, %v1346_v5  ;;  %v1662_v8 = vsel %vm1608_vm5, %v1659_v56, %v1661_v53  ;;  %v894_v51 = vsel %vm838_vm3, %v891_v18, %v893_v4  ;;  %v1182_v28 = vmax.f32 %v677_v14, %v893_v4 }
  0xe3   : > { %v1557_v44 = vmax.f32 %v1100_v45, %v1347_v48  ;;  %v1664_v40 = vsel %vm1608_vm5, %v1661_v53, %v1663_v25  ;;  %v1102_v49 = vmax.f32 %v676_v62, %v894_v51  ;;  %v584_v56 = vmax.f32 %v5125_v58, %v5280_v46  ;;  %v5300_v45 = vld [vmem:[#allocation2 + $0x190] sm:$0xff] }
  0xe4   : > { %v678_v26 = vmax.f32 %v582_v15, %v5284_v7  ;;  %v679_v31 = vmax.f32 %v583_v50, %v5292_v3  ;;  %v1350_v17 = vrot.slane %v1182_v28, 2  ;;  %v5304_v18 = vmax.f32 %v5171_v11, %v5252_v41 }
  0xe5   : > { %v5298_v36 = vmax.f32 %v1557_v44, %v1660_v16  ;;  %v5308_v14 = vmax.f32 %v5208_v63, %v5284_v7  ;;  %v1348_v62 = vrot.slane %v1102_v49, 2  ;;  %v680_v58 = vmax.f32 %v584_v56, %v5300_v45 }
  0xe6   : > { %v895_v53 = vrot.slane %v678_v26, 1  ;;  %v896_v4 = vrot.slane %v679_v31, 1  ;;  %v1665_v11 = vrot.slane %v678_v26, 4  ;;  %v1666_v25 = vrot.slane %v679_v31, 4 }
  0xe7   : > { %3881 = vst.msk [vmem:[%s4470_s27 + $0x22c] sm:$0xf0] %vm1922_vm6, %v5298_v36  ;;  %v5315_v28 = vmax.f32 %v1867_v32, %v5298_v36  ;;  %v5318_v16 = vmax.f32 %v2046_v22, %v5298_v36  ;;  %v1349_v48 = vsel %vm1295_vm4, %v1346_v5, %v1348_v62  ;;  %v1351_v63 = vsel %vm1295_vm4, %v1348_v62, %v1350_v17 }
  0xe8   : > { %v897_v15 = vsel %vm838_vm3, %v895_v53, %v896_v4  ;;  %v898_v50 = vrot.slane %v680_v58, 1  ;;  %v1558_v44 = vmax.f32 %v1101_v52, %v1349_v48  ;;  %v1559_v51 = vmax.f32 %v1102_v49, %v1351_v63  ;;  %v5333_v53 = vld [vmem:[#allocation2 + $0x198] sm:$0xf]  ;;  %v5369_v63 = vld [vmem:[#allocation2 + $0x1a0] sm:$0xff] }
  0xe9   : > { %8187 = vst [vmem:[#allocation23_spill] sm:$0xff] %v5318_v16  ;;  %v1103_v56 = vmax.f32 %v678_v26, %v897_v15  ;;  %v1667_v19 = vsel %vm1608_vm5, %v1665_v11, %v1666_v25  ;;  %v2049_v22 = vmax.f32 %v5159_v29, %v5315_v28  ;;  %v585_v5 = vmax.f32 %v5133_v27, %v5304_v18 }
  0xea   : > { %v899_v32 = vsel %vm838_vm3, %v896_v4, %v898_v50  ;;  %v1668_v9 = vrot.slane %v680_v58, 4  ;;  %v5329_v17 = vmax.f32 %v1558_v44, %v1662_v8  ;;  %v5331_v62 = vmax.f32 %v1559_v51, %v1664_v40 }
  0xeb   : > { %v1104_v52 = vmax.f32 %v679_v31, %v899_v32  ;;  %v1352_v49 = vrot.slane %v1103_v56, 2  ;;  %v681_v26 = vmax.f32 %v585_v5, %v5333_v53  ;;  %v5339_v11 = vmax.f32 %v5221_v39, %v5292_v3  ;;  %v5379_v5 = vld [vmem:[#allocation2 + $0x1a8] sm:$0xff] }
  0xec   : > { %v1669_v4 = vsel %vm1608_vm5, %v1666_v25, %v1668_v9  ;;  %v5343_v27 = vmax.f32 %v5223_v35, %v5300_v45  ;;  %3882 = vst.msk [vmem:[%s4470_s27 + $0x234] sm:$0xff] %vm185_vm0, %v5329_v17  ;;  %v5350_v29 = vmax.f32 %v5243_v24, %v5329_v17  ;;  %v5353_v8 = vmax.f32 %v2047_v20, %v5329_v17 }
  0xed   : > { %3883 = vst.msk [vmem:[%s4470_s27 + $0x23c] sm:$0xf] %vm221_vm1, %v5331_v62  ;;  %v5360_v39 = vmax.f32 %v5245_v2, %v5331_v62  ;;  %v1353_v40 = vrot.slane %v1104_v52, 2  ;;  %v900_v35 = vrot.slane %v681_v26, 1  ;;  %v1670_v31 = vrot.slane %v681_v26, 4 }
  0xee   : > { %8188 = vst [vmem:[#allocation24_spill] sm:$0xff] %v5353_v8  ;;  %v586_v25 = vmax.f32 %v5139_v33, %v5308_v14  ;;  %v587_v24 = vmax.f32 %v5149_v47, %v5339_v11  ;;  %v2050_v20 = vmax.f32 %v5182_v37, %v5350_v29  ;;  %v588_v15 = vmax.f32 %v5203_v13, %v5343_v27 }
  0xef   : > { %v1354_v48 = vsel %vm1295_vm4, %v1352_v49, %v1353_v40  ;;  %v5375_v44 = vmax.f32 %v5252_v41, %v5333_v53  ;;  %v901_v33 = vsel %vm838_vm3, %v898_v50, %v900_v35  ;;  %v1183_v32 = vmax.f32 %v681_v26, %v900_v35  ;;  %v5381_v49 = vld [vmem:[#allocation2 + $0x1b0] sm:$0xff] }
  0xf0   : > { %v1560_v51 = vmax.f32 %v1103_v56, %v1354_v48  ;;  %v1671_v47 = vsel %vm1608_vm5, %v1668_v9, %v1670_v31  ;;  %v1105_v37 = vmax.f32 %v680_v58, %v901_v33  ;;  %v682_v8 = vmax.f32 %v586_v25, %v5369_v63 }
  0xf1   : > { %v683_v13 = vmax.f32 %v587_v24, %v5379_v5  ;;  %v684_v16 = vmax.f32 %v588_v15, %v5381_v49  ;;  %v1357_v60 = vrot.slane %v1183_v32, 2  ;;  %v589_v50 = vmax.f32 %v5219_v6, %v5375_v44 }
  0xf2   : > { %v1873_v41 = vmax.f32 %v1560_v51, %v1667_v19  ;;  %v5390_v56 = vmax.f32 %v5284_v7, %v5369_v63  ;;  %v1355_v9 = vrot.slane %v1105_v37, 2  ;;  %v902_v26 = vrot.slane %v682_v8, 1 }
  0xf3   : > { %v903_v35 = vrot.slane %v683_v13, 1  ;;  %v905_v31 = vrot.slane %v684_v16, 1  ;;  %v1672_v19 = vrot.slane %v682_v8, 4  ;;  %v1673_v24 = vrot.slane %v683_v13, 4 }
  0xf4   : > { %3884 = vst.msk [vmem:[%s4470_s27 + $0x23c] sm:$0xf0] %vm1922_vm6, %v1873_v41  ;;  %v5395_v58 = vmax.f32 %v5298_v36, %v1873_v41  ;;  %v5397_v25 = vmax.f32 %v2049_v22, %v1873_v41  ;;  %v1356_v48 = vsel %vm1295_vm4, %v1353_v40, %v1355_v9  ;;  %v1358_v6 = vsel %vm1295_vm4, %v1355_v9, %v1357_v60 }
  0xf5   : > { %v904_v7 = vsel %vm838_vm3, %v902_v26, %v903_v35  ;;  %v906_v15 = vsel %vm838_vm3, %v903_v35, %v905_v31  ;;  %v1561_v51 = vmax.f32 %v1104_v52, %v1356_v48  ;;  %v1562_v33 = vmax.f32 %v1105_v37, %v1358_v6 }
  0xf6   : > { %8189 = vst [vmem:[#allocation20_spill] sm:$0xff] %v5397_v25  ;;  %v1106_v32 = vmax.f32 %v682_v8, %v904_v7  ;;  %v1107_v61 = vmax.f32 %v683_v13, %v906_v15  ;;  %v1674_v36 = vsel %vm1608_vm5, %v1672_v19, %v1673_v24  ;;  %v2052_v22 = vmax.f32 %v5239_v1, %v5395_v58 }
  0xf7   : > { %v685_v40 = vmax.f32 %v589_v50, %v5403_v43  ;;  %v1675_v60 = vrot.slane %v684_v16, 4  ;;  %v1874_v9 = vmax.f32 %v1561_v51, %v1669_v4  ;;  %v5409_v26 = vmax.f32 %v1562_v33, %v1671_v47 }
  0xf8   : > { %v1359_v35 = vrot.slane %v1106_v32, 2  ;;  %v1360_v52 = vrot.slane %v1107_v61, 2  ;;  %v5414_v48 = vmax.f32 %v5292_v3, %v5379_v5  ;;  %v5439_v15 = vmax.f32 %v5300_v45, %v5381_v49 }
  0xf9   : > { %8190 = vst [vmem:[#allocation31_spill] sm:$0xff] %v5409_v26  ;;  %v907_v37 = vrot.slane %v685_v40, 1  ;;  %v1676_v8 = vsel %vm1608_vm5, %v1673_v24, %v1675_v60  ;;  %v1677_v13 = vrot.slane %v685_v40, 4  ;;  %3885 = vst.msk [vmem:[%s4470_s27 + $0x244] sm:$0xff] %vm185_vm0, %v1874_v9  ;;  %v5419_v1 = vmax.f32 %v5329_v17, %v1874_v9  ;;  %v5433_v17 = vld [vmem:[#allocation2 + $0x1c0] sm:$0xff] }
  0xfa   : > { %v5421_v50 = vmax.f32 %v2050_v20, %v1874_v9  ;;  %3886 = vst.msk [vmem:[%s4470_s27 + $0x24c] sm:$0xf] %vm221_vm1, %v5409_v26  ;;  %v5428_v4 = vmax.f32 %v5331_v62, %v5409_v26  ;;  %v1361_v47 = vsel %vm1295_vm4, %v1359_v35, %v1360_v52  ;;  %v590_v51 = vmax.f32 %v5232_v21, %v5390_v56 }
  0xfb   : > { %v1563_v19 = vmax.f32 %v1106_v32, %v1361_v47  ;;  %v908_v3 = vsel %vm838_vm3, %v905_v31, %v907_v37  ;;  %v1184_v24 = vmax.f32 %v685_v40, %v907_v37  ;;  %v1678_v6 = vsel %vm1608_vm5, %v1675_v60, %v1677_v13  ;;  %v5451_v60 = vld [vmem:[#allocation2 + $0x1c8] sm:$0xff] }
  0xfc   : > { %8191 = vst [vmem:[#allocation32_spill] sm:$0xff] %v5421_v50  ;;  %8192 = vst [vmem:[#allocation33_spill] sm:$0xff] %v5428_v4  ;;  %v1108_v20 = vmax.f32 %v684_v16, %v908_v3  ;;  %v2053_v7 = vmax.f32 %v5259_v55, %v5419_v1  ;;  %v591_v32 = vmax.f32 %v5274_v10, %v5414_v48 }
  0xfd   : > { %v5443_v33 = vmax.f32 %v1563_v19, %v1674_v36  ;;  %v1364_v31 = vrot.slane %v1184_v24, 2  ;;  %v5449_v40 = vmax.f32 %v5333_v53, %v5403_v43  ;;  %v592_v55 = vmax.f32 %v5280_v46, %v5439_v15  ;;  %v5469_v36 = vld [vmem:[#allocation2 + $0x1d0] sm:$0xff]  ;;  %v5477_v24 = vld [vmem:[#allocation2 + $0x1d8] sm:$0xf] }
  0xfe   : > { %v1362_v16 = vrot.slane %v1108_v20, 2  ;;  %v686_v45 = vmax.f32 %v590_v51, %v5433_v17  ;;  %v5458_v21 = vmax.f32 %v5369_v63, %v5433_v17  ;;  %v687_v35 = vmax.f32 %v591_v32, %v5451_v60 }
  0xff   : > { %3887 = vst.msk [vmem:[%s4470_s27 + $0x24c] sm:$0xf0] %vm1922_vm6, %v5443_v33  ;;  %v5464_v10 = vmax.f32 %v1873_v41, %v5443_v33  ;;  %v5467_v53 = vmax.f32 %v2052_v22, %v5443_v33  ;;  %v593_v46 = vmax.f32 %v5304_v18, %v5449_v40  ;;  %v688_v13 = vmax.f32 %v592_v55, %v5469_v36 }
 0x100   : > { %v1363_v37 = vsel %vm1295_vm4, %v1360_v52, %v1362_v16  ;;  %v1365_v63 = vsel %vm1295_vm4, %v1362_v16, %v1364_v31  ;;  %v909_v47 = vrot.slane %v686_v45, 1  ;;  %v910_v3 = vrot.slane %v687_v35, 1 }
 0x101   : > { %8193 = vst [vmem:[#allocation34_spill] sm:$0xff] %v5467_v53  ;;  %v1564_v19 = vmax.f32 %v1107_v61, %v1363_v37  ;;  %v1565_v41 = vmax.f32 %v1108_v20, %v1365_v63  ;;  %v1679_v22 = vrot.slane %v686_v45, 4  ;;  %v912_v51 = vrot.slane %v688_v13, 1 }
 0x102   : > { %v1680_v32 = vrot.slane %v687_v35, 4  ;;  %v2055_v18 = vmax.f32 %v5315_v28, %v5464_v10  ;;  %v689_v52 = vmax.f32 %v593_v46, %v5477_v24  ;;  %v911_v16 = vsel %vm838_vm3, %v909_v47, %v910_v3 }
 0x103   : > { %v1877_v53 = vmax.f32 %v1564_v19, %v1676_v8  ;;  %v5482_v31 = vmax.f32 %v1565_v41, %v1678_v6  ;;  %v1682_v61 = vrot.slane %v688_v13, 4  ;;  %v913_v20 = vsel %vm838_vm3, %v910_v3, %v912_v51 }
 0x104   : > { %v1109_v55 = vmax.f32 %v686_v45, %v911_v16  ;;  %v1681_v37 = vsel %vm1608_vm5, %v1679_v22, %v1680_v32  ;;  %v914_v63 = vrot.slane %v689_v52, 1  ;;  %v1110_v8 = vmax.f32 %v687_v35, %v913_v20  ;;  %v5504_v22 = vld [vmem:[#allocation2 + $0x1e0] sm:$0xff] }
 0x105   : > { %8194 = vst [vmem:[#allocation35_spill] sm:$0xff] %v5482_v31  ;;  %3888 = vst.msk [vmem:[%s4470_s27 + $0x254] sm:$0xff] %vm185_vm0, %v1877_v53  ;;  %v5489_v50 = vmax.f32 %v1874_v9, %v1877_v53  ;;  %v5491_v25 = vmax.f32 %v2053_v7, %v1877_v53  ;;  %v5498_v28 = vmax.f32 %v5409_v26, %v5482_v31  ;;  %v1684_v7 = vrot.slane %v689_v52, 4 }
 0x106   : > { %3889 = vst.msk [vmem:[%s4470_s27 + $0x25c] sm:$0xf] %vm221_vm1, %v5482_v31  ;;  %v1366_v6 = vrot.slane %v1109_v55, 2  ;;  %v915_v45 = vsel %vm838_vm3, %v912_v51, %v914_v63  ;;  %v1683_v46 = vsel %vm1608_vm5, %v1680_v32, %v1682_v61  ;;  %v1185_v47 = vmax.f32 %v689_v52, %v914_v63 }
 0x107   : > { %8195 = vst [vmem:[#allocation36_spill] sm:$0xff] %v5491_v25  ;;  %8196 = vst [vmem:[#allocation37_spill] sm:$0xff] %v5498_v28  ;;  %v1367_v19 = vrot.slane %v1110_v8, 2  ;;  %v1111_v41 = vmax.f32 %v688_v13, %v915_v45  ;;  %v2056_v9 = vmax.f32 %v5350_v29, %v5489_v50  ;;  %v5508_v16 = vmax.f32 %v5379_v5, %v5451_v60  ;;  %v5529_v45 = vld [vmem:[#allocation2 + $0x1e8] sm:$0xff] }
 0x108   : > { %v1371_v3 = vrot.slane %v1185_v47, 2  ;;  %v5512_v35 = vmax.f32 %v5381_v49, %v5469_v36  ;;  %v594_v51 = vmax.f32 %v5308_v14, %v5458_v21  ;;  %v1685_v29 = vsel %vm1608_vm5, %v1682_v61, %v1684_v7  ;;  %v5539_v47 = vld [vmem:[#allocation2 + $0x1f0] sm:$0xff]  ;;  %v5542_v7 = vld [vmem:[#allocation2 + $0x1f8] sm:$0xf] }
 0x109   : > { %v1368_v13 = vsel %vm1295_vm4, %v1366_v6, %v1367_v19  ;;  %v1369_v32 = vrot.slane %v1111_v41, 2  ;;  %v5520_v52 = vmax.f32 %v5403_v43, %v5477_v24  ;;  %v595_v5 = vmax.f32 %v5339_v11, %v5508_v16 }
 0x10a   : > { %v1566_v20 = vmax.f32 %v1109_v55, %v1368_v13  ;;  %v596_v49 = vmax.f32 %v5343_v27, %v5512_v35  ;;  %v690_v63 = vmax.f32 %v594_v51, %v5504_v22  ;;  %v5535_v61 = vmax.f32 %v5433_v17, %v5504_v22 }
 0x10b   : > { %v1370_v14 = vsel %vm1295_vm4, %v1367_v19, %v1369_v32  ;;  %v1372_v6 = vsel %vm1295_vm4, %v1369_v32, %v1371_v3  ;;  %v597_v43 = vmax.f32 %v5375_v44, %v5520_v52  ;;  %v691_v19 = vmax.f32 %v595_v5, %v5529_v45 }
 0x10c   : > { %v5537_v11 = vmax.f32 %v1566_v20, %v1681_v37  ;;  %v1567_v55 = vmax.f32 %v1110_v8, %v1370_v14  ;;  %v1568_v27 = vmax.f32 %v1111_v41, %v1372_v6  ;;  %v692_v3 = vmax.f32 %v596_v49, %v5539_v47 }
 0x10d   : > { %v916_v51 = vrot.slane %v690_v63, 1  ;;  %v1686_v44 = vrot.slane %v690_v63, 4  ;;  %v693_v13 = vmax.f32 %v597_v43, %v5542_v7  ;;  %v917_v32 = vrot.slane %v691_v19, 1 }
 0x10e   : > { %3890 = vst.msk [vmem:[%s4470_s27 + $0x25c] sm:$0xf0] %vm1922_vm6, %v5537_v11  ;;  %v5551_v17 = vmax.f32 %v5443_v33, %v5537_v11  ;;  %v5554_v37 = vmax.f32 %v2055_v18, %v5537_v11  ;;  %v1880_v8 = vmax.f32 %v1567_v55, %v1683_v46  ;;  %v5556_v41 = vmax.f32 %v1568_v27, %v1685_v29 }
 0x10f   : > { %v919_v20 = vrot.slane %v692_v3, 1  ;;  %v1687_v5 = vrot.slane %v691_v19, 4  ;;  %v921_v49 = vrot.slane %v693_v13, 1  ;;  %v918_v46 = vsel %vm838_vm3, %v916_v51, %v917_v32 }
 0x110   : > { %8197 = vst [vmem:[#allocation38_spill] sm:$0xff] %v5554_v37  ;;  %8198 = vst [vmem:[#allocation39_spill] sm:$0xff] %v5556_v41  ;;  %v5560_v14 = vmax.f32 %v1877_v53, %v1880_v8  ;;  %v5562_v6 = vmax.f32 %v2056_v9, %v1880_v8  ;;  %v5569_v33 = vmax.f32 %v5482_v31, %v5556_v41  ;;  %v1691_v30 = vrot.slane %v693_v13, 4 }
 0x111   : > { %3891 = vst.msk [vmem:[%s4470_s27 + $0x264] sm:$0xff] %vm185_vm0, %v1880_v8  ;;  %v2058_v18 = vmax.f32 %v5395_v58, %v5551_v17  ;;  %v920_v29 = vsel %vm838_vm3, %v917_v32, %v919_v20  ;;  %v1688_v43 = vsel %vm1608_vm5, %v1686_v44, %v1687_v5  ;;  %v922_v53 = vsel %vm838_vm3, %v919_v20, %v921_v49 }
 0x112   : > { %8199 = vst [vmem:[#allocation40_spill] sm:$0xff] %v5562_v6  ;;  %3892 = vst.msk [vmem:[%s4470_s27 + $0x26c] sm:$0xf] %vm221_vm1, %v5556_v41  ;;  %v1112_v9 = vmax.f32 %v690_v63, %v918_v46  ;;  %v1113_v55 = vmax.f32 %v691_v19, %v920_v29  ;;  %v1114_v27 = vmax.f32 %v692_v3, %v922_v53  ;;  %v1689_v6 = vrot.slane %v692_v3, 4 }
 0x113   : > { %8200 = vst [vmem:[#allocation41_spill] sm:$0xff] %v5569_v33  ;;  %v2059_v37 = vmax.f32 %v5419_v1, %v5560_v14  ;;  %v1186_v25 = vmax.f32 %v693_v13, %v921_v49  ;;  %v5581_v58 = vmax.f32 %v5451_v60, %v5529_v45  ;;  %v5587_v19 = vmax.f32 %v5469_v36, %v5539_v47  ;;  %v5593_v13 = vld [vmem:[#allocation2 + $0x200] sm:$0xff]  ;;  %v5602_v49 = vld [vmem:[#allocation2 + $0x208] sm:$0xff] }
 0x114   : > { %v1373_v51 = vrot.slane %v1112_v9, 2  ;;  %v1374_v54 = vrot.slane %v1113_v55, 2  ;;  %v1376_v32 = vrot.slane %v1114_v27, 2  ;;  %v1690_v44 = vsel %vm1608_vm5, %v1687_v5, %v1689_v6 }
 0x115   : > { %v1378_v0 = vrot.slane %v1186_v25, 2  ;;  %v1692_v63 = vsel %vm1608_vm5, %v1689_v6, %v1691_v30  ;;  %v598_v1 = vmax.f32 %v5390_v56, %v5535_v61  ;;  %v599_v20 = vmax.f32 %v5414_v48, %v5581_v58  ;;  %v5606_v6 = vld [vmem:[#allocation2 + $0x210] sm:$0xff] }
 0x116   : > { %v1375_v3 = vsel %vm1295_vm4, %v1373_v51, %v1374_v54  ;;  %v1377_v60 = vsel %vm1295_vm4, %v1374_v54, %v1376_v32  ;;  %v5599_v25 = vmax.f32 %v5477_v24, %v5542_v7  ;;  %v600_v56 = vmax.f32 %v5439_v15, %v5587_v19 }
 0x117   : > { %v1569_v30 = vmax.f32 %v1112_v9, %v1375_v3  ;;  %v1570_v5 = vmax.f32 %v1113_v55, %v1377_v60  ;;  %v1379_v36 = vsel %vm1295_vm4, %v1376_v32, %v1378_v0  ;;  %v694_v48 = vmax.f32 %v598_v1, %v5593_v13  ;;  %v5650_v1 = vld [vmem:[#allocation2 + $0x218] sm:$0xf] }
 0x118   : > { %v1571_v54 = vmax.f32 %v1114_v27, %v1379_v36  ;;  %v695_v46 = vmax.f32 %v599_v20, %v5602_v49  ;;  %v601_v24 = vmax.f32 %v5449_v40, %v5599_v25  ;;  %v696_v53 = vmax.f32 %v600_v56, %v5606_v6 }
 0x119   : > { %v5612_v29 = vmax.f32 %v1569_v30, %v1688_v43  ;;  %v5614_v0 = vmax.f32 %v1570_v5, %v1690_v44  ;;  %v5619_v15 = vmax.f32 %v5504_v22, %v5593_v13  ;;  %v923_v55 = vrot.slane %v694_v48, 1 }
 0x11a   : > { %v5621_v9 = vmax.f32 %v1571_v54, %v1692_v63  ;;  %v924_v27 = vrot.slane %v695_v46, 1  ;;  %v1693_v51 = vrot.slane %v694_v48, 4  ;;  %v1694_v63 = vrot.slane %v695_v46, 4 }
 0x11b   : > { %3893 = vst.msk [vmem:[%s4470_s27 + $0x26c] sm:$0xf0] %vm1922_vm6, %v5612_v29  ;;  %v5628_v40 = vmax.f32 %v5537_v11, %v5612_v29  ;;  %v5631_v43 = vmax.f32 %v2058_v18, %v5612_v29  ;;  %v5637_v22 = vmax.f32 %v1880_v8, %v5614_v0  ;;  %v5640_v32 = vmax.f32 %v2059_v37, %v5614_v0 }
 0x11c   : > { %8201 = vst [vmem:[#allocation42_spill] sm:$0xff] %v5621_v9  ;;  %3894 = vst.msk [vmem:[%s4470_s27 + $0x274] sm:$0xff] %vm185_vm0, %v5614_v0  ;;  %v5647_v44 = vmax.f32 %v5556_v41, %v5621_v9  ;;  %v925_v11 = vsel %vm838_vm3, %v923_v55, %v924_v27  ;;  %v926_v18 = vrot.slane %v696_v53, 1  ;;  %v697_v37 = vmax.f32 %v601_v24, %v5650_v1 }
 0x11d   : > { %8202 = vst [vmem:[#allocation43_spill] sm:$0xff] %v5631_v43  ;;  %8203 = vst [vmem:[#allocation44_spill] sm:$0xff] %v5640_v32  ;;  %v1115_v3 = vmax.f32 %v694_v48, %v925_v11  ;;  %v2061_v8 = vmax.f32 %v5464_v10, %v5628_v40  ;;  %v1696_v60 = vrot.slane %v696_v53, 4  ;;  %v1695_v30 = vsel %vm1608_vm5, %v1693_v51, %v1694_v63  ;;  %v5680_v32 = vld [vmem:[#allocation2 + $0x228] sm:$0xff] }
 0x11e   : > { %3895 = vst.msk [vmem:[%s4470_s27 + $0x27c] sm:$0xf] %vm221_vm1, %v5621_v9  ;;  %8204 = vst [vmem:[#allocation45_spill] sm:$0xff] %v5647_v44  ;;  %v927_v20 = vsel %vm838_vm3, %v924_v27, %v926_v18  ;;  %v2062_v5 = vmax.f32 %v5489_v50, %v5637_v22  ;;  %v5661_v36 = vmax.f32 %v5529_v45, %v5602_v49  ;;  %v928_v48 = vrot.slane %v697_v37, 1  ;;  %v5692_v44 = vld [vmem:[#allocation2 + $0x238] sm:$0xf] }
 0x11f   : > { %v1116_v56 = vmax.f32 %v695_v46, %v927_v20  ;;  %v1380_v54 = vrot.slane %v1115_v3, 2  ;;  %v1697_v55 = vsel %vm1608_vm5, %v1694_v63, %v1696_v60  ;;  %v1698_v10 = vrot.slane %v697_v37, 4  ;;  %v5673_v46 = vld [vmem:[#allocation2 + $0x220] sm:$0xff] }
 0x120   : > { %v5666_v24 = vmax.f32 %v5539_v47, %v5606_v6  ;;  %v602_v27 = vmax.f32 %v5458_v21, %v5619_v15  ;;  %v603_v50 = vmax.f32 %v5508_v16, %v5661_v36  ;;  %v929_v45 = vsel %vm838_vm3, %v926_v18, %v928_v48 }
 0x121   : > { %v1381_v51 = vrot.slane %v1116_v56, 2  ;;  %v1187_v11 = vmax.f32 %v697_v37, %v928_v48  ;;  %v5677_v63 = vmax.f32 %v5542_v7, %v5650_v1  ;;  %v1117_v20 = vmax.f32 %v696_v53, %v929_v45  ;;  %v5686_v37 = vld [vmem:[#allocation2 + $0x230] sm:$0xff] }
 0x122   : > { %v1699_v47 = vsel %vm1608_vm5, %v1696_v60, %v1698_v10  ;;  %v604_v21 = vmax.f32 %v5512_v35, %v5666_v24  ;;  %v698_v16 = vmax.f32 %v602_v27, %v5673_v46  ;;  %v699_v48 = vmax.f32 %v603_v50, %v5680_v32 }
 0x123   : > { %v1382_v43 = vsel %vm1295_vm4, %v1380_v54, %v1381_v51  ;;  %v1385_v18 = vrot.slane %v1187_v11, 2  ;;  %v605_v7 = vmax.f32 %v5520_v52, %v5677_v63  ;;  %v1383_v45 = vrot.slane %v1117_v20, 2 }
 0x124   : > { %v1572_v53 = vmax.f32 %v1115_v3, %v1382_v43  ;;  %v700_v60 = vmax.f32 %v604_v21, %v5686_v37  ;;  %v930_v10 = vrot.slane %v698_v16, 1  ;;  %v931_v35 = vrot.slane %v699_v48, 1 }
 0x125   : > { %v1700_v27 = vrot.slane %v698_v16, 4  ;;  %v1701_v33 = vrot.slane %v699_v48, 4  ;;  %v701_v54 = vmax.f32 %v605_v7, %v5692_v44  ;;  %v1384_v41 = vsel %vm1295_vm4, %v1381_v51, %v1383_v45 }
 0x126   : > { %v1885_v11 = vmax.f32 %v1572_v53, %v1695_v30  ;;  %v1386_v50 = vsel %vm1295_vm4, %v1383_v45, %v1385_v18  ;;  %v933_v28 = vrot.slane %v700_v60, 1  ;;  %v1573_v52 = vmax.f32 %v1116_v56, %v1384_v41 }
 0x127   : > { %v1574_v43 = vmax.f32 %v1117_v20, %v1386_v50  ;;  %v932_v3 = vsel %vm838_vm3, %v930_v10, %v931_v35  ;;  %v1702_v21 = vsel %vm1608_vm5, %v1700_v27, %v1701_v33  ;;  %v935_v56 = vrot.slane %v701_v54, 1  ;;  %v5728_v50 = vld [vmem:[#allocation2 + $0x240] sm:$0xff] }
 0x128   : > { %3896 = vst.msk [vmem:[%s4470_s27 + $0x27c] sm:$0xf0] %vm1922_vm6, %v1885_v11  ;;  %v5702_v31 = vmax.f32 %v5612_v29, %v1885_v11  ;;  %v5704_v7 = vmax.f32 %v2061_v8, %v1885_v11  ;;  %v934_v30 = vsel %vm838_vm3, %v931_v35, %v933_v28  ;;  %v1118_v51 = vmax.f32 %v698_v16, %v932_v3 }
 0x129   : > { %v1886_v18 = vmax.f32 %v1573_v52, %v1697_v55  ;;  %v5707_v53 = vmax.f32 %v1574_v43, %v1699_v47  ;;  %v1119_v41 = vmax.f32 %v699_v48, %v934_v30  ;;  %v1703_v10 = vrot.slane %v700_v60, 4  ;;  %v5733_v43 = vld [vmem:[#allocation2 + $0x248] sm:$0xff] }
 0x12a   : > { %8205 = vst [vmem:[#allocation46_spill] sm:$0xff] %v5704_v7  ;;  %v1387_v20 = vrot.slane %v1118_v51, 2  ;;  %v2064_v45 = vmax.f32 %v5551_v17, %v5702_v31  ;;  %v1705_v27 = vrot.slane %v701_v54, 4  ;;  %v936_v16 = vsel %vm838_vm3, %v933_v28, %v935_v56 }
 0x12b   : > { %8206 = vst [vmem:[#allocation47_spill] sm:$0xff] %v5707_v53  ;;  %3897 = vst.msk [vmem:[%s4470_s27 + $0x284] sm:$0xff] %vm185_vm0, %v1886_v18  ;;  %v5714_v29 = vmax.f32 %v5614_v0, %v1886_v18  ;;  %v5716_v8 = vmax.f32 %v2062_v5, %v1886_v18  ;;  %v5723_v55 = vmax.f32 %v5621_v9, %v5707_v53  ;;  %v1388_v47 = vrot.slane %v1119_v41, 2 }
 0x12c   : > { %3898 = vst.msk [vmem:[%s4470_s27 + $0x28c] sm:$0xf] %vm221_vm1, %v5707_v53  ;;  %v1704_v17 = vsel %vm1608_vm5, %v1701_v33, %v1703_v10  ;;  %v1188_v48 = vmax.f32 %v701_v54, %v935_v56  ;;  %v1706_v35 = vsel %vm1608_vm5, %v1703_v10, %v1705_v27  ;;  %v1120_v5 = vmax.f32 %v700_v60, %v936_v16  ;;  %v5781_v27 = vld [vmem:[#allocation2 + $0x250] sm:$0xff] }
 0x12d   : > { %8207 = vst [vmem:[#allocation48_spill] sm:$0xff] %v5716_v8  ;;  %8208 = vst [vmem:[#allocation49_spill] sm:$0xff] %v5723_v55  ;;  %v1389_v0 = vsel %vm1295_vm4, %v1387_v20, %v1388_v47  ;;  %v2065_v52 = vmax.f32 %v5560_v14, %v5714_v29  ;;  %v5737_v3 = vmax.f32 %v5593_v13, %v5673_v46 }
 0x12e   : > { %v1575_v28 = vmax.f32 %v1118_v51, %v1389_v0  ;;  %v1392_v33 = vrot.slane %v1188_v48, 2  ;;  %v5741_v54 = vmax.f32 %v5602_v49, %v5680_v32  ;;  %v5745_v30 = vmax.f32 %v5606_v6, %v5686_v37  ;;  %v5785_v0 = vld [vmem:[#allocation2 + $0x258] sm:$0xf] }
 0x12f   : > { %v1390_v60 = vrot.slane %v1120_v5, 2  ;;  %v606_v14 = vmax.f32 %v5535_v61, %v5737_v3  ;;  %v5751_v56 = vmax.f32 %v5650_v1, %v5692_v44  ;;  %v5755_v13 = vmax.f32 %v5673_v46, %v5728_v50 }
 0x130   : > { %v5757_v51 = vmax.f32 %v1575_v28, %v1702_v21  ;;  %v607_v49 = vmax.f32 %v5581_v58, %v5741_v54  ;;  %v608_v6 = vmax.f32 %v5587_v19, %v5745_v30  ;;  %v5765_v20 = vmax.f32 %v5680_v32, %v5733_v43 }
 0x131   : > { %v1391_v61 = vsel %vm1295_vm4, %v1388_v47, %v1390_v60  ;;  %v1393_v1 = vsel %vm1295_vm4, %v1390_v60, %v1392_v33  ;;  %v702_v10 = vmax.f32 %v606_v14, %v5728_v50  ;;  %v609_v46 = vmax.f32 %v5599_v25, %v5751_v56 }
 0x132   : > { %3899 = vst.msk [vmem:[%s4470_s27 + $0x28c] sm:$0xf0] %vm1922_vm6, %v5757_v51  ;;  %v5776_v58 = vmax.f32 %v1885_v11, %v5757_v51  ;;  %v5779_v19 = vmax.f32 %v2064_v45, %v5757_v51  ;;  %v1576_v32 = vmax.f32 %v1119_v41, %v1391_v61  ;;  %v1577_v21 = vmax.f32 %v1120_v5, %v1393_v1 }
 0x133   : > { %v703_v47 = vmax.f32 %v607_v49, %v5733_v43  ;;  %v704_v16 = vmax.f32 %v608_v6, %v5781_v27  ;;  %v937_v25 = vrot.slane %v702_v10, 1  ;;  %v1707_v48 = vrot.slane %v702_v10, 4 }
 0x134   : > { %8209 = vst [vmem:[#allocation50_spill] sm:$0xff] %v5779_v19  ;;  %v5787_v28 = vmax.f32 %v1576_v32, %v1704_v17  ;;  %v5789_v11 = vmax.f32 %v1577_v21, %v1706_v35  ;;  %v2067_v41 = vmax.f32 %v5628_v40, %v5776_v58  ;;  %v705_v45 = vmax.f32 %v609_v46, %v5785_v0 }
 0x135   : > { %v938_v5 = vrot.slane %v703_v47, 1  ;;  %v940_v33 = vrot.slane %v704_v16, 1  ;;  %v1708_v60 = vrot.slane %v703_v47, 4  ;;  %v1710_v14 = vrot.slane %v704_v16, 4 }
 0x136   : > { %8210 = vst [vmem:[#allocation51_spill] sm:$0xff] %v5789_v11  ;;  %3900 = vst.msk [vmem:[%s4470_s27 + $0x294] sm:$0xff] %vm185_vm0, %v5787_v28  ;;  %v5798_v49 = vmax.f32 %v1886_v18, %v5787_v28  ;;  %v5801_v17 = vmax.f32 %v2065_v52, %v5787_v28  ;;  %v5808_v40 = vmax.f32 %v5707_v53, %v5789_v11  ;;  %v942_v35 = vrot.slane %v705_v45, 1 }
 0x137   : > { %3901 = vst.msk [vmem:[%s4470_s27 + $0x29c] sm:$0xf] %vm221_vm1, %v5789_v11  ;;  %v939_v6 = vsel %vm838_vm3, %v937_v25, %v938_v5  ;;  %v941_v61 = vsel %vm838_vm3, %v938_v5, %v940_v33  ;;  %v1709_v1 = vsel %vm1608_vm5, %v1707_v48, %v1708_v60  ;;  %v1711_v18 = vsel %vm1608_vm5, %v1708_v60, %v1710_v14 }
 0x138   : > { %8211 = vst [vmem:[#allocation52_spill] sm:$0xff] %v5801_v17  ;;  %8212 = vst [vmem:[#allocation53_spill] sm:$0xff] %v5808_v40  ;;  %v1121_v46 = vmax.f32 %v702_v10, %v939_v6  ;;  %v1122_v32 = vmax.f32 %v703_v47, %v941_v61  ;;  %v943_v52 = vsel %vm838_vm3, %v940_v33, %v942_v35  ;;  %v1712_v8 = vrot.slane %v705_v45, 4 }
 0x139   : > { %v2068_v21 = vmax.f32 %v5637_v22, %v5798_v49  ;;  %v1123_v17 = vmax.f32 %v704_v16, %v943_v52  ;;  %v1189_v19 = vmax.f32 %v705_v45, %v942_v35  ;;  %v5819_v7 = vmax.f32 %v5686_v37, %v5781_v27  ;;  %v5826_v22 = vld [vmem:[#allocation2 + $0x260] sm:$0xff]  ;;  %v5828_v16 = vld [vmem:[#allocation2 + $0x268] sm:$0xff]  ;;  %v5833_v35 = vld [vmem:[#allocation2 + $0x270] sm:$0xff] }
 0x13a   : > { %v1394_v25 = vrot.slane %v1121_v46, 2  ;;  %v1395_v5 = vrot.slane %v1122_v32, 2  ;;  %v610_v48 = vmax.f32 %v5619_v15, %v5755_v13  ;;  %v611_v10 = vmax.f32 %v5661_v36, %v5765_v20 }
 0x13b   : > { %v1397_v47 = vrot.slane %v1123_v17, 2  ;;  %v1399_v33 = vrot.slane %v1189_v19, 2  ;;  %v1713_v60 = vsel %vm1608_vm5, %v1710_v14, %v1712_v8  ;;  %v612_v37 = vmax.f32 %v5666_v24, %v5819_v7 }
 0x13c   : > { %v1396_v45 = vsel %vm1295_vm4, %v1394_v25, %v1395_v5  ;;  %v706_v15 = vmax.f32 %v610_v48, %v5826_v22  ;;  %v707_v6 = vmax.f32 %v611_v10, %v5828_v16  ;;  %v5839_v36 = vmax.f32 %v5692_v44, %v5785_v0 }
 0x13d   : > { %v1578_v8 = vmax.f32 %v1121_v46, %v1396_v45  ;;  %v1398_v19 = vsel %vm1295_vm4, %v1395_v5, %v1397_v47  ;;  %v1400_v14 = vsel %vm1295_vm4, %v1397_v47, %v1399_v33  ;;  %v708_v24 = vmax.f32 %v612_v37, %v5833_v35 }
 0x13e   : > { %v1579_v61 = vmax.f32 %v1122_v32, %v1398_v19  ;;  %v1580_v52 = vmax.f32 %v1123_v17, %v1400_v14  ;;  %v944_v25 = vrot.slane %v706_v15, 1  ;;  %v945_v40 = vrot.slane %v707_v6, 1 }
 0x13f   : > { %v1891_v48 = vmax.f32 %v1578_v8, %v1709_v1  ;;  %v947_v10 = vrot.slane %v708_v24, 1  ;;  %v1714_v53 = vrot.slane %v706_v15, 4  ;;  %v1715_v9 = vrot.slane %v707_v6, 4 }
 0x140   : > { %v5844_v44 = vmax.f32 %v1579_v61, %v1711_v18  ;;  %v5846_v46 = vmax.f32 %v1580_v52, %v1713_v60  ;;  %v946_v5 = vsel %vm838_vm3, %v944_v25, %v945_v40  ;;  %v613_v47 = vmax.f32 %v5677_v63, %v5839_v36  ;;  %v5898_v25 = vld [vmem:[#allocation2 + $0x280] sm:$0xff] }
 0x141   : > { %3902 = vst.msk [vmem:[%s4470_s27 + $0x29c] sm:$0xf0] %vm1922_vm6, %v1891_v48  ;;  %v5854_v17 = vmax.f32 %v5757_v51, %v1891_v48  ;;  %v5856_v32 = vmax.f32 %v2067_v41, %v1891_v48  ;;  %v948_v1 = vsel %vm838_vm3, %v945_v40, %v947_v10  ;;  %v1124_v33 = vmax.f32 %v706_v15, %v946_v5  ;;  %v5876_v41 = vld [vmem:[#allocation2 + $0x278] sm:$0xf] }
 0x142   : > { %8213 = vst [vmem:[#allocation54_spill] sm:$0xff] %v5846_v46  ;;  %3903 = vst.msk [vmem:[%s4470_s27 + $0x2a4] sm:$0xff] %vm185_vm0, %v5844_v44  ;;  %v5864_v18 = vmax.f32 %v5787_v28, %v5844_v44  ;;  %v5867_v60 = vmax.f32 %v2068_v21, %v5844_v44  ;;  %v5874_v63 = vmax.f32 %v5789_v11, %v5846_v46  ;;  %v1717_v15 = vrot.slane %v708_v24, 4 }
 0x143   : > { %8214 = vst [vmem:[#allocation55_spill] sm:$0xff] %v5856_v32  ;;  %3904 = vst.msk [vmem:[%s4470_s27 + $0x2ac] sm:$0xf] %vm221_vm1, %v5846_v46  ;;  %v1125_v51 = vmax.f32 %v707_v6, %v948_v1  ;;  %v1401_v40 = vrot.slane %v1124_v33, 2  ;;  %v1716_v37 = vsel %vm1608_vm5, %v1714_v53, %v1715_v9  ;;  %v2070_v28 = vmax.f32 %v5702_v31, %v5854_v17  ;;  %v5915_v32 = vld [vmem:[#allocation2 + $0x288] sm:$0xff] }
 0x144   : > { %8215 = vst [vmem:[#allocation56_spill] sm:$0xff] %v5867_v60  ;;  %8216 = vst [vmem:[#allocation57_spill] sm:$0xff] %v5874_v63  ;;  %v709_v45 = vmax.f32 %v613_v47, %v5876_v41  ;;  %v2071_v8 = vmax.f32 %v5714_v29, %v5864_v18  ;;  %v5886_v19 = vmax.f32 %v5728_v50, %v5826_v22 }
 0x145   : > { %v1402_v21 = vrot.slane %v1125_v51, 2  ;;  %v5890_v61 = vmax.f32 %v5733_v43, %v5828_v16  ;;  %v5894_v31 = vmax.f32 %v5781_v27, %v5833_v35  ;;  %v1718_v52 = vsel %vm1608_vm5, %v1715_v9, %v1717_v15 }
 0x146   : > { %v949_v6 = vrot.slane %v709_v45, 1  ;;  %v1719_v14 = vrot.slane %v709_v45, 4  ;;  %v614_v29 = vmax.f32 %v5737_v3, %v5886_v19  ;;  %v5904_v50 = vmax.f32 %v5785_v0, %v5876_v41 }
 0x147   : > { %v1403_v53 = vsel %vm1295_vm4, %v1401_v40, %v1402_v21  ;;  %v615_v9 = vmax.f32 %v5741_v54, %v5890_v61  ;;  %v616_v40 = vmax.f32 %v5745_v30, %v5894_v31 }
 0x148   : > { %v1581_v5 = vmax.f32 %v1124_v33, %v1403_v53  ;;  %v950_v43 = vsel %vm838_vm3, %v947_v10, %v949_v6  ;;  %v1190_v47 = vmax.f32 %v709_v45, %v949_v6  ;;  %v1720_v27 = vsel %vm1608_vm5, %v1717_v15, %v1719_v14  ;;  %v4042_v45 = vld [vmem:[#allocation2 + $0x290] sm:$0xff]  ;;  %v4043_v14 = vld [vmem:[#allocation2 + $0x298] sm:$0xf] }
 0x149   : > { %v1126_v1 = vmax.f32 %v708_v24, %v950_v43  ;;  %v710_v3 = vmax.f32 %v614_v29, %v5898_v25  ;;  %v617_v10 = vmax.f32 %v5751_v56, %v5904_v50  ;;  %v5921_v33 = vmax.f32 %v5826_v22, %v5898_v25 }
 0x14a   : > { %v5913_v60 = vmax.f32 %v1581_v5, %v1716_v37  ;;  %v1406_v0 = vrot.slane %v1190_v47, 2  ;;  %v711_v54 = vmax.f32 %v615_v9, %v5915_v32  ;;  %v712_v15 = vmax.f32 %v616_v40, %v4042_v45 }
 0x14b   : > { %v1404_v24 = vrot.slane %v1126_v1, 2  ;;  %v951_v30 = vrot.slane %v710_v3, 1  ;;  %v1721_v56 = vrot.slane %v710_v3, 4  ;;  %v713_v53 = vmax.f32 %v617_v10, %v4043_v14 }
 0x14c   : > { %3905 = vst.msk [vmem:[%s4470_s27 + $0x2ac] sm:$0xf0] %vm1922_vm6, %v5913_v60  ;;  %v5928_v37 = vmax.f32 %v1891_v48, %v5913_v60  ;;  %v5931_v6 = vmax.f32 %v2070_v28, %v5913_v60  ;;  %v952_v5 = vrot.slane %v711_v54, 1  ;;  %v954_v43 = vrot.slane %v712_v15, 1 }
 0x14d   : > { %v1405_v22 = vsel %vm1295_vm4, %v1402_v21, %v1404_v24  ;;  %v1407_v29 = vsel %vm1295_vm4, %v1404_v24, %v1406_v0  ;;  %v1722_v40 = vrot.slane %v711_v54, 4  ;;  %v956_v63 = vrot.slane %v713_v53, 1 }
 0x14e   : > { %8217 = vst [vmem:[#allocation58_spill] sm:$0xff] %v5931_v6  ;;  %v1582_v47 = vmax.f32 %v1125_v51, %v1405_v22  ;;  %v1583_v9 = vmax.f32 %v1126_v1, %v1407_v29  ;;  %v2073_v48 = vmax.f32 %v5776_v58, %v5928_v37  ;;  %v953_v28 = vsel %vm838_vm3, %v951_v30, %v952_v5 }
 0x14f   : > { %v955_v6 = vsel %vm838_vm3, %v952_v5, %v954_v43  ;;  %v1724_v10 = vrot.slane %v712_v15, 4  ;;  %v1127_v0 = vmax.f32 %v710_v3, %v953_v28  ;;  %v1723_v51 = vsel %vm1608_vm5, %v1721_v56, %v1722_v40  ;;  %v5960_v5 = vld [vmem:[#allocation2 + $0x2a0] sm:$0xff]  ;;  %v5983_v28 = vld [vmem:[#allocation2 + $0x2a8] sm:$0xff] }
 0x150   : > { %v1895_v11 = vmax.f32 %v1582_v47, %v1718_v52  ;;  %v5939_v21 = vmax.f32 %v1583_v9, %v1720_v27  ;;  %v1128_v24 = vmax.f32 %v711_v54, %v955_v6  ;;  %v957_v1 = vsel %vm838_vm3, %v954_v43, %v956_v63 }
 0x151   : > { %v1725_v22 = vsel %vm1608_vm5, %v1722_v40, %v1724_v10  ;;  %v1191_v29 = vmax.f32 %v713_v53, %v956_v63  ;;  %v1408_v27 = vrot.slane %v1127_v0, 2  ;;  %v1129_v54 = vmax.f32 %v712_v15, %v957_v1  ;;  %v4044_v1 = vld [vmem:[#allocation2 + $0x2b0] sm:$0xff] }
 0x152   : > { %8218 = vst [vmem:[#allocation59_spill] sm:$0xff] %v5939_v21  ;;  %3906 = vst.msk [vmem:[%s4470_s27 + $0x2b4] sm:$0xff] %vm185_vm0, %v1895_v11  ;;  %v5947_v58 = vmax.f32 %v5844_v44, %v1895_v11  ;;  %v5949_v30 = vmax.f32 %v2071_v8, %v1895_v11  ;;  %v5956_v52 = vmax.f32 %v5846_v46, %v5939_v21  ;;  %v1409_v3 = vrot.slane %v1128_v24, 2 }
 0x153   : > { %3907 = vst.msk [vmem:[%s4470_s27 + $0x2bc] sm:$0xf] %vm221_vm1, %v5939_v21  ;;  %v1413_v6 = vrot.slane %v1191_v29, 2  ;;  %v1726_v56 = vrot.slane %v713_v53, 4  ;;  %v5964_v44 = vmax.f32 %v5828_v16, %v5915_v32  ;;  %v5967_v8 = vmax.f32 %v5833_v35, %v4042_v45 }
 0x154   : > { %8219 = vst [vmem:[#allocation60_spill] sm:$0xff] %v5949_v30  ;;  %8220 = vst [vmem:[#allocation61_spill] sm:$0xff] %v5956_v52  ;;  %v2074_v63 = vmax.f32 %v5798_v49, %v5947_v58  ;;  %v618_v43 = vmax.f32 %v5755_v13, %v5921_v33  ;;  %v1410_v47 = vsel %vm1295_vm4, %v1408_v27, %v1409_v3  ;;  %v1411_v15 = vrot.slane %v1129_v54, 2 }
 0x155   : > { %v1727_v53 = vsel %vm1608_vm5, %v1724_v10, %v1726_v56  ;;  %v5974_v9 = vmax.f32 %v5876_v41, %v4043_v14  ;;  %v1584_v49 = vmax.f32 %v1127_v0, %v1410_v47  ;;  %v619_v40 = vmax.f32 %v5765_v20, %v5964_v44 }
 0x156   : > { %v620_v16 = vmax.f32 %v5819_v7, %v5967_v8  ;;  %v714_v35 = vmax.f32 %v618_v43, %v5960_v5  ;;  %v1412_v13 = vsel %vm1295_vm4, %v1409_v3, %v1411_v15  ;;  %v1414_v45 = vsel %vm1295_vm4, %v1411_v15, %v1413_v6  ;;  %v4045_v6 = vld [vmem:[#allocation2 + $0x2b8] sm:$0xf] }
 0x157   : > { %v621_v41 = vmax.f32 %v5839_v36, %v5974_v9  ;;  %v5989_v14 = vmax.f32 %v5898_v25, %v5960_v5  ;;  %v5991_v20 = vmax.f32 %v1584_v49, %v1723_v51  ;;  %v1585_v10 = vmax.f32 %v1128_v24, %v1412_v13 }
 0x158   : > { %v1586_v7 = vmax.f32 %v1129_v54, %v1414_v45  ;;  %v715_v0 = vmax.f32 %v619_v40, %v5983_v28  ;;  %v716_v29 = vmax.f32 %v620_v16, %v4044_v1  ;;  %v958_v27 = vrot.slane %v714_v35, 1 }
 0x159   : > { %v1728_v3 = vrot.slane %v714_v35, 4  ;;  %v717_v56 = vmax.f32 %v621_v41, %v4045_v6  ;;  %3908 = vst.msk [vmem:[%s4470_s27 + $0x2bc] sm:$0xf0] %vm1922_vm6, %v5991_v20  ;;  %v5999_v36 = vmax.f32 %v5913_v60, %v5991_v20  ;;  %v6002_v25 = vmax.f32 %v2073_v48, %v5991_v20 }
 0x15a   : > { %v1898_v24 = vmax.f32 %v1585_v10, %v1725_v22  ;;  %v6004_v51 = vmax.f32 %v1586_v7, %v1727_v53  ;;  %v959_v54 = vrot.slane %v715_v0, 1  ;;  %v961_v43 = vrot.slane %v716_v29, 1 }
 0x15b   : > { %8221 = vst [vmem:[#allocation62_spill] sm:$0xff] %v6002_v25  ;;  %v1729_v47 = vrot.slane %v715_v0, 4  ;;  %v963_v15 = vrot.slane %v717_v56, 1  ;;  %v2076_v48 = vmax.f32 %v5854_v17, %v5999_v36  ;;  %v1731_v41 = vrot.slane %v716_v29, 4 }
 0x15c   : > { %8222 = vst [vmem:[#allocation63_spill] sm:$0xff] %v6004_v51  ;;  %3909 = vst.msk [vmem:[%s4470_s27 + $0x2c4] sm:$0xff] %vm185_vm0, %v1898_v24  ;;  %v6008_v49 = vmax.f32 %v1895_v11, %v1898_v24  ;;  %v6010_v40 = vmax.f32 %v2074_v63, %v1898_v24  ;;  %v6017_v60 = vmax.f32 %v5939_v21, %v6004_v51  ;;  %v1733_v1 = vrot.slane %v717_v56, 4 }
 0x15d   : > { %3910 = vst.msk [vmem:[%s4470_s27 + $0x2cc] sm:$0xf] %vm221_vm1, %v6004_v51  ;;  %v960_v22 = vsel %vm838_vm3, %v958_v27, %v959_v54  ;;  %v962_v53 = vsel %vm838_vm3, %v959_v54, %v961_v43  ;;  %v1730_v16 = vsel %vm1608_vm5, %v1728_v3, %v1729_v47  ;;  %v964_v11 = vsel %vm838_vm3, %v961_v43, %v963_v15  ;;  %v8225_v43 = vld [vmem:[#allocation25_spill] sm:$0xff] }
 0x15e   : > { %8223 = vst [vmem:[#allocation64_spill] sm:$0xff] %v6010_v40  ;;  %8224 = vst [vmem:[#allocation65_spill] sm:$0xff] %v6017_v60  ;;  %v1130_v63 = vmax.f32 %v714_v35, %v960_v22  ;;  %v1131_v13 = vmax.f32 %v715_v0, %v962_v53  ;;  %v1132_v45 = vmax.f32 %v716_v29, %v964_v11  ;;  %v8226_v22 = vld [vmem:[#allocation12_spill] sm:$0xff] }
 0x15f   : > { %v2077_v10 = vmax.f32 %v5864_v18, %v6008_v49  ;;  %v1192_v7 = vmax.f32 %v717_v56, %v963_v15  ;;  %v6029_v17 = vmax.f32 %v5915_v32, %v5983_v28  ;;  %v1732_v3 = vsel %vm1608_vm5, %v1729_v47, %v1731_v41  ;;  %v422_v32 = vld [vmem:[#allocation2 + $0x2c0] sm:$0xff] }
 0x160   : > { %v1415_v27 = vrot.slane %v1130_v63, 2  ;;  %v1416_v6 = vrot.slane %v1131_v13, 2  ;;  %v1418_v54 = vrot.slane %v1132_v45, 2  ;;  %v1734_v35 = vsel %vm1608_vm5, %v1731_v41, %v1733_v1 }
 0x161   : > { %v1420_v40 = vrot.slane %v1192_v7, 2  ;;  %v622_v0 = vmax.f32 %v5886_v19, %v5989_v14  ;;  %v623_v18 = vmax.f32 %v5890_v61, %v6029_v17  ;;  %v624_v15 = vmax.f32 %v5894_v31, %v8225_v43  ;;  %v423_v7 = vld [vmem:[#allocation2 + $0x2c8] sm:$0xff] }
 0x162   : > { %v1417_v29 = vsel %vm1295_vm4, %v1415_v27, %v1416_v6  ;;  %v1419_v56 = vsel %vm1295_vm4, %v1416_v6, %v1418_v54  ;;  %v625_v47 = vmax.f32 %v5904_v50, %v8226_v22  ;;  %v4046_v27 = vld [vmem:[#allocation2 + $0x2d0] sm:$0xff]  ;;  %v4047_v6 = vld [vmem:[#allocation2 + $0x2d8] sm:$0xf] }
 0x163   : > { %v1587_v53 = vmax.f32 %v1130_v63, %v1417_v29  ;;  %v1588_v11 = vmax.f32 %v1131_v13, %v1419_v56  ;;  %v1421_v41 = vsel %vm1295_vm4, %v1418_v54, %v1420_v40  ;;  %v718_v19 = vmax.f32 %v622_v0, %v422_v32 }
 0x164   : > { %v1589_v1 = vmax.f32 %v1132_v45, %v1421_v41  ;;  %v719_v61 = vmax.f32 %v623_v18, %v423_v7  ;;  %v720_v25 = vmax.f32 %v624_v15, %v4046_v27  ;;  %v721_v30 = vmax.f32 %v625_v47, %v4047_v6 }
 0x165   : > { %v6044_v21 = vmax.f32 %v1587_v53, %v1730_v16  ;;  %v6046_v31 = vmax.f32 %v1588_v11, %v1732_v3  ;;  %v965_v50 = vrot.slane %v718_v19, 1  ;;  %v1735_v63 = vrot.slane %v718_v19, 4  ;;  %v426_v53 = vld [vmem:[#allocation2 + $0x2e0] sm:$0xff]  ;;  %v427_v11 = vld [vmem:[#allocation2 + $0x2e8] sm:$0xff] }
 0x166   : > { %v6048_v13 = vmax.f32 %v1589_v1, %v1734_v35  ;;  %v966_v40 = vrot.slane %v719_v61, 1  ;;  %v968_v54 = vrot.slane %v720_v25, 1  ;;  %v1736_v29 = vrot.slane %v719_v61, 4 }
 0x167   : > { %3911 = vst.msk [vmem:[%s4470_s27 + $0x2cc] sm:$0xf0] %vm1922_vm6, %v6044_v21  ;;  %v6055_v45 = vmax.f32 %v5991_v20, %v6044_v21  ;;  %v6058_v0 = vmax.f32 %v2076_v48, %v6044_v21  ;;  %v6064_v16 = vmax.f32 %v1898_v24, %v6046_v31  ;;  %v6067_v3 = vmax.f32 %v2077_v10, %v6046_v31 }
 0x168   : > { %8227 = vst [vmem:[#allocation25_spill] sm:$0xff] %v6048_v13  ;;  %3912 = vst.msk [vmem:[%s4470_s27 + $0x2d4] sm:$0xff] %vm185_vm0, %v6046_v31  ;;  %v6074_v35 = vmax.f32 %v6004_v51, %v6048_v13  ;;  %v967_v20 = vsel %vm838_vm3, %v965_v50, %v966_v40  ;;  %v969_v48 = vsel %vm838_vm3, %v966_v40, %v968_v54  ;;  %v970_v10 = vrot.slane %v721_v30, 1 }
 0x169   : > { %8228 = vst [vmem:[#allocation12_spill] sm:$0xff] %v6055_v45  ;;  %8229 = vst [vmem:[#allocation66_spill] sm:$0xff] %v6058_v0  ;;  %v1737_v18 = vsel %vm1608_vm5, %v1735_v63, %v1736_v29  ;;  %v1133_v56 = vmax.f32 %v718_v19, %v967_v20  ;;  %v1134_v43 = vmax.f32 %v719_v61, %v969_v48  ;;  %v1738_v15 = vrot.slane %v720_v25, 4  ;;  %v430_v19 = vld [vmem:[#allocation2 + $0x300] sm:$0xff]  ;;  %v431_v61 = vld [vmem:[#allocation2 + $0x308] sm:$0xff] }
 0x16a   : > { %8230 = vst [vmem:[#allocation67_spill] sm:$0xff] %v6067_v3  ;;  %3913 = vst.msk [vmem:[%s4470_s27 + $0x2dc] sm:$0xf] %vm221_vm1, %v6048_v13  ;;  %v2079_v24 = vmax.f32 %v5928_v37, %v6055_v45  ;;  %v2080_v22 = vmax.f32 %v5947_v58, %v6064_v16  ;;  %v1740_v47 = vrot.slane %v721_v30, 4  ;;  %v530_v41 = vmax.f32 %v5960_v5, %v422_v32  ;;  %v434_v63 = vld [vmem:[#allocation2 + $0x320] sm:$0xff]  ;;  %v435_v48 = vld [vmem:[#allocation2 + $0x328] sm:$0xff] }
 0x16b   : > { %8231 = vst [vmem:[#allocation68_spill] sm:$0xff] %v6074_v35  ;;  %v1422_v1 = vrot.slane %v1133_v56, 2  ;;  %v1423_v27 = vrot.slane %v1134_v43, 2  ;;  %v971_v6 = vsel %vm838_vm3, %v968_v54, %v970_v10  ;;  %v1193_v50 = vmax.f32 %v721_v30, %v970_v10  ;;  %v438_v58 = vld [vmem:[#allocation2 + $0x340] sm:$0xff]  ;;  %v439_v3 = vld [vmem:[#allocation2 + $0x348] sm:$0xff] }
 0x16c   : > { %v1135_v40 = vmax.f32 %v720_v25, %v971_v6  ;;  %v1739_v37 = vsel %vm1608_vm5, %v1736_v29, %v1738_v15  ;;  %v1741_v20 = vsel %vm1608_vm5, %v1738_v15, %v1740_v47  ;;  %v531_v0 = vmax.f32 %v5983_v28, %v423_v7 }
 0x16d   : > { %v1424_v5 = vsel %vm1295_vm4, %v1422_v1, %v1423_v27  ;;  %v1427_v35 = vrot.slane %v1193_v50, 2  ;;  %v534_v51 = vmax.f32 %v422_v32, %v426_v53  ;;  %v535_v60 = vmax.f32 %v423_v7, %v427_v11 }
 0x16e   : > { %v1590_v54 = vmax.f32 %v1133_v56, %v1424_v5  ;;  %v1425_v30 = vrot.slane %v1135_v40, 2  ;;  %v538_v10 = vmax.f32 %v426_v53, %v430_v19  ;;  %v539_v52 = vmax.f32 %v427_v11, %v431_v61  ;;  %v8232_v56 = vld [vmem:[#allocation26_spill] sm:$0xff] }
 0x16f   : > { %v542_v25 = vmax.f32 %v430_v19, %v434_v63  ;;  %v543_v6 = vmax.f32 %v431_v61, %v435_v48  ;;  %v546_v29 = vmax.f32 %v434_v63, %v438_v58  ;;  %v547_v46 = vmax.f32 %v435_v48, %v439_v3 }
 0x170   : > { %v6089_v15 = vmax.f32 %v1590_v54, %v1737_v18  ;;  %v1426_v47 = vsel %vm1295_vm4, %v1423_v27, %v1425_v30  ;;  %v1428_v28 = vsel %vm1295_vm4, %v1425_v30, %v1427_v35  ;;  %v626_v1 = vmax.f32 %v5921_v33, %v530_v41 }
 0x171   : > { %v1591_v50 = vmax.f32 %v1134_v43, %v1426_v47  ;;  %v1592_v32 = vmax.f32 %v1135_v40, %v1428_v28  ;;  %v627_v7 = vmax.f32 %v5964_v44, %v531_v0  ;;  %v628_v5 = vmax.f32 %v5967_v8, %v8232_v56 }
 0x172   : > { %3914 = vst.msk [vmem:[%s4470_s27 + $0x2dc] sm:$0xf0] %vm1922_vm6, %v6089_v15  ;;  %v6102_v18 = vmax.f32 %v6044_v21, %v6089_v15  ;;  %v6105_v35 = vmax.f32 %v2079_v24, %v6089_v15  ;;  %v630_v33 = vmax.f32 %v5989_v14, %v534_v51  ;;  %v631_v43 = vmax.f32 %v6029_v17, %v535_v60 }
 0x173   : > { %v6109_v27 = vmax.f32 %v1591_v50, %v1739_v37  ;;  %v6111_v44 = vmax.f32 %v1592_v32, %v1741_v20  ;;  %v634_v8 = vmax.f32 %v530_v41, %v538_v10  ;;  %v635_v40 = vmax.f32 %v531_v0, %v539_v52  ;;  %v4048_v0 = vld [vmem:[#allocation2 + $0x2f0] sm:$0xff]  ;;  %v8239_v50 = vld [vmem:[#allocation28_spill] sm:$0xff] }
 0x174   : > { %8233 = vst [vmem:[#allocation26_spill] sm:$0xff] %v6102_v18  ;;  %8234 = vst [vmem:[#allocation69_spill] sm:$0xff] %v6105_v35  ;;  %v638_v54 = vmax.f32 %v534_v51, %v542_v25  ;;  %v639_v30 = vmax.f32 %v535_v60, %v543_v6  ;;  %v642_v47 = vmax.f32 %v538_v10, %v546_v29  ;;  %v442_v51 = vld [vmem:[#allocation2 + $0x360] sm:$0xff]  ;;  %v443_v60 = vld [vmem:[#allocation2 + $0x368] sm:$0xff]  ;;  %v7996_v32 = vrot.slane %v8239_v50, 1 }
 0x175   : > { %v643_v28 = vmax.f32 %v539_v52, %v547_v46  ;;  %3915 = vst.msk [vmem:[%s4470_s27 + $0x2e4] sm:$0xff] %vm185_vm0, %v6109_v27  ;;  %v6118_v21 = vmax.f32 %v6046_v31, %v6109_v27  ;;  %v6121_v14 = vmax.f32 %v2080_v22, %v6109_v27  ;;  %v6128_v17 = vmax.f32 %v6048_v13, %v6111_v44 }
 0x176   : > { %3916 = vst.msk [vmem:[%s4470_s27 + $0x2ec] sm:$0xf] %vm221_vm1, %v6111_v44  ;;  %v6130_v46 = vmax.f32 %v626_v1, %v426_v53  ;;  %v6132_v52 = vmax.f32 %v627_v7, %v427_v11  ;;  %v6134_v24 = vmax.f32 %v628_v5, %v4048_v0  ;;  %v6136_v31 = vmax.f32 %v630_v33, %v430_v19 }
 0x177   : > { %8235 = vst [vmem:[#allocation70_spill] sm:$0xff] %v6118_v21  ;;  %8236 = vst [vmem:[#allocation71_spill] sm:$0xff] %v6121_v14  ;;  %v6138_v22 = vmax.f32 %v631_v43, %v431_v61  ;;  %v6140_v41 = vmax.f32 %v634_v8, %v434_v63  ;;  %v6142_v37 = vmax.f32 %v635_v40, %v435_v48  ;;  %v8238_v48 = vld [vmem:[#allocation27_spill] sm:$0xff] }
 0x178   : > { %8237 = vst [vmem:[#allocation72_spill] sm:$0xff] %v6128_v17  ;;  %v6144_v20 = vmax.f32 %v638_v54, %v438_v58  ;;  %v6146_v10 = vmax.f32 %v639_v30, %v439_v3  ;;  %v6148_v25 = vmax.f32 %v642_v47, %v442_v51  ;;  %v6150_v53 = vmax.f32 %v643_v28, %v443_v60  ;;  %v8240_v54 = vld [vmem:[#allocation9_spill] sm:$0xff]  ;;  %v8241_v51 = vld [vmem:[#allocation14_spill] sm:$0xff] }
 0x179   : > { %v972_v11 = vrot.slane %v6130_v46, 1  ;;  %v973_v6 = vrot.slane %v6132_v52, 1  ;;  %v7993_v19 = vrot.slane %v6134_v24, 1  ;;  %v979_v61 = vrot.slane %v6136_v31, 1 }
 0x17a   : > { %v980_v63 = vrot.slane %v6138_v22, 1  ;;  %v7997_v29 = vrot.slane %v8238_v48, 1  ;;  %v986_v3 = vrot.slane %v6140_v41, 1  ;;  %v987_v1 = vrot.slane %v6142_v37, 1 }
 0x17b   : > { %v974_v58 = vsel %vm838_vm3, %v972_v11, %v973_v6  ;;  %v976_v7 = vsel %vm838_vm3, %v973_v6, %v7993_v19  ;;  %v993_v33 = vrot.slane %v6144_v20, 1  ;;  %v994_v40 = vrot.slane %v6146_v10, 1 }
 0x17c   : > { %v981_v56 = vsel %vm838_vm3, %v979_v61, %v980_v63  ;;  %v983_v5 = vsel %vm838_vm3, %v980_v63, %v7997_v29  ;;  %v988_v43 = vsel %vm838_vm3, %v986_v3, %v987_v1  ;;  %v990_v8 = vsel %vm838_vm3, %v987_v1, %v7996_v32 }
 0x17d   : > { %v7994_v30 = vrot.slane %v8240_v54, 1  ;;  %v1000_v47 = vrot.slane %v6148_v25, 1  ;;  %v1001_v28 = vrot.slane %v6150_v53, 1  ;;  %v7995_v60 = vrot.slane %v8241_v51, 1 }
 0x17e   : > { %v1136_v0 = vmax.f32 %v6130_v46, %v974_v58  ;;  %v995_v11 = vsel %vm838_vm3, %v993_v33, %v994_v40  ;;  %v6185_v61 = vmax.f32 %v6132_v52, %v976_v7  ;;  %v1139_v63 = vmax.f32 %v6136_v31, %v981_v56 }
 0x17f   : > { %v997_v6 = vsel %vm838_vm3, %v994_v40, %v7994_v30  ;;  %v1002_v3 = vsel %vm838_vm3, %v1000_v47, %v1001_v28  ;;  %v1004_v1 = vsel %vm838_vm3, %v1001_v28, %v7995_v60  ;;  %v6193_v19 = vmax.f32 %v6138_v22, %v983_v5 }
 0x180   : > { %v1142_v58 = vmax.f32 %v6140_v41, %v988_v43  ;;  %v6197_v33 = vmax.f32 %v6142_v37, %v990_v8  ;;  %v1145_v40 = vmax.f32 %v6144_v20, %v995_v11  ;;  %v6201_v7 = vmax.f32 %v6146_v10, %v997_v6 }
 0x181   : > { %v1148_v56 = vmax.f32 %v6148_v25, %v1002_v3  ;;  %v6205_v47 = vmax.f32 %v6150_v53, %v1004_v1  ;;  %v1429_v30 = vrot.slane %v1136_v0, 2  ;;  %v8001_v28 = vrot.slane %v6185_v61, 2 }
 0x182   : > { %v1436_v5 = vrot.slane %v1139_v63, 2  ;;  %v8006_v60 = vrot.slane %v6193_v19, 2  ;;  %v1443_v43 = vrot.slane %v1142_v58, 2  ;;  %v8013_v8 = vrot.slane %v6197_v33, 2 }
 0x183   : > { %v1450_v32 = vrot.slane %v1145_v40, 2  ;;  %v1431_v11 = vsel %vm1295_vm4, %v1429_v30, %v8001_v28  ;;  %v8012_v6 = vrot.slane %v6201_v7, 2  ;;  %v1457_v3 = vrot.slane %v1148_v56, 2 }
 0x184   : > { %v8011_v1 = vrot.slane %v6205_v47, 2  ;;  %v1438_v29 = vsel %vm1295_vm4, %v1436_v5, %v8006_v60  ;;  %v1445_v14 = vsel %vm1295_vm4, %v1443_v43, %v8013_v8  ;;  %v1593_v35 = vmax.f32 %v1136_v0, %v1431_v11 }
 0x185   : > { %v1742_v17 = vrot.slane %v6130_v46, 4  ;;  %v1452_v30 = vsel %vm1295_vm4, %v1450_v32, %v8012_v6  ;;  %v1596_v13 = vmax.f32 %v1139_v63, %v1438_v29  ;;  %v1599_v55 = vmax.f32 %v1142_v58, %v1445_v14 }
 0x186   : > { %v1459_v28 = vsel %vm1295_vm4, %v1457_v3, %v8011_v1  ;;  %v1602_v26 = vmax.f32 %v1145_v40, %v1452_v30  ;;  %v1743_v5 = vrot.slane %v6132_v52, 4  ;;  %v1749_v60 = vrot.slane %v6136_v31, 4  ;;  %v8246_v30 = vld [vmem:[#allocation13_spill] sm:$0xff] }
 0x187   : > { %v1605_v4 = vmax.f32 %v1148_v56, %v1459_v28  ;;  %v8010_v0 = vrot.slane %v6138_v22, 4  ;;  %v1756_v46 = vrot.slane %v6140_v41, 4  ;;  %v8009_v43 = vrot.slane %v6142_v37, 4 }
 0x188   : > { %v1763_v32 = vrot.slane %v6144_v20, 4  ;;  %v1744_v11 = vsel %vm1608_vm5, %v1742_v17, %v1743_v5  ;;  %v8008_v29 = vrot.slane %v6146_v10, 4  ;;  %v1770_v14 = vrot.slane %v6148_v25, 4 }
 0x189   : > { %v8007_v63 = vrot.slane %v6150_v53, 4  ;;  %v1751_v52 = vsel %vm1608_vm5, %v1749_v60, %v8010_v0  ;;  %v1758_v31 = vsel %vm1608_vm5, %v1756_v46, %v8009_v43  ;;  %v1906_v41 = vmax.f32 %v1593_v35, %v1744_v11  ;;  %v8249_v11 = vld [vmem:[#allocation15_spill] sm:$0xff] }
 0x18a   : > { %v2082_v20 = vmax.f32 %v5999_v36, %v6102_v18  ;;  %v1765_v17 = vsel %vm1608_vm5, %v1763_v32, %v8008_v29  ;;  %v6252_v58 = vmax.f32 %v1596_v13, %v1751_v52  ;;  %v6254_v40 = vmax.f32 %v1599_v55, %v1758_v31  ;;  %v8247_v55 = vld [vmem:[#allocation18_spill] sm:$0xff]  ;;  %v8253_v52 = vld [vmem:[#allocation17_spill] sm:$0xff] }
 0x18b   : > { %v1772_v25 = vsel %vm1608_vm5, %v1770_v14, %v8007_v63  ;;  %v1915_v60 = vmax.f32 %v1602_v26, %v1765_v17  ;;  %3917 = vst.msk [vmem:[%s4470_s27 + $0x2ec] sm:$0xf0] %vm1922_vm6, %v1906_v41  ;;  %v6259_v35 = vmax.f32 %v6089_v15, %v1906_v41  ;;  %v629_v13 = vmax.f32 %v5974_v9, %v8246_v30  ;;  %v8248_v15 = vld [vmem:[#allocation19_spill] sm:$0xff] }
 0x18c   : > { %8242 = vst [vmem:[#allocation27_spill] sm:$0xff] %v6252_v58  ;;  %8243 = vst [vmem:[#allocation28_spill] sm:$0xff] %v6254_v40  ;;  %v1918_v56 = vmax.f32 %v1605_v4, %v1772_v25  ;;  %v6261_v36 = vmax.f32 %v2082_v20, %v1906_v41  ;;  %v6264_v28 = vmax.f32 %v1906_v41, %v6252_v58  ;;  %v984_v46 = vrot.slane %v8247_v55, 1  ;;  %v4049_v41 = vld [vmem:[#allocation2 + $0x2f8] sm:$0xf] }
 0x18d   : > { %8244 = vst [vmem:[#allocation9_spill] sm:$0xff] %v6259_v35  ;;  %v2031_v3 = vmax.f32 %v6252_v58, %v6254_v40  ;;  %v2034_v26 = vmax.f32 %v6254_v40, %v1915_v60  ;;  %v991_v32 = vrot.slane %v8248_v15, 1  ;;  %v998_v14 = vrot.slane %v8249_v11, 1 }
 0x18e   : > { %8245 = vst [vmem:[#allocation14_spill] sm:$0xff] %v6264_v28  ;;  %v6279_v20 = vmax.f32 %v629_v13, %v4049_v41  ;;  %v8250_v9 = vrot.slane %v8238_v48, 1  ;;  %v8251_v30 = vrot.slane %v8239_v50, 1  ;;  %v8252_v63 = vrot.slane %v8240_v54, 1 }
 0x18f   : > { %v2091_v31 = vmax.f32 %v6259_v35, %v2031_v3  ;;  %v2094_v25 = vmax.f32 %v6264_v28, %v2034_v26  ;;  %v1005_v43 = vrot.slane %v8253_v52, 1  ;;  %v8257_v1 = vrot.slane %v6134_v24, 1 }
 0x190   : > { %v985_v17 = vsel %vm838_vm3, %v8250_v9, %v984_v46  ;;  %v992_v4 = vsel %vm838_vm3, %v8251_v30, %v991_v32  ;;  %v999_v29 = vsel %vm838_vm3, %v8252_v63, %v998_v14  ;;  %v977_v13 = vrot.slane %v6279_v20, 1 }
 0x191   : > { %v6292_v3 = vmax.f32 %v2091_v31, %v1915_v60  ;;  %v6296_v41 = vmax.f32 %v8238_v48, %v985_v17  ;;  %v6299_v9 = vmax.f32 %v8239_v50, %v992_v4  ;;  %v6301_v26 = vmax.f32 %v2094_v25, %v1918_v56 }
 0x192   : > { %v8256_v30 = vrot.slane %v8241_v51, 1  ;;  %v6307_v63 = vmax.f32 %v8240_v54, %v999_v29  ;;  %v8022_v60 = vrot.slane %v6134_v24, 4  ;;  %v978_v17 = vsel %vm838_vm3, %v8257_v1, %v977_v13 }
 0x193   : > { %8254 = vst [vmem:[#allocation13_spill] sm:$0xff] %v6292_v3  ;;  %8255 = vst [vmem:[#allocation18_spill] sm:$0xff] %v6301_v26  ;;  %v1439_v56 = vrot.slane %v6296_v41, 2  ;;  %v1446_v29 = vrot.slane %v6299_v9, 2  ;;  %v8258_v31 = vrot.slane %v6193_v19, 2  ;;  %v1752_v3 = vrot.slane %v8238_v48, 4 }
 0x194   : > { %v1006_v0 = vsel %vm838_vm3, %v8256_v30, %v1005_v43  ;;  %v6320_v30 = vmax.f32 %v6134_v24, %v978_v17  ;;  %v1453_v6 = vrot.slane %v6307_v63, 2  ;;  %v8259_v17 = vrot.slane %v6197_v33, 2 }
 0x195   : > { %v6315_v4 = vmax.f32 %v8241_v51, %v1006_v0  ;;  %v1440_v8 = vsel %vm1295_vm4, %v8258_v31, %v1439_v56  ;;  %v1746_v0 = vsel %vm1608_vm5, %v1743_v5, %v8022_v60  ;;  %v8260_v28 = vrot.slane %v6201_v7, 2 }
 0x196   : > { %v1432_v25 = vrot.slane %v6320_v30, 2  ;;  %v1447_v26 = vsel %vm1295_vm4, %v8259_v17, %v1446_v29  ;;  %v1597_v31 = vmax.f32 %v6193_v19, %v1440_v8  ;;  %v8261_v40 = vrot.slane %v6205_v47, 2 }
 0x197   : > { %v1460_v1 = vrot.slane %v6315_v4, 2  ;;  %v1454_v18 = vsel %vm1295_vm4, %v8260_v28, %v1453_v6  ;;  %v1600_v5 = vmax.f32 %v6197_v33, %v1447_v26  ;;  %v8262_v45 = vrot.slane %v6138_v22, 4 }
 0x198   : > { %v1603_v60 = vmax.f32 %v6201_v7, %v1454_v18  ;;  %v8263_v58 = vrot.slane %v6185_v61, 2  ;;  %v1759_v8 = vrot.slane %v8239_v50, 4  ;;  %v1773_v18 = vrot.slane %v8241_v51, 4 }
 0x199   : > { %v1461_v35 = vsel %vm1295_vm4, %v8261_v40, %v1460_v1  ;;  %v1753_v17 = vsel %vm1608_vm5, %v8262_v45, %v1752_v3  ;;  %v1766_v40 = vrot.slane %v8240_v54, 4  ;;  %v2083_v45 = vmax.f32 %v6008_v49, %v6118_v21 }
 0x19a   : > { %v1433_v28 = vsel %vm1295_vm4, %v8263_v58, %v1432_v25  ;;  %v1606_v19 = vmax.f32 %v6205_v47, %v1461_v35  ;;  %v6358_v7 = vmax.f32 %v1597_v31, %v1753_v17  ;;  %v8264_v22 = vrot.slane %v6142_v37, 4 }
 0x19b   : > { %v1594_v33 = vmax.f32 %v6185_v61, %v1433_v28  ;;  %v8265_v47 = vrot.slane %v6146_v10, 4  ;;  %v1194_v54 = vmax.f32 %v6279_v20, %v977_v13  ;;  %v1195_v61 = vmax.f32 %v8247_v55, %v984_v46 }
 0x19c   : > { %v1760_v58 = vsel %vm1608_vm5, %v8264_v22, %v1759_v8  ;;  %v8266_v35 = vrot.slane %v6150_v53, 4  ;;  %v1196_v37 = vmax.f32 %v8248_v15, %v991_v32  ;;  %v1197_v28 = vmax.f32 %v8249_v11, %v998_v14 }
 0x19d   : > { %v1767_v50 = vsel %vm1608_vm5, %v8265_v47, %v1766_v40  ;;  %v1907_v26 = vmax.f32 %v1594_v33, %v1746_v0  ;;  %v6373_v31 = vmax.f32 %v1600_v5, %v1760_v58  ;;  %v1198_v10 = vmax.f32 %v8253_v52, %v1005_v43  ;;  %v8284_v43 = vld [vmem:[#allocation42_spill] sm:$0xff] }
 0x19e   : > { %v1774_v51 = vsel %vm1608_vm5, %v8266_v35, %v1773_v18  ;;  %v1916_v49 = vmax.f32 %v1603_v60, %v1767_v50  ;;  %v1434_v32 = vrot.slane %v1194_v54, 2  ;;  %v1441_v5 = vrot.slane %v1195_v61, 2 }
 0x19f   : > { %8267 = vst [vmem:[#allocation19_spill] sm:$0xff] %v6373_v31  ;;  %v1919_v17 = vmax.f32 %v1606_v19, %v1774_v51  ;;  %3918 = vst.msk [vmem:[%s4470_s27 + $0x2f4] sm:$0xff] %vm185_vm0, %v1907_v26  ;;  %v6381_v13 = vmax.f32 %v6109_v27, %v1907_v26  ;;  %v6384_v53 = vmax.f32 %v1907_v26, %v6358_v7  ;;  %v1448_v14 = vrot.slane %v1196_v37, 2 }
 0x1a0   : > { %v2032_v46 = vmax.f32 %v6358_v7, %v6373_v31  ;;  %v2035_v60 = vmax.f32 %v6373_v31, %v1916_v49  ;;  %v6389_v0 = vmax.f32 %v2083_v45, %v1907_v26  ;;  %v1435_v22 = vsel %vm1295_vm4, %v1432_v25, %v1434_v32 }
 0x1a1   : > { %8268 = vst [vmem:[#allocation15_spill] sm:$0xff] %v6381_v13  ;;  %8269 = vst [vmem:[#allocation17_spill] sm:$0xff] %v6384_v53  ;;  %v1442_v58 = vsel %vm1295_vm4, %v1439_v56, %v1441_v5  ;;  %v1449_v45 = vsel %vm1295_vm4, %v1446_v29, %v1448_v14  ;;  %v1455_v47 = vrot.slane %v1197_v28, 2  ;;  %v1462_v61 = vrot.slane %v1198_v10, 2  ;;  %v8283_v29 = vld [vmem:[#allocation49_spill] sm:$0xff] }
 0x1a2   : > { %v2092_v19 = vmax.f32 %v6381_v13, %v2032_v46  ;;  %v2095_v33 = vmax.f32 %v6384_v53, %v2035_v60  ;;  %v1595_v35 = vmax.f32 %v6320_v30, %v1435_v22  ;;  %v1598_v26 = vmax.f32 %v6296_v41, %v1442_v58 }
 0x1a3   : > { %v1456_v51 = vsel %vm1295_vm4, %v1453_v6, %v1455_v47  ;;  %v1601_v37 = vmax.f32 %v6299_v9, %v1449_v45  ;;  %v1747_v25 = vrot.slane %v6279_v20, 4  ;;  %v8272_v30 = vrot.slane %v6134_v24, 4 }
 0x1a4   : > { %v6400_v50 = vmax.f32 %v2092_v19, %v1916_v49  ;;  %v6402_v54 = vmax.f32 %v2095_v33, %v1919_v17  ;;  %v1463_v49 = vsel %vm1295_vm4, %v1460_v1, %v1462_v61  ;;  %v1604_v17 = vmax.f32 %v6307_v63, %v1456_v51 }
 0x1a5   : > { %v1607_v28 = vmax.f32 %v6315_v4, %v1463_v49  ;;  %v1748_v6 = vsel %vm1608_vm5, %v8272_v30, %v1747_v25  ;;  %v1754_v41 = vrot.slane %v8247_v55, 4  ;;  %v1761_v9 = vrot.slane %v8248_v15, 4  ;;  %v8274_v25 = vld [vmem:[#allocation33_spill] sm:$0xff] }
 0x1a6   : > { %8270 = vst [vmem:[#allocation73_spill] sm:$0xff] %v6400_v50  ;;  %8271 = vst [vmem:[#allocation74_spill] sm:$0xff] %v6402_v54  ;;  %v1768_v20 = vrot.slane %v8249_v11, 4  ;;  %v1775_v10 = vrot.slane %v8253_v52, 4  ;;  %v6421_v46 = vmax.f32 %v1595_v35, %v1748_v6  ;;  %v2045_v63 = vmax.f32 %v5068_v57, %v5193_v12 }
 0x1a7   : > { %v1755_v24 = vsel %vm1608_vm5, %v1752_v3, %v1754_v41  ;;  %v1762_v4 = vsel %vm1608_vm5, %v1759_v8, %v1761_v9  ;;  %v8047_v1 = vrot.slane %v5196_v23, 1  ;;  %v8042_v55 = vrot.slane %v5196_v23, 4  ;;  %v8276_v41 = vld [vmem:[#allocation31_spill] sm:$0xff] }
 0x1a8   : > { %v1769_v15 = vsel %vm1608_vm5, %v1766_v40, %v1768_v20  ;;  %v1776_v11 = vsel %vm1608_vm5, %v1773_v18, %v1775_v10  ;;  %v6433_v52 = vmax.f32 %v1598_v26, %v1755_v24  ;;  %v6435_v60 = vmax.f32 %v1601_v37, %v1762_v4  ;;  %3919 = vst.msk [vmem:[%s4470_s27 + $0x2fc] sm:$0xf] %vm221_vm1, %v6421_v46  ;;  %v8277_v20 = vld [vmem:[#allocation35_spill] sm:$0xff]  ;;  %v8278_v4 = vld [vmem:[#allocation37_spill] sm:$0xff] }
 0x1a9   : > { %v1917_v57 = vmax.f32 %v1604_v17, %v1769_v15  ;;  %v1920_v48 = vmax.f32 %v1607_v28, %v1776_v11  ;;  %v6442_v3 = vmax.f32 %v6111_v44, %v6421_v46  ;;  %v6445_v8 = vmax.f32 %v2045_v63, %v5245_v2 }
 0x1aa   : > { %v6449_v40 = vmax.f32 %v6421_v46, %v6433_v52  ;;  %v2033_v18 = vmax.f32 %v6433_v52, %v6435_v60  ;;  %v6456_v32 = vmax.f32 %v5196_v23, %v8047_v1  ;;  %v2048_v19 = vmax.f32 %v5071_v34, %v5269_v59 }
 0x1ab   : > { %v2036_v5 = vmax.f32 %v6435_v60, %v1917_v57  ;;  %v8044_v14 = vrot.slane %v6445_v8, 1  ;;  %v8040_v2 = vrot.slane %v6445_v8, 4  ;;  %v8030_v58 = vrot.slane %v5111_v38, 2 }
 0x1ac   : > { %v2093_v33 = vmax.f32 %v6442_v3, %v2033_v18  ;;  %v8043_v22 = vrot.slane %v6456_v32, 2  ;;  %v8029_v45 = vrot.slane %v5089_v42, 4  ;;  %v6474_v35 = vmax.f32 %v2048_v19, %v5331_v62 }
 0x1ad   : > { %v2096_v47 = vmax.f32 %v6449_v40, %v2036_v5  ;;  %v6471_v61 = vmax.f32 %v6445_v8, %v8044_v14  ;;  %v2051_v34 = vmax.f32 %v5193_v12, %v5360_v39  ;;  %v2659_v37 = vmax.f32 %v5111_v38, %v8030_v58  ;;  %v8289_v14 = vld [vmem:[#allocation54_spill] sm:$0xff] }
 0x1ae   : > { %v6478_v51 = vmax.f32 %v2093_v33, %v1917_v57  ;;  %v2662_v26 = vmax.f32 %v6456_v32, %v8043_v22  ;;  %v2054_v49 = vmax.f32 %v5269_v59, %v8274_v25  ;;  %v8035_v28 = vrot.slane %v6474_v35, 1 }
 0x1af   : > { %v6488_v17 = vmax.f32 %v2096_v47, %v1920_v48  ;;  %v8041_v62 = vrot.slane %v6471_v61, 2  ;;  %v8034_v12 = vrot.slane %v6474_v35, 4  ;;  %v2879_v6 = vmax.f32 %v2659_v37, %v8029_v45 }
 0x1b0   : > { %8273 = vst [vmem:[#allocation75_spill] sm:$0xff] %v6478_v51  ;;  %v2882_v30 = vmax.f32 %v2662_v26, %v8042_v55  ;;  %v6498_v9 = vmax.f32 %v2051_v34, %v8276_v41  ;;  %v6501_v10 = vmax.f32 %v2054_v49, %v8277_v20  ;;  %v6510_v24 = vmax.f32 %v6474_v35, %v8035_v28  ;;  %v8280_v26 = vld [vmem:[#allocation39_spill] sm:$0xff]  ;;  %v8281_v49 = vld [vmem:[#allocation41_spill] sm:$0xff] }
 0x1b1   : > { %8275 = vst [vmem:[#allocation33_spill] sm:$0xff] %v6488_v17  ;;  %v8025_v59 = vrot.slane %v6488_v17, 1  ;;  %v2665_v63 = vmax.f32 %v6471_v61, %v8041_v62  ;;  %v2057_v15 = vmax.f32 %v5360_v39, %v8278_v4  ;;  %v2066_v56 = vmax.f32 %v8281_v49, %v8283_v29 }
 0x1b2   : > { %v2990_v11 = vmax.f32 %v2879_v6, %v2882_v30  ;;  %v8027_v57 = vrot.slane %v6498_v9, 1  ;;  %v8038_v48 = vrot.slane %v6498_v9, 4  ;;  %v8026_v18 = vrot.slane %v6501_v10, 1 }
 0x1b3   : > { %v6520_v5 = vmax.f32 %v6488_v17, %v8025_v59  ;;  %v2885_v19 = vmax.f32 %v2665_v63, %v8040_v2  ;;  %v8028_v33 = vrot.slane %v6510_v24, 2  ;;  %v8036_v47 = vrot.slane %v6501_v10, 4  ;;  %v8282_v63 = vld [vmem:[#allocation45_spill] sm:$0xff] }
 0x1b4   : > { %v6529_v39 = vmax.f32 %v6498_v9, %v8027_v57  ;;  %v6534_v34 = vmax.f32 %v6501_v10, %v8026_v18  ;;  %v6537_v37 = vmax.f32 %v2057_v15, %v8280_v26  ;;  %v2060_v6 = vmax.f32 %v8274_v25, %v8281_v49  ;;  %v8285_v57 = vld [vmem:[#allocation47_spill] sm:$0xff] }
 0x1b5   : > { %8279 = vst [vmem:[#allocation31_spill] sm:$0xff] %v6520_v5  ;;  %3922 = vst.msk [vmem:[%s4470_s27 + $0x10e] sm:$0x3] %vm2941_vm7, %v2885_v19  ;;  %v2993_v41 = vmax.f32 %v2882_v30, %v2885_v19  ;;  %v2668_v20 = vmax.f32 %v6510_v24, %v8028_v33  ;;  %v2063_v59 = vmax.f32 %v8278_v4, %v8282_v63  ;;  %v8286_v4 = vld [vmem:[#allocation51_spill] sm:$0xff] }
 0x1b6   : > { %v8033_v15 = vrot.slane %v6529_v39, 2  ;;  %v8031_v26 = vrot.slane %v6534_v34, 2  ;;  %v8032_v25 = vrot.slane %v6537_v37, 1  ;;  %v8050_v27 = vrot.slane %v6537_v37, 4 }
 0x1b7   : > { %v2888_v30 = vmax.f32 %v2668_v20, %v8034_v12  ;;  %v6557_v18 = vmax.f32 %v2060_v6, %v8284_v43  ;;  %v6560_v33 = vmax.f32 %v2063_v59, %v8285_v57  ;;  %v6563_v45 = vmax.f32 %v2066_v56, %v8286_v4  ;;  %v8287_v6 = vld [vmem:[#allocation53_spill] sm:$0xff] }
 0x1b8   : > { %v2671_v49 = vmax.f32 %v6529_v39, %v8033_v15  ;;  %v2674_v58 = vmax.f32 %v6534_v34, %v8031_v26  ;;  %v6574_v43 = vmax.f32 %v6537_v37, %v8032_v25  ;;  %v2069_v59 = vmax.f32 %v8282_v63, %v8287_v6 }
 0x1b9   : > { %3925 = vst.msk [vmem:[%s4470_s27 + $0x11e] sm:$0x3] %vm2941_vm7, %v2888_v30  ;;  %v2996_v56 = vmax.f32 %v2885_v19, %v2888_v30  ;;  %v8037_v57 = vrot.slane %v6557_v18, 1  ;;  %v8053_v20 = vrot.slane %v6557_v18, 4  ;;  %v8039_v4 = vrot.slane %v6560_v33, 1 }
 0x1ba   : > { %v2891_v26 = vmax.f32 %v2671_v49, %v8038_v48  ;;  %v2894_v25 = vmax.f32 %v2674_v58, %v8036_v47  ;;  %v8045_v15 = vrot.slane %v6574_v43, 2  ;;  %v8052_v63 = vrot.slane %v6560_v33, 4 }
 0x1bb   : > { %v3044_v12 = vmax.f32 %v2990_v11, %v2996_v56  ;;  %v6592_v19 = vmax.f32 %v6557_v18, %v8037_v57  ;;  %v6597_v28 = vmax.f32 %v6560_v33, %v8039_v4  ;;  %v8046_v49 = vrot.slane %v6563_v45, 1 }
 0x1bc   : > { %3928 = vst.msk [vmem:[%s4470_s27 + $0x12e] sm:$0x3] %vm2941_vm7, %v2891_v26  ;;  %v2999_v58 = vmax.f32 %v2888_v30, %v2891_v26  ;;  %3931 = vst.msk [vmem:[%s4470_s27 + $0x13e] sm:$0x3] %vm2941_vm7, %v2894_v25  ;;  %v3002_v47 = vmax.f32 %v2891_v26, %v2894_v25  ;;  %v2677_v11 = vmax.f32 %v6574_v43, %v8045_v15  ;;  %v8061_v57 = vrot.slane %v6563_v45, 4 }
 0x1bd   : > { %v6608_v48 = vmax.f32 %v3044_v12, %v2891_v26  ;;  %v8049_v4 = vrot.slane %v6592_v19, 2  ;;  %v8048_v2 = vrot.slane %v6597_v28, 2  ;;  %v6615_v30 = vmax.f32 %v6563_v45, %v8046_v49 }
 0x1be   : > { %v3047_v62 = vmax.f32 %v2993_v41, %v2999_v58  ;;  %v2897_v55 = vmax.f32 %v2677_v11, %v8050_v27  ;;  %v3050_v22 = vmax.f32 %v2996_v56, %v3002_v47  ;;  %v6620_v15 = vmax.f32 %v2069_v59, %v8289_v14 }
 0x1bf   : > { %8288 = vst [vmem:[#allocation35_spill] sm:$0xff] %v6608_v48  ;;  %v2680_v26 = vmax.f32 %v6592_v19, %v8049_v4  ;;  %v2683_v49 = vmax.f32 %v6597_v28, %v8048_v2  ;;  %v8051_v41 = vrot.slane %v6615_v30, 2 }
 0x1c0   : > { %v6630_v1 = vmax.f32 %v3047_v62, %v2894_v25  ;;  %3934 = vst.msk [vmem:[%s4470_s27 + $0x14e] sm:$0x3] %vm2941_vm7, %v2897_v55  ;;  %v3005_v14 = vmax.f32 %v2894_v25, %v2897_v55  ;;  %v6634_v59 = vmax.f32 %v3050_v22, %v2897_v55  ;;  %v8054_v56 = vrot.slane %v6620_v15, 1  ;;  %v8294_v22 = vld [vmem:[#allocation61_spill] sm:$0xff] }
 0x1c1   : > { %v2900_v11 = vmax.f32 %v2680_v26, %v8053_v20  ;;  %v2903_v12 = vmax.f32 %v2683_v49, %v8052_v63  ;;  %v2686_v2 = vmax.f32 %v6615_v30, %v8051_v41  ;;  %v8292_v63 = vld [vmem:[#allocation57_spill] sm:$0xff] }
 0x1c2   : > { %8290 = vst [vmem:[#allocation37_spill] sm:$0xff] %v6630_v1  ;;  %8291 = vst [vmem:[#allocation39_spill] sm:$0xff] %v6634_v59  ;;  %v3053_v25 = vmax.f32 %v2999_v58, %v3005_v14  ;;  %v6650_v27 = vmax.f32 %v6620_v15, %v8054_v56  ;;  %v2072_v4 = vmax.f32 %v8283_v29, %v8292_v63  ;;  %v8295_v62 = vld [vmem:[#allocation65_spill] sm:$0xff] }
 0x1c3   : > { %3937 = vst.msk [vmem:[%s4470_s27 + $0x15e] sm:$0x3] %vm2941_vm7, %v2900_v11  ;;  %v3008_v49 = vmax.f32 %v2897_v55, %v2900_v11  ;;  %3940 = vst.msk [vmem:[%s4470_s27 + $0x16e] sm:$0x3] %vm2941_vm7, %v2903_v12  ;;  %v3011_v26 = vmax.f32 %v2900_v11, %v2903_v12  ;;  %v2906_v41 = vmax.f32 %v2686_v2, %v8061_v57  ;;  %v8296_v2 = vld [vmem:[#allocation59_spill] sm:$0xff] }
 0x1c4   : > { %v6660_v20 = vmax.f32 %v3053_v25, %v2900_v11  ;;  %v8068_v58 = vrot.slane %v6650_v27, 2  ;;  %v2075_v56 = vmax.f32 %v8287_v6, %v8294_v22  ;;  %v2078_v54 = vmax.f32 %v8292_v63, %v8295_v62  ;;  %v8297_v6 = vld [vmem:[#allocation63_spill] sm:$0xff]  ;;  %v8298_v63 = vld [vmem:[#allocation25_spill] sm:$0xff] }
 0x1c5   : > { %v3056_v55 = vmax.f32 %v3002_v47, %v3008_v49  ;;  %3943 = vst.msk [vmem:[%s4470_s27 + $0x17e] sm:$0x3] %vm2941_vm7, %v2906_v41  ;;  %v6669_v59 = vmax.f32 %v2903_v12, %v2906_v41  ;;  %v3059_v1 = vmax.f32 %v3005_v14, %v3011_v26  ;;  %v6672_v57 = vmax.f32 %v2072_v4, %v8296_v2 }
 0x1c6   : > { %8293 = vst [vmem:[#allocation41_spill] sm:$0xff] %v6660_v20  ;;  %v2689_v11 = vmax.f32 %v6650_v27, %v8068_v58  ;;  %v6679_v25 = vmax.f32 %v2075_v56, %v8297_v6  ;;  %v6682_v47 = vmax.f32 %v2078_v54, %v8298_v63  ;;  %v8301_v2 = vrot.slane %v6620_v15, 4  ;;  %v8303_v54 = vld [vmem:[#allocation68_spill] sm:$0xff] }
 0x1c7   : > { %v6684_v48 = vmax.f32 %v3056_v55, %v2903_v12  ;;  %v6686_v50 = vmax.f32 %v3059_v1, %v2906_v41  ;;  %v3062_v4 = vmax.f32 %v3008_v49, %v6669_v59  ;;  %v8069_v14 = vrot.slane %v6672_v57, 1 }
 0x1c8   : > { %v2909_v29 = vmax.f32 %v2689_v11, %v8301_v2  ;;  %v8070_v58 = vrot.slane %v6679_v25, 1  ;;  %v8073_v49 = vrot.slane %v6682_v47, 1  ;;  %v2087_v63 = vmax.f32 %v8303_v54, %v6442_v3 }
 0x1c9   : > { %8299 = vst [vmem:[#allocation45_spill] sm:$0xff] %v6684_v48  ;;  %8300 = vst [vmem:[#allocation49_spill] sm:$0xff] %v6686_v50  ;;  %v6700_v1 = vmax.f32 %v6672_v57, %v8069_v14  ;;  %v2081_v14 = vmax.f32 %v8294_v22, %v8303_v54 }
 0x1ca   : > { %3946 = vst.msk [vmem:[%s4470_s27 + $0x18e] sm:$0x3] %vm2941_vm7, %v2909_v29  ;;  %v3017_v55 = vmax.f32 %v2906_v41, %v2909_v29  ;;  %v6705_v11 = vmax.f32 %v3062_v4, %v2909_v29  ;;  %v6710_v6 = vmax.f32 %v6679_v25, %v8070_v58  ;;  %v6717_v12 = vmax.f32 %v6682_v47, %v8073_v49  ;;  %v8304_v41 = vld [vmem:[#allocation72_spill] sm:$0xff] }
 0x1cb   : > { %v8074_v2 = vrot.slane %v6700_v1, 2  ;;  %v2084_v4 = vmax.f32 %v8295_v62, %v8304_v41  ;;  %v6732_v22 = vmax.f32 %v2081_v14, %v6111_v44  ;;  %v6741_v56 = vmax.f32 %v2087_v63, %v6433_v52 }
 0x1cc   : > { %8302 = vst [vmem:[#allocation42_spill] sm:$0xff] %v6705_v11  ;;  %v3065_v20 = vmax.f32 %v3011_v26, %v3017_v55  ;;  %v8075_v58 = vrot.slane %v6710_v6, 2  ;;  %v8076_v49 = vrot.slane %v6717_v12, 2  ;;  %v2090_v3 = vmax.f32 %v8304_v41, %v6449_v40 }
 0x1cd   : > { %v2692_v50 = vmax.f32 %v6700_v1, %v8074_v2  ;;  %v6735_v62 = vmax.f32 %v2084_v4, %v6421_v46  ;;  %8305 = vst [vmem:[#allocation47_spill] sm:$0xff] %v6741_v56  ;;  %v8306_v2 = vrot.slane %v6672_v57, 4  ;;  %v8077_v14 = vrot.slane %v6732_v22, 1 }
 0x1ce   : > { %v2695_v26 = vmax.f32 %v6710_v6, %v8075_v58  ;;  %v2698_v46 = vmax.f32 %v6717_v12, %v8076_v49  ;;  %v8307_v52 = vrot.slane %v6679_v25, 4  ;;  %v8083_v41 = vrot.slane %v6741_v56, 1 }
 0x1cf   : > { %v2912_v44 = vmax.f32 %v2692_v50, %v8306_v2  ;;  %v8078_v58 = vrot.slane %v6735_v62, 1  ;;  %v8309_v49 = vrot.slane %v6682_v47, 4  ;;  %v6767_v4 = vmax.f32 %v6732_v22, %v8077_v14 }
 0x1d0   : > { %v2915_v63 = vmax.f32 %v2695_v26, %v8307_v52  ;;  %v6790_v48 = vmax.f32 %v2090_v3, %v6435_v60  ;;  %v8319_v31 = vrot.slane %v6741_v56, 4 }
 0x1d1   : > { %3949 = vst.msk [vmem:[%s4470_s27 + $0x19e] sm:$0x3] %vm2941_vm7, %v2912_v44  ;;  %v3020_v50 = vmax.f32 %v2909_v29, %v2912_v44  ;;  %v6760_v2 = vmax.f32 %v3065_v20, %v2912_v44  ;;  %v2918_v54 = vmax.f32 %v2698_v46, %v8309_v49  ;;  %v6774_v52 = vmax.f32 %v6735_v62, %v8078_v58 }
 0x1d2   : > { %3952 = vst.msk [vmem:[%s4470_s27 + $0x1ae] sm:$0x3] %vm2941_vm7, %v2915_v63  ;;  %v3023_v26 = vmax.f32 %v2912_v44, %v2915_v63  ;;  %v6779_v20 = vmax.f32 %v6741_v56, %v8083_v41  ;;  %v8086_v44 = vrot.slane %v6767_v4, 2  ;;  %8312 = vst [vmem:[#allocation57_spill] sm:$0xff] %v6790_v48  ;;  %v8314_v29 = vrot.slane %v6478_v51, 1 }
 0x1d3   : > { %8308 = vst [vmem:[#allocation51_spill] sm:$0xff] %v6760_v2  ;;  %8310 = vst [vmem:[#allocation53_spill] sm:$0xff] %v6774_v52  ;;  %v3068_v46 = vmax.f32 %v6669_v59, %v3020_v50  ;;  %v3026_v14 = vmax.f32 %v2915_v63, %v2918_v54  ;;  %v8088_v58 = vrot.slane %v6774_v52, 2 }
 0x1d4   : > { %8311 = vst [vmem:[#allocation54_spill] sm:$0xff] %v6779_v20  ;;  %3955 = vst.msk [vmem:[%s4470_s27 + $0x1be] sm:$0x3] %vm2941_vm7, %v2918_v54  ;;  %v3071_v40 = vmax.f32 %v3017_v55, %v3023_v26  ;;  %v8091_v11 = vrot.slane %v6779_v20, 2  ;;  %v2701_v59 = vmax.f32 %v6767_v4, %v8086_v44  ;;  %v6800_v2 = vmax.f32 %v6478_v51, %v8314_v29 }
 0x1d5   : > { %v6792_v41 = vmax.f32 %v3068_v46, %v2915_v63  ;;  %v3074_v49 = vmax.f32 %v3020_v50, %v3026_v14  ;;  %v2704_v60 = vmax.f32 %v6774_v52, %v8088_v58  ;;  %v8093_v63 = vrot.slane %v6790_v48, 1 }
 0x1d6   : > { %8315 = vst [vmem:[#allocation65_spill] sm:$0xff] %v6800_v2  ;;  %v6802_v55 = vmax.f32 %v3071_v40, %v2918_v54  ;;  %v2707_v3 = vmax.f32 %v6779_v20, %v8091_v11  ;;  %v8317_v46 = vrot.slane %v6732_v22, 4  ;;  %v8094_v40 = vrot.slane %v6800_v2, 2 }
 0x1d7   : > { %8313 = vst [vmem:[#allocation61_spill] sm:$0xff] %v6792_v41  ;;  %v8097_v44 = vrot.slane %v6520_v5, 2  ;;  %v8318_v58 = vrot.slane %v6735_v62, 4  ;;  %v6824_v20 = vmax.f32 %v6790_v48, %v8093_v63  ;;  %v8110_v63 = vrot.slane %v6478_v51, 4 }
 0x1d8   : > { %8316 = vst [vmem:[#allocation59_spill] sm:$0xff] %v6802_v55  ;;  %v2921_v29 = vmax.f32 %v2701_v59, %v8317_v46  ;;  %v2927_v11 = vmax.f32 %v2707_v3, %v8319_v31  ;;  %v2713_v53 = vmax.f32 %v6800_v2, %v8094_v40  ;;  %v8111_v40 = vrot.slane %v6488_v17, 4  ;;  %v8324_v2 = vld [vmem:[#allocation22_spill] sm:$0xff] }
 0x1d9   : > { %v2924_v21 = vmax.f32 %v2704_v60, %v8318_v58  ;;  %8320 = vst [vmem:[#allocation63_spill] sm:$0xff] %v6824_v20  ;;  %v2716_v58 = vmax.f32 %v6520_v5, %v8097_v44  ;;  %v8105_v3 = vrot.slane %v6824_v20, 2  ;;  %v8322_v5 = vld [vmem:[#allocation16_spill] sm:$0xff]  ;;  %v8325_v56 = vrot.slane %v8324_v2, 1 }
 0x1da   : > { %3958 = vst.msk [vmem:[%s4470_s27 + $0x1ce] sm:$0x3] %vm2941_vm7, %v2921_v29  ;;  %v3029_v59 = vmax.f32 %v2918_v54, %v2921_v29  ;;  %v6828_v46 = vmax.f32 %v3074_v49, %v2921_v29  ;;  %3964 = vst.msk [vmem:[%s4470_s27 + $0x1ee] sm:$0x3] %vm2941_vm7, %v2927_v11  ;;  %v8323_v41 = vrot.slane %v8322_v5, 1  ;;  %v8327_v49 = vrot.slane %v5196_v23, 1 }
 0x1db   : > { %3961 = vst.msk [vmem:[%s4470_s27 + $0x1de] sm:$0x3] %vm2941_vm7, %v2924_v21  ;;  %v3032_v31 = vmax.f32 %v2921_v29, %v2924_v21  ;;  %v3035_v60 = vmax.f32 %v2924_v21, %v2927_v11  ;;  %v2710_v44 = vmax.f32 %v6824_v20, %v8105_v3  ;;  %v8330_v20 = vrot.slane %v6790_v48, 4 }
 0x1dc   : > { %8321 = vst [vmem:[#allocation25_spill] sm:$0xff] %v6828_v46  ;;  %v3077_v50 = vmax.f32 %v3023_v26, %v3029_v59  ;;  %v2224_v54 = vsel %vm838_vm3, %v8325_v56, %v8323_v41  ;;  %v2933_v26 = vmax.f32 %v2713_v53, %v8110_v63  ;;  %v8328_v3 = vmov %v8323_v41  ;;  %v8331_v56 = vld [vmem:[#allocation11_spill] sm:$0xff]  ;;  %v8332_v41 = vld [vmem:[#allocation10_spill] sm:$0xff] }
 0x1dd   : > { %v3080_v55 = vmax.f32 %v3026_v14, %v3032_v31  ;;  %v3083_v29 = vmax.f32 %v3029_v59, %v3035_v60  ;;  %v2936_v14 = vmax.f32 %v2716_v58, %v8111_v40  ;;  %v2226_v59 = vsel %vm838_vm3, %v8328_v3, %v8327_v49 }
 0x1de   : > { %v6853_v52 = vmax.f32 %v3077_v50, %v2924_v21  ;;  %v2930_v13 = vmax.f32 %v2710_v44, %v8330_v20  ;;  %v2227_v21 = vrot.slane %v8331_v56, 1  ;;  %v2228_v50 = vrot.slane %v8332_v41, 1 }
 0x1df   : > { %v6864_v46 = vmax.f32 %v3080_v55, %v2927_v11  ;;  %v2380_v63 = vmax.f32 %v8324_v2, %v2224_v54  ;;  %v2381_v58 = vmax.f32 %v8322_v5, %v2226_v59  ;;  %v2722_v40 = vrot.slane %v8324_v2, 4 }
 0x1e0   : > { %8326 = vst [vmem:[#allocation68_spill] sm:$0xff] %v6853_v52  ;;  %3967 = vst.msk [vmem:[%s4470_s27 + $0x1fe] sm:$0x3] %vm2941_vm7, %v2930_v13  ;;  %v3038_v55 = vmax.f32 %v2927_v11, %v2930_v13  ;;  %v3041_v3 = vmax.f32 %v2930_v13, %v2933_v26  ;;  %v6877_v49 = vmax.f32 %v3083_v29, %v2930_v13  ;;  %v8333_v44 = vrot.slane %v6445_v8, 1 }
 0x1e1   : > { %8329 = vst [vmem:[#allocation72_spill] sm:$0xff] %v6864_v46  ;;  %v2229_v20 = vsel %vm838_vm3, %v2227_v21, %v2228_v50  ;;  %v2502_v52 = vrot.slane %v2380_v63, 2  ;;  %v2503_v54 = vrot.slane %v2381_v58, 2  ;;  %v2723_v13 = vrot.slane %v8322_v5, 4 }
 0x1e2   : > { %v2231_v53 = vsel %vm838_vm3, %v2228_v50, %v8333_v44  ;;  %v3086_v48 = vmax.f32 %v3032_v31, %v3038_v55  ;;  %v3089_v59 = vmax.f32 %v3035_v60, %v3041_v3  ;;  %v2383_v17 = vmax.f32 %v8331_v56, %v2229_v20 }
 0x1e3   : > { %v2384_v46 = vmax.f32 %v8332_v41, %v2231_v53  ;;  %v2504_v11 = vsel %vm1295_vm4, %v2502_v52, %v2503_v54  ;;  %v2727_v29 = vrot.slane %v8331_v56, 4  ;;  %v2724_v60 = vsel %vm1608_vm5, %v2722_v40, %v2723_v13  ;;  %v8340_v53 = vld [vmem:[#allocation29_spill] sm:$0xff] }
 0x1e4   : > { %v6889_v21 = vmax.f32 %v3086_v48, %v2933_v26  ;;  %v6891_v51 = vmax.f32 %v3089_v59, %v2936_v14  ;;  %v2507_v50 = vrot.slane %v2383_v17, 2  ;;  %v2660_v44 = vmax.f32 %v2380_v63, %v2504_v11  ;;  %v8338_v26 = vld [vmem:[#allocation30_spill] sm:$0xff] }
 0x1e5   : > { %v2508_v31 = vrot.slane %v2384_v46, 2  ;;  %v2728_v55 = vrot.slane %v8332_v41, 4  ;;  %v8336_v52 = vrot.slane %v6456_v32, 2  ;;  %v8337_v56 = vrot.slane %v5196_v23, 4 }
 0x1e6   : > { %8334 = vst [vmem:[#allocation16_spill] sm:$0xff] %v6889_v21  ;;  %8335 = vst [vmem:[#allocation22_spill] sm:$0xff] %v6891_v51  ;;  %v6895_v3 = vmax.f32 %v2660_v44, %v2724_v60  ;;  %v8339_v14 = vrot.slane %v8338_v26, 1  ;;  %v8341_v63 = vrot.slane %v8340_v53, 1  ;;  %v8342_v59 = vrot.slane %v6471_v61, 2  ;;  %v8344_v60 = vld [vmem:[#allocation23_spill] sm:$0xff] }
 0x1e7   : > { %v2506_v5 = vsel %vm1295_vm4, %v2503_v54, %v8336_v52  ;;  %v2726_v48 = vsel %vm1608_vm5, %v2723_v13, %v8337_v56  ;;  %v2509_v40 = vsel %vm1295_vm4, %v2507_v50, %v2508_v31  ;;  %v2729_v41 = vsel %vm1608_vm5, %v2727_v29, %v2728_v55  ;;  %v8345_v50 = vld [vmem:[#allocation24_spill] sm:$0xff]  ;;  %v8346_v61 = vld [vmem:[#allocation21_spill] sm:$0xff] }
 0x1e8   : > { %v2219_v20 = vsel %vm838_vm3, %v8341_v63, %v8339_v14  ;;  %v2511_v32 = vsel %vm1295_vm4, %v2508_v31, %v8342_v59  ;;  %v2661_v11 = vmax.f32 %v2381_v58, %v2506_v5  ;;  %v2663_v54 = vmax.f32 %v2383_v17, %v2509_v40 }
 0x1e9   : > { %v2664_v23 = vmax.f32 %v2384_v46, %v2511_v32  ;;  %v8343_v13 = vrot.slane %v6445_v8, 4  ;;  %v2232_v52 = vrot.slane %v8344_v60, 1  ;;  %v2233_v14 = vrot.slane %v8345_v50, 1 }
 0x1ea   : > { %v6917_v56 = vmax.f32 %v2661_v11, %v2726_v48  ;;  %v2377_v29 = vmax.f32 %v8340_v53, %v2219_v20  ;;  %v2498_v63 = vrot.slane %v8346_v61, 2  ;;  %v6922_v31 = vmax.f32 %v2663_v54, %v2729_v41 }
 0x1eb   : > { %v2731_v44 = vsel %vm1608_vm5, %v2728_v55, %v8343_v13  ;;  %v8347_v46 = vrot.slane %v8338_v26, 4  ;;  %v8348_v8 = vrot.slane %v8340_v53, 4  ;;  %v2732_v55 = vrot.slane %v8344_v60, 4  ;;  %v8364_v53 = vld [vmem:[#allocation40_spill] sm:$0xff] }
 0x1ec   : > { %v6924_v17 = vmax.f32 %v2664_v23, %v2731_v44  ;;  %v2234_v5 = vsel %vm838_vm3, %v2232_v52, %v2233_v14  ;;  %v8349_v48 = vrot.slane %v6474_v35, 1  ;;  %v2497_v40 = vrot.slane %v2377_v29, 2  ;;  %3920 = vst.msk [vmem:[%s4470_s27 + $0xfe] sm:$0xfc] %vm2938_vm8, %v6922_v31 }
 0x1ed   : > { %v2719_v58 = vsel %vm1608_vm5, %v8348_v8, %v8347_v46  ;;  %v2733_v41 = vrot.slane %v8345_v50, 4  ;;  %v2386_v32 = vmax.f32 %v8344_v60, %v2234_v5  ;;  %v8350_v13 = vrot.slane %v5111_v38, 2  ;;  %v8355_v38 = vld [vmem:[#allocation32_spill] sm:$0xff] }
 0x1ee   : > { %v2236_v20 = vsel %vm838_vm3, %v2233_v14, %v8349_v48  ;;  %3921 = vst.msk [vmem:[%s4470_s27 + $0x106] sm:$0xff] %vm185_vm0, %v6924_v17  ;;  %v2499_v54 = vsel %vm1295_vm4, %v2497_v40, %v2498_v63  ;;  %v8351_v52 = vrot.slane %v5089_v42, 4  ;;  %v8352_v14 = vmov %v8347_v46 }
 0x1ef   : > { %v2387_v11 = vmax.f32 %v8345_v50, %v2236_v20  ;;  %v2734_v23 = vsel %vm1608_vm5, %v2732_v55, %v2733_v41  ;;  %v2501_v44 = vsel %vm1295_vm4, %v2498_v63, %v8350_v13  ;;  %v2512_v8 = vrot.slane %v2386_v32, 2  ;;  %v8354_v55 = vld [vmem:[#allocation20_spill] sm:$0xff] }
 0x1f0   : > { %v2721_v46 = vsel %vm1608_vm5, %v8352_v14, %v8351_v52  ;;  %v2657_v2 = vmax.f32 %v2377_v29, %v2499_v54  ;;  %v2658_v60 = vmax.f32 %v8346_v61, %v2501_v44  ;;  %v8353_v50 = vrot.slane %v6474_v35, 4 }
 0x1f1   : > { %v2513_v48 = vrot.slane %v2387_v11, 2  ;;  %v2237_v20 = vrot.slane %v8354_v55, 1  ;;  %v2238_v40 = vrot.slane %v8355_v38, 1  ;;  %v2737_v63 = vrot.slane %v8354_v55, 4 }
 0x1f2   : > { %v2736_v5 = vsel %vm1608_vm5, %v2733_v41, %v8353_v50  ;;  %v2877_v26 = vmax.f32 %v2657_v2, %v2719_v58  ;;  %v8356_v13 = vrot.slane %v6510_v24, 2  ;;  %v2878_v29 = vmax.f32 %v2658_v60, %v2721_v46 }
 0x1f3   : > { %v2514_v42 = vsel %vm1295_vm4, %v2512_v8, %v2513_v48  ;;  %v2239_v35 = vsel %vm838_vm3, %v2237_v20, %v2238_v40  ;;  %v8357_v41 = vrot.slane %v6498_v9, 1  ;;  %v8359_v20 = vld [vmem:[#allocation36_spill] sm:$0xff] }
 0x1f4   : > { %v2516_v52 = vsel %vm1295_vm4, %v2513_v48, %v8356_v13  ;;  %v2666_v54 = vmax.f32 %v2386_v32, %v2514_v42  ;;  %v2988_v14 = vmax.f32 %v2877_v26, %v6895_v3  ;;  %v2989_v8 = vmax.f32 %v2878_v29, %v6917_v56 }
 0x1f5   : > { %v2667_v61 = vmax.f32 %v2387_v11, %v2516_v52  ;;  %v2241_v44 = vsel %vm838_vm3, %v2238_v40, %v8357_v41  ;;  %v2389_v2 = vmax.f32 %v8354_v55, %v2239_v35  ;;  %v2738_v32 = vrot.slane %v8355_v38, 4  ;;  %v8358_v11 = vld [vmem:[#allocation34_spill] sm:$0xff] }
 0x1f6   : > { %v2390_v24 = vmax.f32 %v8355_v38, %v2241_v44  ;;  %v2886_v58 = vmax.f32 %v2666_v54, %v2734_v23  ;;  %v2242_v48 = vrot.slane %v8358_v11, 1  ;;  %v2243_v42 = vrot.slane %v8359_v20, 1 }
 0x1f7   : > { %v2887_v46 = vmax.f32 %v2667_v61, %v2736_v5  ;;  %v2517_v60 = vrot.slane %v2389_v2, 2  ;;  %v2742_v40 = vrot.slane %v8358_v11, 4  ;;  %v2739_v5 = vsel %vm1608_vm5, %v2737_v63, %v2738_v32 }
 0x1f8   : > { %v2518_v50 = vrot.slane %v2390_v24, 2  ;;  %3923 = vst.msk [vmem:[%s4470_s27 + $0x10e] sm:$0xfc] %vm2938_vm8, %v2886_v58  ;;  %v6985_v26 = vmax.f32 %v6922_v31, %v2886_v58  ;;  %v8360_v55 = vrot.slane %v6498_v9, 4  ;;  %v8361_v52 = vrot.slane %v6529_v39, 2 }
 0x1f9   : > { %3924 = vst.msk [vmem:[%s4470_s27 + $0x116] sm:$0xff] %vm185_vm0, %v2887_v46  ;;  %v6990_v23 = vmax.f32 %v6924_v17, %v2887_v46  ;;  %v2244_v54 = vsel %vm838_vm3, %v2242_v48, %v2243_v42  ;;  %v8362_v61 = vrot.slane %v6501_v10, 1 }
 0x1fa   : > { %v2741_v38 = vsel %vm1608_vm5, %v2738_v32, %v8360_v55  ;;  %v2519_v13 = vsel %vm1295_vm4, %v2517_v60, %v2518_v50  ;;  %v2521_v29 = vsel %vm1295_vm4, %v2518_v50, %v8361_v52  ;;  %v3042_v41 = vmax.f32 %v2988_v14, %v6985_v26  ;;  %v8363_v50 = vld [vmem:[#allocation38_spill] sm:$0xff] }
 0x1fb   : > { %v2246_v35 = vsel %vm838_vm3, %v2243_v42, %v8362_v61  ;;  %v3043_v63 = vmax.f32 %v2989_v8, %v6990_v23  ;;  %v2669_v9 = vmax.f32 %v2389_v2, %v2519_v13  ;;  %v2670_v44 = vmax.f32 %v2390_v24, %v2521_v29 }
 0x1fc   : > { %v2392_v32 = vmax.f32 %v8358_v11, %v2244_v54  ;;  %v2393_v39 = vmax.f32 %v8359_v20, %v2246_v35  ;;  %v2743_v60 = vrot.slane %v8359_v20, 4  ;;  %v2247_v48 = vrot.slane %v8363_v50, 1 }
 0x1fd   : > { %v2889_v55 = vmax.f32 %v2669_v9, %v2739_v5  ;;  %v2890_v52 = vmax.f32 %v2670_v44, %v2741_v38  ;;  %v2248_v42 = vrot.slane %v8364_v53, 1  ;;  %v2747_v14 = vrot.slane %v8363_v50, 4 }
 0x1fe   : > { %v2522_v61 = vrot.slane %v2392_v32, 2  ;;  %v2523_v59 = vrot.slane %v2393_v39, 2  ;;  %v2744_v8 = vsel %vm1608_vm5, %v2742_v40, %v2743_v60  ;;  %v8365_v2 = vrot.slane %v6501_v10, 4 }
 0x1ff   : > { %3926 = vst.msk [vmem:[%s4470_s27 + $0x11e] sm:$0xfc] %vm2938_vm8, %v2889_v55  ;;  %v7018_v11 = vmax.f32 %v2886_v58, %v2889_v55  ;;  %v7020_v20 = vmax.f32 %v3042_v41, %v2889_v55  ;;  %v7024_v5 = vmax.f32 %v2887_v46, %v2890_v52  ;;  %v7026_v38 = vmax.f32 %v3043_v63, %v2890_v52 }
 0x200   : > { %v2746_v24 = vsel %vm1608_vm5, %v2743_v60, %v8365_v2  ;;  %3927 = vst.msk [vmem:[%s4470_s27 + $0x126] sm:$0xff] %vm185_vm0, %v2890_v52  ;;  %v2524_v13 = vsel %vm1295_vm4, %v2522_v61, %v2523_v59  ;;  %v8366_v40 = vrot.slane %v6534_v34, 2  ;;  %v2249_v29 = vsel %vm838_vm3, %v2247_v48, %v2248_v42 }
 0x201   : > { %v8367_v54 = vrot.slane %v6537_v37, 1  ;;  %v2672_v35 = vmax.f32 %v2392_v32, %v2524_v13  ;;  %v8368_v46 = vmax.f32 %v6895_v3, %v6922_v31  ;;  %v8369_v34 = vmax.f32 %v6917_v56, %v6924_v17  ;;  %v8370_v32 = vld [vmem:[#allocation43_spill] sm:$0xff]  ;;  %v8371_v3 = vld [vmem:[#allocation44_spill] sm:$0xff] }
 0x202   : > { %v2526_v10 = vsel %vm1295_vm4, %v2523_v59, %v8366_v40  ;;  %v2395_v59 = vmax.f32 %v8363_v50, %v2249_v29  ;;  %v2748_v60 = vrot.slane %v8364_v53, 4  ;;  %v2252_v48 = vrot.slane %v8370_v32, 1 }
 0x203   : > { %v2251_v58 = vsel %vm838_vm3, %v2248_v42, %v8367_v54  ;;  %v3045_v41 = vmax.f32 %v8368_v46, %v7018_v11  ;;  %v2673_v63 = vmax.f32 %v2393_v39, %v2526_v10  ;;  %v3046_v9 = vmax.f32 %v8369_v34, %v7024_v5  ;;  %v8375_v34 = vld [vmem:[#allocation46_spill] sm:$0xff] }
 0x204   : > { %v2396_v44 = vmax.f32 %v8364_v53, %v2251_v58  ;;  %v2892_v42 = vmax.f32 %v2672_v35, %v2744_v8  ;;  %v2253_v31 = vrot.slane %v8371_v3, 1  ;;  %v2752_v39 = vrot.slane %v8370_v32, 4 }
 0x205   : > { %v2893_v61 = vmax.f32 %v2673_v63, %v2746_v24  ;;  %v2527_v2 = vrot.slane %v2395_v59, 2  ;;  %v2749_v56 = vsel %vm1608_vm5, %v2747_v14, %v2748_v60  ;;  %v8372_v17 = vrot.slane %v6537_v37, 4 }
 0x206   : > { %v2528_v13 = vrot.slane %v2396_v44, 2  ;;  %3929 = vst.msk [vmem:[%s4470_s27 + $0x12e] sm:$0xfc] %vm2938_vm8, %v2892_v42  ;;  %v7056_v40 = vmax.f32 %v2889_v55, %v2892_v42  ;;  %v7058_v53 = vmax.f32 %v3045_v41, %v2892_v42  ;;  %v8373_v14 = vrot.slane %v6574_v43, 2 }
 0x207   : > { %v2751_v50 = vsel %vm1608_vm5, %v2748_v60, %v8372_v17  ;;  %3930 = vst.msk [vmem:[%s4470_s27 + $0x136] sm:$0xff] %vm185_vm0, %v2893_v61  ;;  %v7062_v8 = vmax.f32 %v2890_v52, %v2893_v61  ;;  %v7064_v24 = vmax.f32 %v3046_v9, %v2893_v61  ;;  %v2254_v29 = vsel %vm838_vm3, %v2252_v48, %v2253_v31 }
 0x208   : > { %v2529_v10 = vsel %vm1295_vm4, %v2527_v2, %v2528_v13  ;;  %v2531_v37 = vsel %vm1295_vm4, %v2528_v13, %v8373_v14  ;;  %v8374_v54 = vrot.slane %v6557_v18, 1  ;;  %v3048_v52 = vmax.f32 %v6985_v26, %v7056_v40 }
 0x209   : > { %v2675_v58 = vmax.f32 %v2395_v59, %v2529_v10  ;;  %v2676_v35 = vmax.f32 %v2396_v44, %v2531_v37  ;;  %v3049_v46 = vmax.f32 %v6990_v23, %v7062_v8  ;;  %v2398_v43 = vmax.f32 %v8370_v32, %v2254_v29  ;;  %v8376_v59 = vld [vmem:[#allocation48_spill] sm:$0xff] }
 0x20a   : > { %v2256_v55 = vsel %vm838_vm3, %v2253_v31, %v8374_v54  ;;  %v2753_v63 = vrot.slane %v8371_v3, 4  ;;  %v2257_v9 = vrot.slane %v8375_v34, 1  ;;  %v2258_v31 = vrot.slane %v8376_v59, 1 }
 0x20b   : > { %v2399_v41 = vmax.f32 %v8371_v3, %v2256_v55  ;;  %v2895_v60 = vmax.f32 %v2675_v58, %v2749_v56  ;;  %v2896_v48 = vmax.f32 %v2676_v35, %v2751_v50  ;;  %v2757_v2 = vrot.slane %v8375_v34, 4  ;;  %v8380_v35 = vld [vmem:[#allocation50_spill] sm:$0xff] }
 0x20c   : > { %v2532_v26 = vrot.slane %v2398_v43, 2  ;;  %v2754_v13 = vsel %vm1608_vm5, %v2752_v39, %v2753_v63  ;;  %v8377_v23 = vrot.slane %v6557_v18, 4  ;;  %v8378_v39 = vrot.slane %v6592_v19, 2 }
 0x20d   : > { %v2533_v44 = vrot.slane %v2399_v41, 2  ;;  %3932 = vst.msk [vmem:[%s4470_s27 + $0x13e] sm:$0xfc] %vm2938_vm8, %v2895_v60  ;;  %v7090_v17 = vmax.f32 %v2892_v42, %v2895_v60  ;;  %v7092_v3 = vmax.f32 %v3048_v52, %v2895_v60  ;;  %v7096_v56 = vmax.f32 %v2893_v61, %v2896_v48 }
 0x20e   : > { %v2756_v32 = vsel %vm1608_vm5, %v2753_v63, %v8377_v23  ;;  %3933 = vst.msk [vmem:[%s4470_s27 + $0x146] sm:$0xff] %vm185_vm0, %v2896_v48  ;;  %v7098_v50 = vmax.f32 %v3049_v46, %v2896_v48  ;;  %v2259_v14 = vsel %vm838_vm3, %v2257_v9, %v2258_v31  ;;  %v8379_v37 = vrot.slane %v6560_v33, 1 }
 0x20f   : > { %v2534_v10 = vsel %vm1295_vm4, %v2532_v26, %v2533_v44  ;;  %v2536_v18 = vsel %vm1295_vm4, %v2533_v44, %v8378_v39  ;;  %v3051_v61 = vmax.f32 %v7018_v11, %v7090_v17  ;;  %v3052_v55 = vmax.f32 %v7024_v5, %v7096_v56 }
 0x210   : > { %v2261_v42 = vsel %vm838_vm3, %v2258_v31, %v8379_v37  ;;  %v2678_v29 = vmax.f32 %v2398_v43, %v2534_v10  ;;  %v2679_v54 = vmax.f32 %v2399_v41, %v2536_v18  ;;  %v2401_v19 = vmax.f32 %v8375_v34, %v2259_v14  ;;  %v8381_v43 = vld [vmem:[#allocation52_spill] sm:$0xff] }
 0x211   : > { %v2402_v58 = vmax.f32 %v8376_v59, %v2261_v42  ;;  %v2758_v52 = vrot.slane %v8376_v59, 4  ;;  %v2262_v46 = vrot.slane %v8380_v35, 1  ;;  %v2263_v31 = vrot.slane %v8381_v43, 1 }
 0x212   : > { %v2898_v63 = vmax.f32 %v2678_v29, %v2754_v13  ;;  %v2899_v9 = vmax.f32 %v2679_v54, %v2756_v32  ;;  %v2762_v26 = vrot.slane %v8380_v35, 4  ;;  %v2537_v11 = vrot.slane %v2401_v19, 2  ;;  %v8385_v54 = vld [vmem:[#allocation55_spill] sm:$0xff] }
 0x213   : > { %v2538_v41 = vrot.slane %v2402_v58, 2  ;;  %v2759_v44 = vsel %vm1608_vm5, %v2757_v2, %v2758_v52  ;;  %v8382_v5 = vrot.slane %v6560_v33, 4  ;;  %v8383_v2 = vrot.slane %v6597_v28, 2 }
 0x214   : > { %3935 = vst.msk [vmem:[%s4470_s27 + $0x14e] sm:$0xfc] %vm2938_vm8, %v2898_v63  ;;  %v7124_v23 = vmax.f32 %v2895_v60, %v2898_v63  ;;  %v7126_v59 = vmax.f32 %v3051_v61, %v2898_v63  ;;  %v7130_v13 = vmax.f32 %v2896_v48, %v2899_v9  ;;  %v7132_v32 = vmax.f32 %v3052_v55, %v2899_v9 }
 0x215   : > { %v2761_v34 = vsel %vm1608_vm5, %v2758_v52, %v8382_v5  ;;  %3936 = vst.msk [vmem:[%s4470_s27 + $0x156] sm:$0xff] %vm185_vm0, %v2899_v9  ;;  %v2539_v10 = vsel %vm1295_vm4, %v2537_v11, %v2538_v41  ;;  %v2541_v33 = vsel %vm1295_vm4, %v2538_v41, %v8383_v2  ;;  %v2264_v39 = vsel %vm838_vm3, %v2262_v46, %v2263_v31 }
 0x216   : > { %v8384_v18 = vrot.slane %v6563_v45, 1  ;;  %v2681_v14 = vmax.f32 %v2401_v19, %v2539_v10  ;;  %v3054_v48 = vmax.f32 %v7056_v40, %v7124_v23  ;;  %v2682_v37 = vmax.f32 %v2402_v58, %v2541_v33  ;;  %v8386_v19 = vld [vmem:[#allocation56_spill] sm:$0xff] }
 0x217   : > { %v3055_v42 = vmax.f32 %v7062_v8, %v7130_v13  ;;  %v2404_v28 = vmax.f32 %v8380_v35, %v2264_v39  ;;  %v2763_v61 = vrot.slane %v8381_v43, 4  ;;  %v2267_v55 = vrot.slane %v8385_v54, 1 }
 0x218   : > { %v2266_v60 = vsel %vm838_vm3, %v2263_v31, %v8384_v18  ;;  %v2901_v52 = vmax.f32 %v2681_v14, %v2759_v44  ;;  %v2902_v46 = vmax.f32 %v2682_v37, %v2761_v34  ;;  %v2268_v31 = vrot.slane %v8386_v19, 1  ;;  %v8390_v37 = vld [vmem:[#allocation58_spill] sm:$0xff] }
 0x219   : > { %v2405_v29 = vmax.f32 %v8381_v43, %v2266_v60  ;;  %v2767_v11 = vrot.slane %v8385_v54, 4  ;;  %v2542_v40 = vrot.slane %v2404_v28, 2  ;;  %v2764_v41 = vsel %vm1608_vm5, %v2762_v26, %v2763_v61 }
 0x21a   : > { %v8387_v8 = vrot.slane %v6563_v45, 4  ;;  %3938 = vst.msk [vmem:[%s4470_s27 + $0x15e] sm:$0xfc] %vm2938_vm8, %v2901_v52  ;;  %v7158_v5 = vmax.f32 %v2898_v63, %v2901_v52  ;;  %v7160_v43 = vmax.f32 %v3054_v48, %v2901_v52  ;;  %v7164_v44 = vmax.f32 %v2899_v9, %v2902_v46 }
 0x21b   : > { %v2543_v58 = vrot.slane %v2405_v29, 2  ;;  %3939 = vst.msk [vmem:[%s4470_s27 + $0x166] sm:$0xff] %vm185_vm0, %v2902_v46  ;;  %v7166_v34 = vmax.f32 %v3055_v42, %v2902_v46  ;;  %v8388_v26 = vrot.slane %v6615_v30, 2  ;;  %v2269_v2 = vsel %vm838_vm3, %v2267_v55, %v2268_v31 }
 0x21c   : > { %v2766_v35 = vsel %vm1608_vm5, %v2763_v61, %v8387_v8  ;;  %v8389_v33 = vrot.slane %v6620_v15, 1  ;;  %v3057_v9 = vmax.f32 %v7090_v17, %v7158_v5  ;;  %v3058_v60 = vmax.f32 %v7096_v56, %v7164_v44 }
 0x21d   : > { %v2544_v10 = vsel %vm1295_vm4, %v2542_v40, %v2543_v58  ;;  %v2546_v45 = vsel %vm1295_vm4, %v2543_v58, %v8388_v26  ;;  %v2407_v30 = vmax.f32 %v8385_v54, %v2269_v2  ;;  %v2768_v48 = vrot.slane %v8386_v19, 4 }
 0x21e   : > { %v2271_v63 = vsel %vm838_vm3, %v2268_v31, %v8389_v33  ;;  %v2684_v39 = vmax.f32 %v2404_v28, %v2544_v10  ;;  %v2685_v18 = vmax.f32 %v2405_v29, %v2546_v45  ;;  %v2272_v42 = vrot.slane %v8390_v37, 1  ;;  %v8391_v28 = vld [vmem:[#allocation60_spill] sm:$0xff] }
 0x21f   : > { %v2408_v14 = vmax.f32 %v8386_v19, %v2271_v63  ;;  %v2273_v31 = vrot.slane %v8391_v28, 1  ;;  %v2772_v40 = vrot.slane %v8390_v37, 4  ;;  %v2547_v17 = vrot.slane %v2407_v30, 2 }
 0x220   : > { %v2904_v61 = vmax.f32 %v2684_v39, %v2764_v41  ;;  %v2905_v55 = vmax.f32 %v2685_v18, %v2766_v35  ;;  %v2769_v58 = vsel %vm1608_vm5, %v2767_v11, %v2768_v48  ;;  %v8392_v56 = vrot.slane %v6620_v15, 4  ;;  %v8395_v18 = vld [vmem:[#allocation62_spill] sm:$0xff] }
 0x221   : > { %v2548_v29 = vrot.slane %v2408_v14, 2  ;;  %v8393_v11 = vrot.slane %v6650_v27, 2  ;;  %v2274_v26 = vsel %vm838_vm3, %v2272_v42, %v2273_v31  ;;  %v8394_v45 = vrot.slane %v6672_v57, 1 }
 0x222   : > { %v2771_v54 = vsel %vm1608_vm5, %v2768_v48, %v8392_v56  ;;  %3941 = vst.msk [vmem:[%s4470_s27 + $0x16e] sm:$0xfc] %vm2938_vm8, %v2904_v61  ;;  %v7192_v8 = vmax.f32 %v2901_v52, %v2904_v61  ;;  %v7194_v19 = vmax.f32 %v3057_v9, %v2904_v61  ;;  %v7198_v41 = vmax.f32 %v2902_v46, %v2905_v55 }
 0x223   : > { %3942 = vst.msk [vmem:[%s4470_s27 + $0x176] sm:$0xff] %vm185_vm0, %v2905_v55  ;;  %v7200_v35 = vmax.f32 %v3058_v60, %v2905_v55  ;;  %v2549_v10 = vsel %vm1295_vm4, %v2547_v17, %v2548_v29  ;;  %v2551_v15 = vsel %vm1295_vm4, %v2548_v29, %v8393_v11  ;;  %v2276_v52 = vsel %vm838_vm3, %v2273_v31, %v8394_v45 }
 0x224   : > { %v2687_v2 = vmax.f32 %v2407_v30, %v2549_v10  ;;  %v3060_v46 = vmax.f32 %v7124_v23, %v7192_v8  ;;  %v2688_v33 = vmax.f32 %v2408_v14, %v2551_v15  ;;  %v3061_v63 = vmax.f32 %v7130_v13, %v7198_v41  ;;  %v8396_v30 = vld [vmem:[#allocation64_spill] sm:$0xff] }
 0x225   : > { %v2410_v27 = vmax.f32 %v8390_v37, %v2274_v26  ;;  %v2411_v39 = vmax.f32 %v8391_v28, %v2276_v52  ;;  %v2773_v9 = vrot.slane %v8391_v28, 4  ;;  %v2277_v60 = vrot.slane %v8395_v18, 1 }
 0x226   : > { %v2907_v48 = vmax.f32 %v2687_v2, %v2769_v58  ;;  %v2908_v42 = vmax.f32 %v2688_v33, %v2771_v54  ;;  %v2278_v31 = vrot.slane %v8396_v30, 1  ;;  %v2777_v17 = vrot.slane %v8395_v18, 4  ;;  %v8400_v33 = vld [vmem:[#allocation66_spill] sm:$0xff] }
 0x227   : > { %v2552_v23 = vrot.slane %v2410_v27, 2  ;;  %v2553_v14 = vrot.slane %v2411_v39, 2  ;;  %v2774_v29 = vsel %vm1608_vm5, %v2772_v40, %v2773_v9  ;;  %v8397_v13 = vrot.slane %v6672_v57, 4 }
 0x228   : > { %3944 = vst.msk [vmem:[%s4470_s27 + $0x17e] sm:$0xfc] %vm2938_vm8, %v2907_v48  ;;  %v7226_v56 = vmax.f32 %v2904_v61, %v2907_v48  ;;  %v7228_v28 = vmax.f32 %v3060_v46, %v2907_v48  ;;  %v7232_v58 = vmax.f32 %v2905_v55, %v2908_v42  ;;  %v7234_v54 = vmax.f32 %v3061_v63, %v2908_v42 }
 0x229   : > { %v2776_v37 = vsel %vm1608_vm5, %v2773_v9, %v8397_v13  ;;  %3945 = vst.msk [vmem:[%s4470_s27 + $0x186] sm:$0xff] %vm185_vm0, %v2908_v42  ;;  %v2554_v10 = vsel %vm1295_vm4, %v2552_v23, %v2553_v14  ;;  %v8398_v40 = vrot.slane %v6700_v1, 2  ;;  %v2279_v11 = vsel %vm838_vm3, %v2277_v60, %v2278_v31 }
 0x22a   : > { %v8399_v15 = vrot.slane %v6679_v25, 1  ;;  %v2690_v26 = vmax.f32 %v2410_v27, %v2554_v10  ;;  %v3063_v55 = vmax.f32 %v7158_v5, %v7226_v56  ;;  %v3064_v52 = vmax.f32 %v7164_v44, %v7232_v58  ;;  %v8401_v27 = vld [vmem:[#allocation67_spill] sm:$0xff] }
 0x22b   : > { %v2556_v57 = vsel %vm1295_vm4, %v2553_v14, %v8398_v40  ;;  %v2413_v1 = vmax.f32 %v8395_v18, %v2279_v11  ;;  %v2778_v46 = vrot.slane %v8396_v30, 4  ;;  %v2282_v63 = vrot.slane %v8400_v33, 1 }
 0x22c   : > { %v2281_v61 = vsel %vm838_vm3, %v2278_v31, %v8399_v15  ;;  %v2691_v45 = vmax.f32 %v2411_v39, %v2556_v57  ;;  %v2910_v9 = vmax.f32 %v2690_v26, %v2774_v29  ;;  %v2283_v31 = vrot.slane %v8401_v27, 1 }
 0x22d   : > { %v2414_v2 = vmax.f32 %v8396_v30, %v2281_v61  ;;  %v2782_v23 = vrot.slane %v8400_v33, 4  ;;  %v2557_v5 = vrot.slane %v2413_v1, 2  ;;  %v2779_v14 = vsel %vm1608_vm5, %v2777_v17, %v2778_v46 }
 0x22e   : > { %v2911_v60 = vmax.f32 %v2691_v45, %v2776_v37  ;;  %v8402_v44 = vrot.slane %v6679_v25, 4  ;;  %3947 = vst.msk [vmem:[%s4470_s27 + $0x18e] sm:$0xfc] %vm2938_vm8, %v2910_v9  ;;  %v7260_v13 = vmax.f32 %v2907_v48, %v2910_v9  ;;  %v7262_v30 = vmax.f32 %v3063_v55, %v2910_v9  ;;  %v8405_v45 = vld [vmem:[#allocation69_spill] sm:$0xff] }
 0x22f   : > { %v2558_v39 = vrot.slane %v2414_v2, 2  ;;  %v8403_v17 = vrot.slane %v6710_v6, 2  ;;  %v2284_v40 = vsel %vm838_vm3, %v2282_v63, %v2283_v31  ;;  %v8404_v57 = vrot.slane %v6682_v47, 1 }
 0x230   : > { %v2781_v18 = vsel %vm1608_vm5, %v2778_v46, %v8402_v44  ;;  %3948 = vst.msk [vmem:[%s4470_s27 + $0x196] sm:$0xff] %vm185_vm0, %v2911_v60  ;;  %v7266_v29 = vmax.f32 %v2908_v42, %v2911_v60  ;;  %v7268_v37 = vmax.f32 %v3064_v52, %v2911_v60  ;;  %v3066_v42 = vmax.f32 %v7192_v8, %v7260_v13 }
 0x231   : > { %v2559_v10 = vsel %vm1295_vm4, %v2557_v5, %v2558_v39  ;;  %v2561_v25 = vsel %vm1295_vm4, %v2558_v39, %v8403_v17  ;;  %v2286_v48 = vsel %vm838_vm3, %v2283_v31, %v8404_v57  ;;  %v2416_v6 = vmax.f32 %v8400_v33, %v2284_v40 }
 0x232   : > { %v2693_v11 = vmax.f32 %v2413_v1, %v2559_v10  ;;  %v2694_v15 = vmax.f32 %v2414_v2, %v2561_v25  ;;  %v3067_v61 = vmax.f32 %v7198_v41, %v7266_v29  ;;  %v2417_v26 = vmax.f32 %v8401_v27, %v2286_v48  ;;  %v8406_v1 = vld [vmem:[#allocation71_spill] sm:$0xff] }
 0x233   : > { %v2783_v55 = vrot.slane %v8401_v27, 4  ;;  %v2287_v52 = vrot.slane %v8405_v45, 1  ;;  %v2288_v31 = vrot.slane %v8406_v1, 1  ;;  %v2787_v5 = vrot.slane %v8405_v45, 4 }
 0x234   : > { %v2913_v46 = vmax.f32 %v2693_v11, %v2779_v14  ;;  %v2914_v63 = vmax.f32 %v2694_v15, %v2781_v18  ;;  %v2562_v8 = vrot.slane %v2416_v6, 2  ;;  %v2563_v2 = vrot.slane %v2417_v26, 2 }
 0x235   : > { %v2784_v39 = vsel %vm1608_vm5, %v2782_v23, %v2783_v55  ;;  %v8407_v41 = vrot.slane %v6682_v47, 4  ;;  %v8408_v23 = vrot.slane %v6717_v12, 2  ;;  %v2289_v17 = vsel %vm838_vm3, %v2287_v52, %v2288_v31 }
 0x236   : > { %3950 = vst.msk [vmem:[%s4470_s27 + $0x19e] sm:$0xfc] %vm2938_vm8, %v2913_v46  ;;  %v7294_v44 = vmax.f32 %v2910_v9, %v2913_v46  ;;  %v7296_v27 = vmax.f32 %v3066_v42, %v2913_v46  ;;  %v7300_v14 = vmax.f32 %v2911_v60, %v2914_v63  ;;  %v7302_v18 = vmax.f32 %v3067_v61, %v2914_v63 }
 0x237   : > { %v2786_v33 = vsel %vm1608_vm5, %v2783_v55, %v8407_v41  ;;  %3951 = vst.msk [vmem:[%s4470_s27 + $0x1a6] sm:$0xff] %vm185_vm0, %v2914_v63  ;;  %v2564_v10 = vsel %vm1295_vm4, %v2562_v8, %v2563_v2  ;;  %v2566_v47 = vsel %vm1295_vm4, %v2563_v2, %v8408_v23  ;;  %v8409_v25 = vrot.slane %v6732_v22, 1 }
 0x238   : > { %v2696_v40 = vmax.f32 %v2416_v6, %v2564_v10  ;;  %v3069_v60 = vmax.f32 %v7226_v56, %v7294_v44  ;;  %v2697_v57 = vmax.f32 %v2417_v26, %v2566_v47  ;;  %v3070_v48 = vmax.f32 %v7232_v58, %v7300_v14 }
 0x239   : > { %v2291_v9 = vsel %vm838_vm3, %v2288_v31, %v8409_v25  ;;  %v2419_v12 = vmax.f32 %v8405_v45, %v2289_v17  ;;  %v2788_v42 = vrot.slane %v8406_v1, 4  ;;  %v2292_v15 = vrot.slane %v6261_v36, 1 }
 0x23a   : > { %v2420_v11 = vmax.f32 %v8406_v1, %v2291_v9  ;;  %v2916_v61 = vmax.f32 %v2696_v40, %v2784_v39  ;;  %v2917_v55 = vmax.f32 %v2697_v57, %v2786_v33  ;;  %v2293_v6 = vrot.slane %v6389_v0, 1  ;;  %v8413_v40 = vld [vmem:[#allocation27_spill] sm:$0xff]  ;;  %v8415_v57 = vld [vmem:[#allocation9_spill] sm:$0xff] }
 0x23b   : > { %v2792_v52 = vrot.slane %v6261_v36, 4  ;;  %v2567_v56 = vrot.slane %v2419_v12, 2  ;;  %v2789_v31 = vsel %vm1608_vm5, %v2787_v5, %v2788_v42  ;;  %v8410_v58 = vrot.slane %v6732_v22, 4 }
 0x23c   : > { %v2568_v26 = vrot.slane %v2420_v11, 2  ;;  %3953 = vst.msk [vmem:[%s4470_s27 + $0x1ae] sm:$0xfc] %vm2938_vm8, %v2916_v61  ;;  %v7328_v8 = vmax.f32 %v2913_v46, %v2916_v61  ;;  %v7330_v1 = vmax.f32 %v3069_v60, %v2916_v61  ;;  %v7334_v2 = vmax.f32 %v2914_v63, %v2917_v55  ;;  %v8414_v60 = vld [vmem:[#allocation12_spill] sm:$0xff] }
 0x23d   : > { %v2791_v45 = vsel %vm1608_vm5, %v2788_v42, %v8410_v58  ;;  %3954 = vst.msk [vmem:[%s4470_s27 + $0x1b6] sm:$0xff] %vm185_vm0, %v2917_v55  ;;  %v7336_v39 = vmax.f32 %v3070_v48, %v2917_v55  ;;  %v8411_v5 = vrot.slane %v6767_v4, 2  ;;  %v2294_v33 = vsel %vm838_vm3, %v2292_v15, %v2293_v6 }
 0x23e   : > { %v2569_v41 = vsel %vm1295_vm4, %v2567_v56, %v2568_v26  ;;  %v8412_v10 = vrot.slane %v6735_v62, 1  ;;  %v3072_v63 = vmax.f32 %v7260_v13, %v7328_v8  ;;  %v3073_v17 = vmax.f32 %v7266_v29, %v7334_v2  ;;  %v8417_v13 = vld [vmem:[#allocation15_spill] sm:$0xff]  ;;  %v8419_v29 = vld [vmem:[#allocation28_spill] sm:$0xff]  ;;  %v8420_v56 = vld [vmem:[#allocation26_spill] sm:$0xff] }
 0x23f   : > { %v2571_v22 = vsel %vm1295_vm4, %v2568_v26, %v8411_v5  ;;  %v2699_v23 = vmax.f32 %v2419_v12, %v2569_v41  ;;  %v2422_v4 = vmax.f32 %v6261_v36, %v2294_v33  ;;  %v2793_v9 = vrot.slane %v6389_v0, 4  ;;  %v8421_v26 = vld [vmem:[#allocation14_spill] sm:$0xff] }
 0x240   : > { %v2296_v46 = vsel %vm838_vm3, %v2293_v6, %v8412_v10  ;;  %v2700_v47 = vmax.f32 %v2420_v11, %v2571_v22  ;;  %v8416_v48 = vmax.f32 %v8414_v60, %v8415_v57  ;;  %v8418_v11 = vmax.f32 %v6064_v16, %v8417_v13 }
 0x241   : > { %v2423_v25 = vmax.f32 %v6389_v0, %v2296_v46  ;;  %v2919_v42 = vmax.f32 %v2699_v23, %v2789_v31  ;;  %v8422_v36 = vmax.f32 %v8420_v56, %v8421_v26  ;;  %v2572_v41 = vrot.slane %v2422_v4, 2  ;;  %v8424_v46 = vld [vmem:[#allocation53_spill] sm:$0xff] }
 0x242   : > { %v2145_v12 = vmax.f32 %v8416_v48, %v8413_v40  ;;  %v2920_v15 = vmax.f32 %v2700_v47, %v2791_v45  ;;  %v2146_v6 = vmax.f32 %v8418_v11, %v6358_v7  ;;  %v2794_v5 = vsel %vm1608_vm5, %v2792_v52, %v2793_v9  ;;  %v8426_v40 = vld [vmem:[#allocation47_spill] sm:$0xff] }
 0x243   : > { %v7365_v58 = vmax.f32 %v8422_v36, %v8419_v29  ;;  %v2573_v0 = vrot.slane %v2423_v25, 2  ;;  %v8423_v22 = vrot.slane %v6735_v62, 4  ;;  %3956 = vst.msk [vmem:[%s4470_s27 + $0x1be] sm:$0xfc] %vm2938_vm8, %v2919_v42  ;;  %v7373_v45 = vmax.f32 %v2916_v61, %v2919_v42  ;;  %v8430_v36 = vld [vmem:[#allocation70_spill] sm:$0xff] }
 0x244   : > { %v7375_v16 = vmax.f32 %v3072_v63, %v2919_v42  ;;  %3957 = vst.msk [vmem:[%s4470_s27 + $0x1c6] sm:$0xff] %vm185_vm0, %v2920_v15  ;;  %v7379_v7 = vmax.f32 %v2917_v55, %v2920_v15  ;;  %v7381_v33 = vmax.f32 %v3073_v17, %v2920_v15  ;;  %v8425_v52 = vrot.slane %v8424_v46, 2 }
 0x245   : > { %v2796_v31 = vsel %vm1608_vm5, %v2793_v9, %v8423_v22  ;;  %v2574_v10 = vsel %vm1295_vm4, %v2572_v41, %v2573_v0  ;;  %v2297_v23 = vrot.slane %v2145_v12, 1  ;;  %v2298_v47 = vrot.slane %v2146_v6, 1  ;;  %v8431_v41 = vld [vmem:[#allocation17_spill] sm:$0xff] }
 0x246   : > { %v2576_v62 = vsel %vm1295_vm4, %v2573_v0, %v8425_v52  ;;  %v2702_v9 = vmax.f32 %v2422_v4, %v2574_v10  ;;  %v3075_v61 = vmax.f32 %v7294_v44, %v7373_v45  ;;  %v3076_v55 = vmax.f32 %v7300_v14, %v7379_v7  ;;  %v8429_v14 = vld [vmem:[#allocation19_spill] sm:$0xff] }
 0x247   : > { %v2703_v63 = vmax.f32 %v2423_v25, %v2576_v62  ;;  %v2299_v17 = vsel %vm838_vm3, %v2297_v23, %v2298_v47  ;;  %v8427_v60 = vrot.slane %v8426_v40, 1  ;;  %v2797_v48 = vrot.slane %v2145_v12, 4  ;;  %v8433_v23 = vld [vmem:[#allocation73_spill] sm:$0xff] }
 0x248   : > { %v2798_v13 = vrot.slane %v2146_v6, 4  ;;  %v2922_v11 = vmax.f32 %v2702_v9, %v2794_v5  ;;  %v2425_v4 = vmax.f32 %v2145_v12, %v2299_v17  ;;  %v8428_v44 = vrot.slane %v8426_v40, 4  ;;  %v8435_v9 = vld [vmem:[#allocation13_spill] sm:$0xff]  ;;  %v8437_v40 = vld [vmem:[#allocation75_spill] sm:$0xff] }
 0x249   : > { %v2301_v57 = vsel %vm838_vm3, %v2298_v47, %v8427_v60  ;;  %v2923_v29 = vmax.f32 %v2703_v63, %v2796_v31  ;;  %v8432_v0 = vmax.f32 %v8430_v36, %v8431_v41  ;;  %v2302_v10 = vrot.slane %v7365_v58, 1 }
 0x24a   : > { %v2426_v56 = vmax.f32 %v2146_v6, %v2301_v57  ;;  %v2799_v26 = vsel %vm1608_vm5, %v2797_v48, %v2798_v13  ;;  %v2801_v25 = vsel %vm1608_vm5, %v2798_v13, %v8428_v44  ;;  %3959 = vst.msk [vmem:[%s4470_s27 + $0x1ce] sm:$0xfc] %vm2938_vm8, %v2922_v11  ;;  %v7406_v46 = vmax.f32 %v2919_v42, %v2922_v11  ;;  %v8440_v13 = vld [vmem:[#allocation54_spill] sm:$0xff] }
 0x24b   : > { %v2149_v22 = vmax.f32 %v8432_v0, %v8429_v14  ;;  %v7408_v5 = vmax.f32 %v3075_v61, %v2922_v11  ;;  %3960 = vst.msk [vmem:[%s4470_s27 + $0x1d6] sm:$0xff] %vm185_vm0, %v2923_v29  ;;  %v7412_v12 = vmax.f32 %v2920_v15, %v2923_v29  ;;  %v7414_v6 = vmax.f32 %v3076_v55, %v2923_v29 }
 0x24c   : > { %v2577_v31 = vrot.slane %v2425_v4, 2  ;;  %v2578_v52 = vrot.slane %v2426_v56, 2  ;;  %v8434_v47 = vrot.slane %v8433_v23, 1  ;;  %v8436_v63 = vrot.slane %v8435_v9, 1 }
 0x24d   : > { %v2303_v62 = vrot.slane %v2149_v22, 1  ;;  %v3078_v42 = vmax.f32 %v7328_v8, %v7406_v46  ;;  %v3079_v61 = vmax.f32 %v7334_v2, %v7412_v12  ;;  %v8438_v15 = vrot.slane %v8437_v40, 1  ;;  %v8442_v8 = vld [vmem:[#allocation57_spill] sm:$0xff] }
 0x24e   : > { %v2309_v17 = vsel %vm838_vm3, %v8436_v63, %v8434_v47  ;;  %v8439_v55 = vmov %v8434_v47  ;;  %v2579_v48 = vsel %vm1295_vm4, %v2577_v31, %v2578_v52  ;;  %v8441_v44 = vrot.slane %v8440_v13, 2 }
 0x24f   : > { %v2311_v60 = vsel %vm838_vm3, %v8439_v55, %v8438_v15  ;;  %v2431_v57 = vmax.f32 %v8435_v9, %v2309_v17  ;;  %v2304_v36 = vsel %vm838_vm3, %v2302_v10, %v2303_v62  ;;  %v8443_v41 = vrot.slane %v8442_v8, 1 }
 0x250   : > { %v2581_v14 = vsel %vm1295_vm4, %v2578_v52, %v8441_v44  ;;  %v2705_v0 = vmax.f32 %v2425_v4, %v2579_v48  ;;  %v2428_v63 = vmax.f32 %v7365_v58, %v2304_v36  ;;  %v2432_v17 = vmax.f32 %v8433_v23, %v2311_v60  ;;  %v8444_v36 = vld [vmem:[#allocation63_spill] sm:$0xff] }
 0x251   : > { %v2306_v2 = vsel %vm838_vm3, %v2303_v62, %v8443_v41  ;;  %v2706_v47 = vmax.f32 %v2426_v56, %v2581_v14  ;;  %v2587_v31 = vrot.slane %v2431_v57, 2  ;;  %v2802_v55 = vrot.slane %v7365_v58, 4 }
 0x252   : > { %v2429_v15 = vmax.f32 %v2149_v22, %v2306_v2  ;;  %v2803_v13 = vrot.slane %v2149_v22, 4  ;;  %v2925_v52 = vmax.f32 %v2705_v0, %v2799_v26  ;;  %v2582_v10 = vrot.slane %v2428_v63, 2  ;;  %v8446_v2 = vld [vmem:[#allocation65_spill] sm:$0xff] }
 0x253   : > { %v2926_v44 = vmax.f32 %v2706_v47, %v2801_v25  ;;  %v2588_v21 = vrot.slane %v2432_v17, 2  ;;  %v2807_v4 = vrot.slane %v8435_v9, 4  ;;  %v2808_v56 = vrot.slane %v8433_v23, 4 }
 0x254   : > { %v2583_v51 = vrot.slane %v2429_v15, 2  ;;  %v2804_v62 = vsel %vm1608_vm5, %v2802_v55, %v2803_v13  ;;  %3962 = vst.msk [vmem:[%s4470_s27 + $0x1de] sm:$0xfc] %vm2938_vm8, %v2925_v52  ;;  %v3033_v48 = vmax.f32 %v2922_v11, %v2925_v52  ;;  %v7447_v14 = vmax.f32 %v3078_v42, %v2925_v52 }
 0x255   : > { %3963 = vst.msk [vmem:[%s4470_s27 + $0x1e6] sm:$0xff] %vm185_vm0, %v2926_v44  ;;  %v3034_v58 = vmax.f32 %v2923_v29, %v2926_v44  ;;  %v7451_v22 = vmax.f32 %v3079_v61, %v2926_v44  ;;  %v2589_v25 = vsel %vm1295_vm4, %v2587_v31, %v2588_v21  ;;  %v2809_v60 = vsel %vm1608_vm5, %v2807_v4, %v2808_v56 }
 0x256   : > { %v2584_v26 = vsel %vm1295_vm4, %v2582_v10, %v2583_v51  ;;  %v8445_v9 = vrot.slane %v8444_v36, 2  ;;  %v2711_v11 = vmax.f32 %v2431_v57, %v2589_v25  ;;  %v3081_v42 = vmax.f32 %v7373_v45, %v3033_v48 }
 0x257   : > { %v2708_v41 = vmax.f32 %v2428_v63, %v2584_v26  ;;  %v8447_v0 = vrot.slane %v8446_v2, 2  ;;  %v8448_v55 = vrot.slane %v8442_v8, 4  ;;  %v8449_v10 = vrot.slane %v8437_v40, 4 }
 0x258   : > { %v2586_v23 = vsel %vm1295_vm4, %v2583_v51, %v8445_v9  ;;  %v7469_v4 = vmax.f32 %v2711_v11, %v2809_v60  ;;  %v3082_v45 = vmax.f32 %v7379_v7, %v3034_v58  ;;  %v3186_v57 = vrot.slane %v7020_v20, 1 }
 0x259   : > { %v2591_v29 = vsel %vm1295_vm4, %v2588_v21, %v8447_v0  ;;  %v2709_v61 = vmax.f32 %v2429_v15, %v2586_v23  ;;  %v2806_v31 = vsel %vm1608_vm5, %v2803_v13, %v8448_v55  ;;  %v2811_v51 = vsel %vm1608_vm5, %v2808_v56, %v8449_v10  ;;  %v8453_v10 = vld [vmem:[#allocation37_spill] sm:$0xff] }
 0x25a   : > { %v2712_v47 = vmax.f32 %v2432_v17, %v2591_v29  ;;  %v2928_v63 = vmax.f32 %v2708_v41, %v2804_v62  ;;  %v3187_v15 = vrot.slane %v7026_v38, 1  ;;  %v3554_v8 = vrot.slane %v7020_v20, 4 }
 0x25b   : > { %v2929_v26 = vmax.f32 %v2709_v61, %v2806_v31  ;;  %v3555_v62 = vrot.slane %v7026_v38, 4 }
 0x25c   : > { %v7473_v21 = vmax.f32 %v2712_v47, %v2811_v51  ;;  %3965 = vst.msk [vmem:[%s4470_s27 + $0x1ee] sm:$0xfc] %vm2938_vm8, %v2928_v63  ;;  %v3036_v17 = vmax.f32 %v2925_v52, %v2928_v63  ;;  %v3039_v40 = vmax.f32 %v2928_v63, %v7469_v4  ;;  %v7480_v13 = vmax.f32 %v3081_v42, %v2928_v63  ;;  %v8450_v52 = vld [vmem:[#allocation35_spill] sm:$0xff] }
 0x25d   : > { %3966 = vst.msk [vmem:[%s4470_s27 + $0x1f6] sm:$0xff] %vm185_vm0, %v2929_v26  ;;  %v3037_v7 = vmax.f32 %v2926_v44, %v2929_v26  ;;  %v7486_v25 = vmax.f32 %v3082_v45, %v2929_v26  ;;  %v3188_v60 = vsel %vm838_vm3, %v3186_v57, %v3187_v15  ;;  %v8451_v23 = vrot.slane %v8450_v52, 1 }
 0x25e   : > { %v3040_v56 = vmax.f32 %v2929_v26, %v7473_v21  ;;  %v7490_v36 = vmax.f32 %v7406_v46, %v3036_v17  ;;  %v7492_v9 = vmax.f32 %v3033_v48, %v3039_v40  ;;  %v3298_v11 = vmax.f32 %v7020_v20, %v3188_v60 }
 0x25f   : > { %v3190_v41 = vsel %vm838_vm3, %v3187_v15, %v8451_v23  ;;  %v7499_v42 = vmax.f32 %v7412_v12, %v3037_v7  ;;  %v3556_v0 = vsel %vm1608_vm5, %v3554_v8, %v3555_v62  ;;  %v8452_v46 = vmov %v8451_v23 }
 0x260   : > { %v7501_v44 = vmax.f32 %v3034_v58, %v3040_v56  ;;  %v3299_v2 = vmax.f32 %v7026_v38, %v3190_v41  ;;  %v3410_v29 = vrot.slane %v3298_v11, 2  ;;  %v3346_v48 = vmax.f32 %v8450_v52, %v8452_v46 }
 0x261   : > { %v3557_v61 = vrot.slane %v8450_v52, 4  ;;  %v3191_v47 = vrot.slane %v7058_v53, 1  ;;  %v3192_v20 = vrot.slane %v7064_v24, 1  ;;  %v3559_v12 = vrot.slane %v7058_v53, 4 }
 0x262   : > { %v3411_v55 = vrot.slane %v3299_v2, 2  ;;  %v3560_v58 = vrot.slane %v7064_v24, 4  ;;  %v3413_v31 = vrot.slane %v3346_v48, 2  ;;  %v8454_v51 = vrot.slane %v8453_v10, 1 }
 0x263   : > { %v3558_v38 = vsel %vm1608_vm5, %v3555_v62, %v3557_v61  ;;  %v3562_v45 = vrot.slane %v8453_v10, 4  ;;  %v3193_v26 = vsel %vm838_vm3, %v3191_v47, %v3192_v20  ;;  %v3196_v41 = vrot.slane %v7092_v3, 1 }
 0x264   : > { %v3347_v63 = vmax.f32 %v8453_v10, %v8454_v51  ;;  %v3412_v57 = vsel %vm1295_vm4, %v3410_v29, %v3411_v55  ;;  %v8455_v15 = vmov %v8454_v51  ;;  %v3561_v17 = vsel %vm1608_vm5, %v3559_v12, %v3560_v58 }
 0x265   : > { %v3195_v8 = vsel %vm838_vm3, %v3192_v20, %v8455_v15  ;;  %v3522_v40 = vmax.f32 %v3298_v11, %v3412_v57  ;;  %v3414_v62 = vsel %vm1295_vm4, %v3411_v55, %v3413_v31  ;;  %v3300_v7 = vmax.f32 %v7058_v53, %v3193_v26  ;;  %v8456_v53 = vld [vmem:[#allocation39_spill] sm:$0xff] }
 0x266   : > { %v3301_v56 = vmax.f32 %v7064_v24, %v3195_v8  ;;  %v3523_v60 = vmax.f32 %v3299_v2, %v3414_v62  ;;  %v3418_v52 = vrot.slane %v3347_v63, 2  ;;  %v3563_v23 = vsel %vm1608_vm5, %v3560_v58, %v3562_v45 }
 0x267   : > { %v3666_v29 = vmax.f32 %v3522_v40, %v3556_v0  ;;  %v3415_v46 = vrot.slane %v3300_v7, 2  ;;  %v3197_v61 = vrot.slane %v7098_v50, 1  ;;  %v3564_v47 = vrot.slane %v7092_v3, 4 }
 0x268   : > { %v3416_v48 = vrot.slane %v3301_v56, 2  ;;  %v3667_v11 = vmax.f32 %v3523_v60, %v3558_v38  ;;  %v3565_v55 = vrot.slane %v7098_v50, 4  ;;  %v8457_v20 = vrot.slane %v8456_v53, 1 }
 0x269   : > { %3698 = vst.msk [vmem:[%s4470_s27] sm:$0xff] %vm185_vm0, %v3666_v29  ;;  %v3198_v0 = vsel %vm838_vm3, %v3196_v41, %v3197_v61  ;;  %v3567_v26 = vrot.slane %v8456_v53, 4  ;;  %v3201_v15 = vrot.slane %v7126_v59, 1 }
 0x26a   : > { %v3348_v24 = vmax.f32 %v8456_v53, %v8457_v20  ;;  %v3417_v2 = vsel %vm1295_vm4, %v3415_v46, %v3416_v48  ;;  %v3419_v12 = vsel %vm1295_vm4, %v3416_v48, %v3418_v52  ;;  %v8458_v58 = vmov %v8457_v20  ;;  %3699 = vst.msk [vmem:[%s4470_s27 + $0x8] sm:$0xff] %vm185_vm0, %v3667_v11 }
 0x26b   : > { %v3200_v31 = vsel %vm838_vm3, %v3197_v61, %v8458_v58  ;;  %v3524_v38 = vmax.f32 %v3300_v7, %v3417_v2  ;;  %v3525_v10 = vmax.f32 %v3301_v56, %v3419_v12  ;;  %v3302_v51 = vmax.f32 %v7092_v3, %v3198_v0 }
 0x26c   : > { %v3303_v63 = vmax.f32 %v7098_v50, %v3200_v31  ;;  %v3566_v45 = vsel %vm1608_vm5, %v3564_v47, %v3565_v55  ;;  %v3423_v57 = vrot.slane %v3348_v24, 2  ;;  %v3568_v7 = vsel %vm1608_vm5, %v3565_v55, %v3567_v26 }
 0x26d   : > { %v3668_v8 = vmax.f32 %v3524_v38, %v3561_v17  ;;  %v3669_v40 = vmax.f32 %v3525_v10, %v3563_v23  ;;  %v3420_v62 = vrot.slane %v3302_v51, 2  ;;  %v3202_v56 = vrot.slane %v7132_v32, 1  ;;  %v8459_v17 = vld [vmem:[#allocation41_spill] sm:$0xff] }
 0x26e   : > { %v3421_v60 = vrot.slane %v3303_v63, 2  ;;  %v3569_v52 = vrot.slane %v7126_v59, 4  ;;  %v3570_v3 = vrot.slane %v7132_v32, 4  ;;  %v8460_v23 = vrot.slane %v8459_v17, 1 }
 0x26f   : > { %3700 = vst.msk [vmem:[%s4470_s27 + $0x10] sm:$0xff] %vm185_vm0, %v3668_v8  ;;  %3701 = vst.msk [vmem:[%s4470_s27 + $0x18] sm:$0xff] %vm185_vm0, %v3669_v40  ;;  %v3572_v46 = vrot.slane %v8459_v17, 4  ;;  %v3203_v11 = vsel %vm838_vm3, %v3201_v15, %v3202_v56  ;;  %v3206_v31 = vrot.slane %v7160_v43, 1  ;;  %v3211_v15 = vrot.slane %v7194_v19, 1 }
 0x270   : > { %v3422_v50 = vsel %vm1295_vm4, %v3420_v62, %v3421_v60  ;;  %v3424_v41 = vsel %vm1295_vm4, %v3421_v60, %v3423_v57  ;;  %v3349_v29 = vmax.f32 %v8459_v17, %v8460_v23  ;;  %v8461_v47 = vmov %v8460_v23 }
 0x271   : > { %v3526_v48 = vmax.f32 %v3302_v51, %v3422_v50  ;;  %v3527_v61 = vmax.f32 %v3303_v63, %v3424_v41  ;;  %v3205_v55 = vsel %vm838_vm3, %v3202_v56, %v8461_v47  ;;  %v3304_v53 = vmax.f32 %v7126_v59, %v3203_v11 }
 0x272   : > { %v3305_v20 = vmax.f32 %v7132_v32, %v3205_v55  ;;  %v3571_v24 = vsel %vm1608_vm5, %v3569_v52, %v3570_v3  ;;  %v3428_v2 = vrot.slane %v3349_v29, 2  ;;  %v3573_v58 = vsel %vm1608_vm5, %v3570_v3, %v3572_v46  ;;  %v8462_v32 = vld [vmem:[#allocation45_spill] sm:$0xff] }
 0x273   : > { %v3670_v12 = vmax.f32 %v3526_v48, %v3566_v45  ;;  %v3671_v0 = vmax.f32 %v3527_v61, %v3568_v7  ;;  %v3425_v38 = vrot.slane %v3304_v53, 2  ;;  %v3207_v51 = vrot.slane %v7166_v34, 1  ;;  %v8465_v55 = vld [vmem:[#allocation49_spill] sm:$0xff] }
 0x274   : > { %v3426_v10 = vrot.slane %v3305_v20, 2  ;;  %v3574_v63 = vrot.slane %v7160_v43, 4  ;;  %v3575_v59 = vrot.slane %v7166_v34, 4  ;;  %v8463_v57 = vrot.slane %v8462_v32, 1 }
 0x275   : > { %3702 = vst.msk [vmem:[%s4470_s27 + $0x20] sm:$0xff] %vm185_vm0, %v3670_v12  ;;  %3703 = vst.msk [vmem:[%s4470_s27 + $0x28] sm:$0xff] %vm185_vm0, %v3671_v0  ;;  %v3577_v26 = vrot.slane %v8462_v32, 4  ;;  %v3208_v62 = vsel %vm838_vm3, %v3206_v31, %v3207_v51  ;;  %v3212_v29 = vrot.slane %v7200_v35, 1 }
 0x276   : > { %v3350_v45 = vmax.f32 %v8462_v32, %v8463_v57  ;;  %v3427_v8 = vsel %vm1295_vm4, %v3425_v38, %v3426_v10  ;;  %v3429_v40 = vsel %vm1295_vm4, %v3426_v10, %v3428_v2  ;;  %v8464_v60 = vmov %v8463_v57 }
 0x277   : > { %v3210_v7 = vsel %vm838_vm3, %v3207_v51, %v8464_v60  ;;  %v3528_v56 = vmax.f32 %v3304_v53, %v3427_v8  ;;  %v3529_v52 = vmax.f32 %v3305_v20, %v3429_v40  ;;  %v3306_v3 = vmax.f32 %v7160_v43, %v3208_v62 }
 0x278   : > { %v3307_v50 = vmax.f32 %v7166_v34, %v3210_v7  ;;  %v3576_v41 = vsel %vm1608_vm5, %v3574_v63, %v3575_v59  ;;  %v3433_v17 = vrot.slane %v3350_v45, 2  ;;  %v3578_v23 = vsel %vm1608_vm5, %v3575_v59, %v3577_v26 }
 0x279   : > { %v3672_v46 = vmax.f32 %v3528_v56, %v3571_v24  ;;  %v3673_v48 = vmax.f32 %v3529_v52, %v3573_v58  ;;  %v3430_v61 = vrot.slane %v3306_v3, 2  ;;  %v3213_v47 = vsel %vm838_vm3, %v3211_v15, %v3212_v29  ;;  %v8468_v52 = vld [vmem:[#allocation42_spill] sm:$0xff] }
 0x27a   : > { %v3431_v11 = vrot.slane %v3307_v50, 2  ;;  %v8466_v53 = vrot.slane %v8465_v55, 1  ;;  %v3579_v43 = vrot.slane %v7194_v19, 4  ;;  %v3580_v34 = vrot.slane %v7200_v35, 4 }
 0x27b   : > { %3704 = vst.msk [vmem:[%s4470_s27 + $0x30] sm:$0xff] %vm185_vm0, %v3672_v46  ;;  %3705 = vst.msk [vmem:[%s4470_s27 + $0x38] sm:$0xff] %vm185_vm0, %v3673_v48  ;;  %v3308_v12 = vmax.f32 %v7194_v19, %v3213_v47  ;;  %v3582_v32 = vrot.slane %v8465_v55, 4  ;;  %v3216_v57 = vrot.slane %v7228_v28, 1  ;;  %v3584_v40 = vrot.slane %v7228_v28, 4 }
 0x27c   : > { %v3215_v20 = vsel %vm838_vm3, %v3212_v29, %v8466_v53  ;;  %v3432_v2 = vsel %vm1295_vm4, %v3430_v61, %v3431_v11  ;;  %v3434_v24 = vsel %vm1295_vm4, %v3431_v11, %v3433_v17  ;;  %v3581_v38 = vsel %vm1608_vm5, %v3579_v43, %v3580_v34 }
 0x27d   : > { %v3309_v0 = vmax.f32 %v7200_v35, %v3215_v20  ;;  %v3530_v58 = vmax.f32 %v3306_v3, %v3432_v2  ;;  %v3531_v31 = vmax.f32 %v3307_v50, %v3434_v24  ;;  %v8467_v10 = vmov %v8466_v53 }
 0x27e   : > { %v3351_v51 = vmax.f32 %v8465_v55, %v8467_v10  ;;  %v3435_v63 = vrot.slane %v3308_v12, 2  ;;  %v3217_v35 = vrot.slane %v7234_v54, 1  ;;  %v3583_v8 = vsel %vm1608_vm5, %v3580_v34, %v3582_v32 }
 0x27f   : > { %v3436_v59 = vrot.slane %v3309_v0, 2  ;;  %v3674_v45 = vmax.f32 %v3530_v58, %v3576_v41  ;;  %v3675_v19 = vmax.f32 %v3531_v31, %v3578_v23  ;;  %v3585_v62 = vrot.slane %v7234_v54, 4 }
 0x280   : > { %v3438_v26 = vrot.slane %v3351_v51, 2  ;;  %v3218_v56 = vsel %vm838_vm3, %v3216_v57, %v3217_v35  ;;  %v8469_v3 = vrot.slane %v8468_v52, 1  ;;  %v3587_v11 = vrot.slane %v8468_v52, 4 }
 0x281   : > { %v3437_v15 = vsel %vm1295_vm4, %v3435_v63, %v3436_v59  ;;  %3706 = vst.msk [vmem:[%s4470_s27 + $0x40] sm:$0xff] %vm185_vm0, %v3674_v45  ;;  %3707 = vst.msk [vmem:[%s4470_s27 + $0x48] sm:$0xff] %vm185_vm0, %v3675_v19  ;;  %v3310_v17 = vmax.f32 %v7228_v28, %v3218_v56  ;;  %v3586_v29 = vsel %vm1608_vm5, %v3584_v40, %v3585_v62  ;;  %v3221_v47 = vrot.slane %v7262_v30, 1 }
 0x282   : > { %v3532_v60 = vmax.f32 %v3308_v12, %v3437_v15  ;;  %v3439_v7 = vsel %vm1295_vm4, %v3436_v59, %v3438_v26  ;;  %v3220_v50 = vsel %vm838_vm3, %v3217_v35, %v8469_v3  ;;  %v8470_v48 = vmov %v8469_v3  ;;  %v8474_v3 = vld [vmem:[#allocation61_spill] sm:$0xff] }
 0x283   : > { %v3533_v41 = vmax.f32 %v3309_v0, %v3439_v7  ;;  %v3311_v23 = vmax.f32 %v7234_v54, %v3220_v50  ;;  %v3352_v61 = vmax.f32 %v8468_v52, %v8470_v48  ;;  %v3440_v53 = vrot.slane %v3310_v17, 2  ;;  %v8471_v0 = vld [vmem:[#allocation51_spill] sm:$0xff] }
 0x284   : > { %v3676_v46 = vmax.f32 %v3532_v60, %v3581_v38  ;;  %v3222_v43 = vrot.slane %v7268_v37, 1  ;;  %v3588_v54 = vsel %vm1608_vm5, %v3585_v62, %v3587_v11  ;;  %v3589_v34 = vrot.slane %v7262_v30, 4 }
 0x285   : > { %v3677_v55 = vmax.f32 %v3533_v41, %v3583_v8  ;;  %v3441_v20 = vrot.slane %v3311_v23, 2  ;;  %v3443_v28 = vrot.slane %v3352_v61, 2  ;;  %v3590_v2 = vrot.slane %v7268_v37, 4 }
 0x286   : > { %3708 = vst.msk [vmem:[%s4470_s27 + $0x50] sm:$0xff] %vm185_vm0, %v3676_v46  ;;  %v3223_v12 = vsel %vm838_vm3, %v3221_v47, %v3222_v43  ;;  %v8472_v58 = vrot.slane %v8471_v0, 1  ;;  %v3592_v26 = vrot.slane %v8471_v0, 4  ;;  %v3226_v40 = vrot.slane %v7296_v27, 1 }
 0x287   : > { %3709 = vst.msk [vmem:[%s4470_s27 + $0x58] sm:$0xff] %vm185_vm0, %v3677_v55  ;;  %v3442_v24 = vsel %vm1295_vm4, %v3440_v53, %v3441_v20  ;;  %v3444_v63 = vsel %vm1295_vm4, %v3441_v20, %v3443_v28  ;;  %v3312_v59 = vmax.f32 %v7262_v30, %v3223_v12  ;;  %v3591_v45 = vsel %vm1608_vm5, %v3589_v34, %v3590_v2  ;;  %v8477_v12 = vld [vmem:[#allocation59_spill] sm:$0xff] }
 0x288   : > { %v3225_v31 = vsel %vm838_vm3, %v3222_v43, %v8472_v58  ;;  %v8473_v38 = vmov %v8472_v58  ;;  %v3534_v51 = vmax.f32 %v3310_v17, %v3442_v24  ;;  %v3535_v57 = vmax.f32 %v3311_v23, %v3444_v63 }
 0x289   : > { %v3353_v10 = vmax.f32 %v8471_v0, %v8473_v38  ;;  %v3313_v32 = vmax.f32 %v7268_v37, %v3225_v31  ;;  %v3445_v15 = vrot.slane %v3312_v59, 2  ;;  %v3593_v60 = vsel %vm1608_vm5, %v3590_v2, %v3592_v26 }
 0x28a   : > { %v3678_v35 = vmax.f32 %v3534_v51, %v3586_v29  ;;  %v3679_v62 = vmax.f32 %v3535_v57, %v3588_v54  ;;  %v3227_v7 = vrot.slane %v7302_v18, 1  ;;  %v3594_v30 = vrot.slane %v7296_v27, 4 }
 0x28b   : > { %v3448_v19 = vrot.slane %v3353_v10, 2  ;;  %v3446_v8 = vrot.slane %v3313_v32, 2  ;;  %v3595_v52 = vrot.slane %v7302_v18, 4  ;;  %v8475_v50 = vrot.slane %v8474_v3, 1 }
 0x28c   : > { %3710 = vst.msk [vmem:[%s4470_s27 + $0x60] sm:$0xff] %vm185_vm0, %v3678_v35  ;;  %3711 = vst.msk [vmem:[%s4470_s27 + $0x68] sm:$0xff] %vm185_vm0, %v3679_v62  ;;  %v3228_v29 = vsel %vm838_vm3, %v3226_v40, %v3227_v7  ;;  %v3597_v43 = vrot.slane %v8474_v3, 4  ;;  %v3231_v28 = vrot.slane %v7330_v1, 1  ;;  %v3232_v2 = vrot.slane %v7336_v39, 1 }
 0x28d   : > { %v3447_v37 = vsel %vm1295_vm4, %v3445_v15, %v3446_v8  ;;  %v3449_v56 = vsel %vm1295_vm4, %v3446_v8, %v3448_v19  ;;  %v3354_v41 = vmax.f32 %v8474_v3, %v8475_v50  ;;  %v8476_v46 = vmov %v8475_v50 }
 0x28e   : > { %v3536_v17 = vmax.f32 %v3312_v59, %v3447_v37  ;;  %v3537_v23 = vmax.f32 %v3313_v32, %v3449_v56  ;;  %v3230_v48 = vsel %vm838_vm3, %v3227_v7, %v8476_v46  ;;  %v3314_v61 = vmax.f32 %v7296_v27, %v3228_v29 }
 0x28f   : > { %v3315_v11 = vmax.f32 %v7302_v18, %v3230_v48  ;;  %v3596_v47 = vsel %vm1608_vm5, %v3594_v30, %v3595_v52  ;;  %v3453_v55 = vrot.slane %v3354_v41, 2  ;;  %v3599_v24 = vrot.slane %v7330_v1, 4 }
 0x290   : > { %v3680_v53 = vmax.f32 %v3536_v17, %v3591_v45  ;;  %v3681_v20 = vmax.f32 %v3537_v23, %v3593_v60  ;;  %v3450_v54 = vrot.slane %v3314_v61, 2  ;;  %v3598_v27 = vsel %vm1608_vm5, %v3595_v52, %v3597_v43 }
 0x291   : > { %v3451_v34 = vrot.slane %v3315_v11, 2  ;;  %v3600_v18 = vrot.slane %v7336_v39, 4  ;;  %v8478_v0 = vrot.slane %v8477_v12, 1  ;;  %v3602_v31 = vrot.slane %v8477_v12, 4 }
 0x292   : > { %3712 = vst.msk [vmem:[%s4470_s27 + $0x70] sm:$0xff] %vm185_vm0, %v3680_v53  ;;  %3713 = vst.msk [vmem:[%s4470_s27 + $0x78] sm:$0xff] %vm185_vm0, %v3681_v20  ;;  %v3233_v51 = vsel %vm838_vm3, %v3231_v28, %v3232_v2  ;;  %v3236_v8 = vrot.slane %v7375_v16, 1  ;;  %v3237_v30 = vrot.slane %v7381_v33, 1  ;;  %v3604_v37 = vrot.slane %v7375_v16, 4 }
 0x293   : > { %v3355_v58 = vmax.f32 %v8477_v12, %v8478_v0  ;;  %v3452_v38 = vsel %vm1295_vm4, %v3450_v54, %v3451_v34  ;;  %v3454_v10 = vsel %vm1295_vm4, %v3451_v34, %v3453_v55  ;;  %v8479_v63 = vmov %v8478_v0 }
 0x294   : > { %v3235_v59 = vsel %vm838_vm3, %v3232_v2, %v8479_v63  ;;  %v3538_v32 = vmax.f32 %v3314_v61, %v3452_v38  ;;  %v3539_v57 = vmax.f32 %v3315_v11, %v3454_v10  ;;  %v3316_v45 = vmax.f32 %v7330_v1, %v3233_v51  ;;  %v8480_v1 = vld [vmem:[#allocation25_spill] sm:$0xff] }
 0x295   : > { %v3317_v19 = vmax.f32 %v7336_v39, %v3235_v59  ;;  %v3601_v26 = vsel %vm1608_vm5, %v3599_v24, %v3600_v18  ;;  %v3458_v35 = vrot.slane %v3355_v58, 2  ;;  %v3603_v15 = vsel %vm1608_vm5, %v3600_v18, %v3602_v31 }
 0x296   : > { %v3682_v40 = vmax.f32 %v3538_v32, %v3596_v47  ;;  %v3683_v62 = vmax.f32 %v3539_v57, %v3598_v27  ;;  %v3455_v60 = vrot.slane %v3316_v45, 2  ;;  %v3605_v56 = vrot.slane %v7381_v33, 4 }
 0x297   : > { %v3456_v7 = vrot.slane %v3317_v19, 2  ;;  %v8481_v52 = vrot.slane %v8480_v1, 1  ;;  %v3607_v41 = vrot.slane %v8480_v1, 4  ;;  %v3241_v17 = vrot.slane %v7408_v5, 1 }
 0x298   : > { %3714 = vst.msk [vmem:[%s4470_s27 + $0x80] sm:$0xff] %vm185_vm0, %v3682_v40  ;;  %3715 = vst.msk [vmem:[%s4470_s27 + $0x88] sm:$0xff] %vm185_vm0, %v3683_v62  ;;  %v3238_v46 = vsel %vm838_vm3, %v3236_v8, %v3237_v30  ;;  %v3606_v55 = vsel %vm1608_vm5, %v3604_v37, %v3605_v56  ;;  %v3242_v54 = vrot.slane %v7414_v6, 1  ;;  %v3609_v24 = vrot.slane %v7408_v5, 4 }
 0x299   : > { %v3356_v39 = vmax.f32 %v8480_v1, %v8481_v52  ;;  %v3457_v3 = vsel %vm1295_vm4, %v3455_v60, %v3456_v7  ;;  %v3459_v50 = vsel %vm1295_vm4, %v3456_v7, %v3458_v35  ;;  %v8482_v48 = vmov %v8481_v52 }
 0x29a   : > { %v3540_v23 = vmax.f32 %v3316_v45, %v3457_v3  ;;  %v3541_v29 = vmax.f32 %v3317_v19, %v3459_v50  ;;  %v3240_v61 = vsel %vm838_vm3, %v3237_v30, %v8482_v48  ;;  %v3318_v11 = vmax.f32 %v7375_v16, %v3238_v46  ;;  %v8486_v30 = vld [vmem:[#allocation72_spill] sm:$0xff] }
 0x29b   : > { %v3319_v47 = vmax.f32 %v7381_v33, %v3240_v61  ;;  %v3463_v53 = vrot.slane %v3356_v39, 2  ;;  %v3608_v28 = vsel %vm1608_vm5, %v3605_v56, %v3607_v41  ;;  %v3610_v27 = vrot.slane %v7414_v6, 4  ;;  %v8483_v33 = vld [vmem:[#allocation68_spill] sm:$0xff] }
 0x29c   : > { %v3684_v20 = vmax.f32 %v3540_v23, %v3601_v26  ;;  %v3685_v43 = vmax.f32 %v3541_v29, %v3603_v15  ;;  %v3460_v34 = vrot.slane %v3318_v11, 2  ;;  %v3243_v16 = vsel %vm838_vm3, %v3241_v17, %v3242_v54 }
 0x29d   : > { %v3461_v2 = vrot.slane %v3319_v47, 2  ;;  %v8484_v18 = vrot.slane %v8483_v33, 1  ;;  %v3612_v31 = vrot.slane %v8483_v33, 4  ;;  %v3320_v51 = vmax.f32 %v7408_v5, %v3243_v16 }
 0x29e   : > { %3716 = vst.msk [vmem:[%s4470_s27 + $0x90] sm:$0xff] %vm185_vm0, %v3684_v20  ;;  %3717 = vst.msk [vmem:[%s4470_s27 + $0x98] sm:$0xff] %vm185_vm0, %v3685_v43  ;;  %v3611_v57 = vsel %vm1608_vm5, %v3609_v24, %v3610_v27  ;;  %v3246_v15 = vrot.slane %v7447_v14, 1  ;;  %v3247_v62 = vrot.slane %v7451_v22, 1  ;;  %v3614_v5 = vrot.slane %v7447_v14, 4 }
 0x29f   : > { %v3245_v12 = vsel %vm838_vm3, %v3242_v54, %v8484_v18  ;;  %v8485_v0 = vmov %v8484_v18  ;;  %v3462_v38 = vsel %vm1295_vm4, %v3460_v34, %v3461_v2  ;;  %v3464_v10 = vsel %vm1295_vm4, %v3461_v2, %v3463_v53 }
 0x2a0   : > { %v3357_v58 = vmax.f32 %v8483_v33, %v8485_v0  ;;  %v3321_v63 = vmax.f32 %v7414_v6, %v3245_v12  ;;  %v3542_v59 = vmax.f32 %v3318_v11, %v3462_v38  ;;  %v3543_v32 = vmax.f32 %v3319_v47, %v3464_v10 }
 0x2a1   : > { %v3465_v19 = vrot.slane %v3320_v51, 2  ;;  %v3613_v35 = vsel %vm1608_vm5, %v3610_v27, %v3612_v31  ;;  %v3615_v7 = vrot.slane %v7451_v22, 4  ;;  %v8487_v37 = vrot.slane %v8486_v30, 1 }
 0x2a2   : > { %v3468_v45 = vrot.slane %v3357_v58, 2  ;;  %v3466_v26 = vrot.slane %v3321_v63, 2  ;;  %v3686_v8 = vmax.f32 %v3542_v59, %v3606_v55  ;;  %v3687_v40 = vmax.f32 %v3543_v32, %v3608_v28 }
 0x2a3   : > { %v3358_v56 = vmax.f32 %v8486_v30, %v8487_v37  ;;  %v3248_v39 = vsel %vm838_vm3, %v3246_v15, %v3247_v62  ;;  %v8488_v3 = vmov %v8487_v37  ;;  %v3616_v23 = vsel %vm1608_vm5, %v3614_v5, %v3615_v7  ;;  %v8494_v15 = vld [vmem:[#allocation18_spill] sm:$0xff] }
 0x2a4   : > { %v3467_v6 = vsel %vm1295_vm4, %v3465_v19, %v3466_v26  ;;  %v3469_v60 = vsel %vm1295_vm4, %v3466_v26, %v3468_v45  ;;  %3718 = vst.msk [vmem:[%s4470_s27 + $0xa0] sm:$0xff] %vm185_vm0, %v3686_v8  ;;  %3719 = vst.msk [vmem:[%s4470_s27 + $0xa8] sm:$0xff] %vm185_vm0, %v3687_v40  ;;  %v3250_v50 = vsel %vm838_vm3, %v3247_v62, %v8488_v3  ;;  %v3617_v61 = vrot.slane %v8486_v30, 4  ;;  %v8491_v45 = vld [vmem:[#allocation16_spill] sm:$0xff] }
 0x2a5   : > { %v3544_v1 = vmax.f32 %v3320_v51, %v3467_v6  ;;  %v3545_v52 = vmax.f32 %v3321_v63, %v3469_v60  ;;  %v3322_v41 = vmax.f32 %v7447_v14, %v3248_v39  ;;  %v3323_v17 = vmax.f32 %v7451_v22, %v3250_v50  ;;  %v8496_v60 = vld [vmem:[#allocation33_spill] sm:$0xff] }
 0x2a6   : > { %v3473_v29 = vrot.slane %v3358_v56, 2  ;;  %v3251_v11 = vrot.slane %v7480_v13, 1  ;;  %v3252_v53 = vrot.slane %v7486_v25, 1  ;;  %v3619_v20 = vrot.slane %v7480_v13, 4 }
 0x2a7   : > { %v3688_v46 = vmax.f32 %v3544_v1, %v3611_v57  ;;  %v3689_v48 = vmax.f32 %v3545_v52, %v3613_v35  ;;  %v3470_v47 = vrot.slane %v3322_v41, 2  ;;  %v3471_v55 = vrot.slane %v3323_v17, 2 }
 0x2a8   : > { %v3618_v14 = vsel %vm1608_vm5, %v3615_v7, %v3617_v61  ;;  %v3620_v22 = vrot.slane %v7486_v25, 4  ;;  %v8489_v43 = vrot.slane %v6877_v49, 1  ;;  %v3622_v54 = vrot.slane %v6877_v49, 4 }
 0x2a9   : > { %3720 = vst.msk [vmem:[%s4470_s27 + $0xb0] sm:$0xff] %vm185_vm0, %v3688_v46  ;;  %3721 = vst.msk [vmem:[%s4470_s27 + $0xb8] sm:$0xff] %vm185_vm0, %v3689_v48  ;;  %v3472_v34 = vsel %vm1295_vm4, %v3470_v47, %v3471_v55  ;;  %v3474_v2 = vsel %vm1295_vm4, %v3471_v55, %v3473_v29  ;;  %v3253_v24 = vsel %vm838_vm3, %v3251_v11, %v3252_v53  ;;  %v8495_v8 = vrot.slane %v8494_v15, 1 }
 0x2aa   : > { %v3359_v28 = vmax.f32 %v6877_v49, %v8489_v43  ;;  %v8490_v27 = vmov %v8489_v43  ;;  %v3546_v33 = vmax.f32 %v3322_v41, %v3472_v34  ;;  %v3547_v18 = vmax.f32 %v3323_v17, %v3474_v2 }
 0x2ab   : > { %v3255_v16 = vsel %vm838_vm3, %v3252_v53, %v8490_v27  ;;  %v3324_v12 = vmax.f32 %v7480_v13, %v3253_v24  ;;  %v3621_v58 = vsel %vm1608_vm5, %v3619_v20, %v3620_v22  ;;  %v3623_v38 = vsel %vm1608_vm5, %v3620_v22, %v3622_v54  ;;  %v8500_v24 = vld [vmem:[#allocation31_spill] sm:$0xff] }
 0x2ac   : > { %v3325_v0 = vmax.f32 %v7486_v25, %v3255_v16  ;;  %v3478_v31 = vrot.slane %v3359_v28, 2  ;;  %v3132_v10 = vmax.f32 %v7490_v36, %v7469_v4  ;;  %v3690_v51 = vmax.f32 %v3546_v33, %v3616_v23  ;;  %v8492_v36 = vld [vmem:[#allocation74_spill] sm:$0xff] }
 0x2ad   : > { %v3691_v49 = vmax.f32 %v3547_v18, %v3618_v14  ;;  %v3475_v63 = vrot.slane %v3324_v12, 2  ;;  %v3133_v32 = vmax.f32 %v7499_v42, %v7473_v21  ;;  %v3259_v13 = vrot.slane %v8491_v45, 1 }
 0x2ae   : > { %v3476_v59 = vrot.slane %v3325_v0, 2  ;;  %v3256_v57 = vrot.slane %v3132_v10, 1  ;;  %v3624_v19 = vrot.slane %v3132_v10, 4  ;;  %3722 = vst.msk [vmem:[%s4470_s27 + $0xc0] sm:$0xff] %vm185_vm0, %v3690_v51  ;;  %v3627_v4 = vrot.slane %v8491_v45, 4 }
 0x2af   : > { %3723 = vst.msk [vmem:[%s4470_s27 + $0xc8] sm:$0xff] %vm185_vm0, %v3691_v49  ;;  %v8493_v35 = vrot.slane %v8492_v36, 1  ;;  %v3257_v62 = vrot.slane %v3133_v32, 1  ;;  %v3625_v5 = vrot.slane %v3133_v32, 4  ;;  %v3360_v6 = vmax.f32 %v8491_v45, %v3259_v13 }
 0x2b0   : > { %v3477_v25 = vsel %vm1295_vm4, %v3475_v63, %v3476_v59  ;;  %v3479_v26 = vsel %vm1295_vm4, %v3476_v59, %v3478_v31  ;;  %v8497_v7 = vrot.slane %v8496_v60, 1  ;;  %v2812_v1 = vrot.slane %v8494_v15, 4 }
 0x2b1   : > { %v2314_v21 = vsel %vm838_vm3, %v8495_v8, %v8493_v35  ;;  %v3548_v42 = vmax.f32 %v3324_v12, %v3477_v25  ;;  %v3549_v40 = vmax.f32 %v3325_v0, %v3479_v26  ;;  %v8498_v30 = vmov %v8493_v35 }
 0x2b2   : > { %v2316_v37 = vsel %vm838_vm3, %v8498_v30, %v8497_v7  ;;  %v2434_v56 = vmax.f32 %v8494_v15, %v2314_v21  ;;  %v3258_v3 = vsel %vm838_vm3, %v3256_v57, %v3257_v62  ;;  %v3260_v50 = vsel %vm838_vm3, %v3257_v62, %v3259_v13 }
 0x2b3   : > { %v3692_v52 = vmax.f32 %v3548_v42, %v3621_v58  ;;  %v3693_v39 = vmax.f32 %v3549_v40, %v3623_v38  ;;  %v3326_v41 = vmax.f32 %v3132_v10, %v3258_v3  ;;  %v3327_v17 = vmax.f32 %v3133_v32, %v3260_v50  ;;  %v8502_v38 = vld [vmem:[#allocation22_spill] sm:$0xff] }
 0x2b4   : > { %v3626_v23 = vsel %vm1608_vm5, %v3624_v19, %v3625_v5  ;;  %v3628_v29 = vsel %vm1608_vm5, %v3625_v5, %v3627_v4  ;;  %v2435_v46 = vmax.f32 %v8492_v36, %v2316_v37  ;;  %v2592_v48 = vrot.slane %v2434_v56, 2 }
 0x2b5   : > { %3724 = vst.msk [vmem:[%s4470_s27 + $0xd0] sm:$0xff] %vm185_vm0, %v3692_v52  ;;  %3725 = vst.msk [vmem:[%s4470_s27 + $0xd8] sm:$0xff] %vm185_vm0, %v3693_v39  ;;  %v2813_v61 = vrot.slane %v8492_v36, 4  ;;  %v3480_v11 = vrot.slane %v3326_v41, 2  ;;  %v3481_v47 = vrot.slane %v3327_v17, 2  ;;  %v3483_v55 = vrot.slane %v3360_v6, 2 }
 0x2b6   : > { %v2593_v53 = vrot.slane %v2435_v46, 2  ;;  %v8499_v14 = vrot.slane %v8496_v60, 4  ;;  %v8501_v27 = vrot.slane %v8500_v24, 2  ;;  %v3264_v10 = vrot.slane %v8502_v38, 1 }
 0x2b7   : > { %v2814_v20 = vsel %vm1608_vm5, %v2812_v1, %v2813_v61  ;;  %v3482_v43 = vsel %vm1295_vm4, %v3480_v11, %v3481_v47  ;;  %v3484_v28 = vsel %vm1295_vm4, %v3481_v47, %v3483_v55  ;;  %v3632_v63 = vrot.slane %v8502_v38, 4 }
 0x2b8   : > { %v2816_v22 = vsel %vm1608_vm5, %v2813_v61, %v8499_v14  ;;  %v3550_v54 = vmax.f32 %v3326_v41, %v3482_v43  ;;  %v3551_v34 = vmax.f32 %v3327_v17, %v3484_v28  ;;  %v2594_v2 = vsel %vm1295_vm4, %v2592_v48, %v2593_v53 }
 0x2b9   : > { %v2596_v16 = vsel %vm1295_vm4, %v2593_v53, %v8501_v27  ;;  %v2714_v33 = vmax.f32 %v2434_v56, %v2594_v2  ;;  %v3361_v13 = vmax.f32 %v8502_v38, %v3264_v10 }
 0x2ba   : > { %v2715_v18 = vmax.f32 %v2435_v46, %v2596_v16  ;;  %v3694_v12 = vmax.f32 %v3550_v54, %v3626_v23  ;;  %v3695_v0 = vmax.f32 %v3551_v34, %v3628_v29 }
 0x2bb   : > { %v2934_v58 = vmax.f32 %v2714_v33, %v2814_v20  ;;  %v3488_v15 = vrot.slane %v3361_v13, 2 }
 0x2bc   : > { %v2935_v31 = vmax.f32 %v2715_v18, %v2816_v22  ;;  %3726 = vst.msk [vmem:[%s4470_s27 + $0xe0] sm:$0xff] %vm185_vm0, %v3694_v12  ;;  %3727 = vst.msk [vmem:[%s4470_s27 + $0xe8] sm:$0xff] %vm185_vm0, %v3695_v0 }
 0x2bd   : > { %v3135_v51 = vmax.f32 %v7492_v9, %v2934_v58 }
 0x2be   : > { %v3136_v49 = vmax.f32 %v7501_v44, %v2935_v31 }
 0x2bf   : > { %v3261_v59 = vrot.slane %v3135_v51, 1  ;;  %v3629_v57 = vrot.slane %v3135_v51, 4 }
 0x2c0   : > { %v3262_v32 = vrot.slane %v3136_v49, 1  ;;  %v3630_v45 = vrot.slane %v3136_v49, 4 }
 0x2c2   : > { %v3263_v19 = vsel %vm838_vm3, %v3261_v59, %v3262_v32  ;;  %v3265_v25 = vsel %vm838_vm3, %v3262_v32, %v3264_v10  ;;  %v3631_v26 = vsel %vm1608_vm5, %v3629_v57, %v3630_v45  ;;  %v3633_v9 = vsel %vm1608_vm5, %v3630_v45, %v3632_v63 }
 0x2c3   : > { %v3328_v44 = vmax.f32 %v3135_v51, %v3263_v19  ;;  %v3329_v4 = vmax.f32 %v3136_v49, %v3265_v25 }
 0x2c5   : > { %v3485_v36 = vrot.slane %v3328_v44, 2  ;;  %v3486_v35 = vrot.slane %v3329_v4, 2 }
 0x2c7   : > { %v3487_v8 = vsel %vm1295_vm4, %v3485_v36, %v3486_v35  ;;  %v3489_v21 = vsel %vm1295_vm4, %v3486_v35, %v3488_v15 }
 0x2c8   : > { %v3552_v42 = vmax.f32 %v3328_v44, %v3487_v8  ;;  %v3553_v40 = vmax.f32 %v3329_v4, %v3489_v21 }
 0x2ca   : > { %v3696_v62 = vmax.f32 %v3552_v42, %v3631_v26  ;;  %v3697_v5 = vmax.f32 %v3553_v40, %v3633_v9 }
 0x2cc   : > { %3728 = vst.msk [vmem:[%s4470_s27 + $0xf0] sm:$0xff] %vm185_vm0, %v3696_v62  ;;  %3729 = vst.msk [vmem:[%s4470_s27 + $0xf8] sm:$0xff] %vm185_vm0, %v3697_v5 }
 0x2cd   : > { %4093 = shalt.err (!%p4090_p5)
}
 0x2ce   : > { %s4094_s22 = scalar_lea.hbm %s7857_s12, 16384  ;;  %s4098_s25 = scalar_lea.hbm %s7913_s1, 32768 }
 0x2cf   : > { %p4095_p4 = scmp.ne.s32.totalorder %s7857_s12, %s4094_s22  ;;  %p4099_p12 = scmp.lt.u32.totalorder %s7857_s12, %s7913_s1 }
 0x2d0   : > { %p4100_p1 = scmp.lt.u32.totalorder %s4098_s25, %s4094_s22  ;;  %p4102_p8 = scmp.lt.u32.totalorder %s4094_s22, %s7857_s12 }
 0x2d1   : > { %p4096_p7 = pnand %p4095_p4, %p8503_p9 }
 0x2d2   : > { %p4101_p3 = por %p4100_p1, %p4099_p12 }
 0x2d3   : > { %p4097_p10 = pneg %p4096_p7 }
 0x2d4   : > { %p4103_p11 = por %p4102_p8, %p4101_p3 }
 0x2d6   : > { %p4104_p0 = pnand %p4103_p11, %p4097_p10 }
 0x2d8   : > { %4107 = shalt.err (!%p4104_p0)
}
 0x2d9   : > { %s4169_s4 = smov 128   ;;  %s4170_s18 = smov 8  }
 0x2da   : > { %3977 = dma.vmem_to_hbm [thread:$0]  (%p8503_p9), %s7859_s30, 16384, %s7857_s12, %s3731_s9, %s4169_s4, %s4169_s4, %s4170_s18  }
 0x2db PF: > { %s3760_s27 = sand.u32 1, %s4142_s6   ;;  %p8504_p6 = scmp.ne.s32.totalorder %s8127_s21, 0 }
 0x2dc   : > { %p8505_p13 = scmp.ge.s32.totalorder %s4162_s11, 2  ;;  %s3761_s29 = scalar_lea.sflag [#allocation5], %s3760_s27 }
 0x2de   : > { %p3984_p2 = pnand %p8505_p13, %p8504_p6 }
 0x2e0   : > { %4137 = dma.done.wait (!%p3984_p2), %s3761_s29, 16384  }
 0x2e1   : > { %4139 = vsyncadd (!%p3984_p2), %s3761_s29, 4294950912  ;;  %s17_s11 = sadd.s32 1, %s4162_s11   ;;  %s8506_s6 = smov %s4146_s7 }
 0x2e2   : > { %p14_p5 = scmp.ge.s32.totalorder %s17_s11, 4   ;;  %s8507_s7 = smov %s4150_s8 }
 0x2e3   : > { %s8508_s8 = smov %s4237_s20  ;;  %s8509_s9 = smov %s4158_s10 }
 0x2e4   : > { %s8510_s10 = smov %s8512_s14  ;;  %16 = sbr.rel (!%p14_p5) target bundleno = 6 (0x6), region = 74 }
 0x2eb   :  { %3766 = vsyncpa [#allocation4], 1 }
 0x2ec   :  { %3768 = vsyncpa [#allocation4 + $0x1], 1 }
 0x2ed   :  { %3769 = vsyncpa [#allocation5], 1 }
 0x2ee   :  { %3771 = vsyncpa [#allocation5 + $0x1], 1 }

</bundles_post_ra>
